<compile_context>
chip_gen: v7x
topology: tpu7x:2x2x1
jax: 0.10.0
libtpu: 0.0.40
codegen_flags: <defaults>
</compile_context>

<pallas_src>
import functools
import math

import jax
import jax.numpy as jnp
from jax.experimental import pallas as pl
from jax.experimental.pallas import tpu as pltpu


# --------------------------------------------------------------------------- #
# Pallas kernel: one (batch, query-tile) slice of the full DecoderLayer.
# --------------------------------------------------------------------------- #
def _decoder_layer_kernel(*refs, num_heads, eps, q_is_full, tgt_mode, src_mode,
                          compute_dtype):
    it = iter(refs)
    ln_ref = next(it)                                   # (6,) SMEM LN scalars
    xq_ref = next(it)                                   # (Tq, D) query tile
    xkv_ref = xq_ref if q_is_full else next(it)         # (S, D) full x (K/V src)
    enc_ref = next(it)                                  # (S_enc, D) encoder out
    tbias_ref = None if tgt_mode == "causal" else next(it)
    sbias_ref = next(it)
    (wqkv1_ref, bqkv1_ref, wo1_ref, bo1_ref,
     wq2_ref, bq2_ref, wkv2_ref, bkv2_ref, wo2_ref, bo2_ref,
     w1_ref, b1_ref, w2_ref, b2_ref) = (next(it) for _ in range(14))
    o_ref = next(it)
    kv1_ref = next(it)                                  # scratch (2H, S, d_k)
    kv2_ref = next(it)                                  # scratch (2H, S_enc, d_k)

    f32 = jnp.float32
    cdt = compute_dtype
    H = num_heads
    Tq, D = xq_ref.shape
    d_k = D // H
    S1 = xkv_ref.shape[0]
    scale = 1.0 / math.sqrt(d_k)

    def layernorm(y, alpha, bias):
        # Matches torch: UNBIASED std, divide by (std + eps).
        mean = jnp.mean(y, axis=-1, keepdims=True)
        c = y - mean
        var = jnp.sum(c * c, axis=-1, keepdims=True) * (1.0 / (y.shape[-1] - 1))
        inv = pl.reciprocal(jnp.sqrt(var) + eps, approx=True)       # EUP slot
        return alpha * c * inv + bias

    def matmul(a, w, b=None):
        # compute-dtype inputs, f32 MXU accumulation; bias added in f32.
        out = jnp.dot(a.astype(cdt), w.astype(cdt), preferred_element_type=f32)
        return out if b is None else out + b

    def split_heads(a, n):
        # (L, n*d_k) -> (n, L, d_k): lane slices + leading-axis stack.  (With a
        # lane-aligned d_k >= 128 a reshape/swapaxes pair is the cheaper form.)
        return jnp.stack([a[:, j * d_k:(j + 1) * d_k] for j in range(n)], axis=0)

    def attention(q, kv_ref, bias, wo_ref, bo_ref):
        # q: (Tq, D) f32; kv_ref: (2H, Skv, d_k) cdt — K heads then V heads;
        # bias: (Tq|1, Skv) f32 additive (-1e9 at masked positions).
        kv = kv_ref[...]
        k, v = kv[:H], kv[H:]                           # (H, Skv, d_k) each
        qh = split_heads(q.astype(cdt), H)              # cast ONCE, then split
        s = jnp.einsum("hqd,hkd->hqk", qh, k,
                       preferred_element_type=f32)      # batched QK^T
        s = s * scale + bias[None]
        s = s - jnp.max(s, axis=-1, keepdims=True)
        p = jnp.exp(s)
        p = p * pl.reciprocal(jnp.sum(p, axis=-1, keepdims=True), approx=True)
        ctx = jnp.einsum("hqk,hkd->hqd", p.astype(cdt), v,
                         preferred_element_type=f32)    # batched PV
        ctx = jnp.concatenate([ctx[h] for h in range(H)], axis=-1)   # (Tq, D)
        return matmul(ctx, wo_ref[...], bo_ref[...])    # ONE (Tq,D)@(D,D)

    la0, lb0, la1, lb1, la2, lb2 = (ln_ref[i] for i in range(6))
    wqkv1 = wqkv1_ref[...]
    bqkv1 = bqkv1_ref[...]

    # ---- once per batch element (first query tile): K/V into VMEM scratch --- #
    @pl.when(pl.program_id(1) == 0)
    def _project_kv():
        kv1 = matmul(layernorm(xkv_ref[...], la0, lb0),
                     wqkv1[:, D:], bqkv1[:, D:]).astype(cdt)         # (S, 2D)
        kv2 = matmul(enc_ref[...], wkv2_ref[...],
                     bkv2_ref[...]).astype(cdt)                      # (S_enc, 2D)
        for j in range(2 * H):                                       # head-major
            kv1_ref[j] = kv1[:, j * d_k:(j + 1) * d_k]
            kv2_ref[j] = kv2[:, j * d_k:(j + 1) * d_k]

    # ---- attention biases --------------------------------------------------- #
    if tgt_mode == "causal":
        # Generate the causal mask in-kernel: no O(B*S^2) HBM traffic.
        q0 = pl.program_id(1) * Tq
        rows = jax.lax.broadcasted_iota(jnp.int32, (Tq, S1), 0) + q0
        cols = jax.lax.broadcasted_iota(jnp.int32, (Tq, S1), 1)
        tbias = jnp.where(rows >= cols, 0.0, -1e9).astype(f32)
    else:
        tbias = tbias_ref[...].astype(f32)              # (Tq|1, S)
    sbias = sbias_ref[...].astype(f32)                  # (Tq|1, S_enc)

    x = xq_ref[...]                                     # (Tq, D) f32

    # ---- residual 0: self-attention (dropout == identity) ------------------- #
    xn = layernorm(x, la0, lb0)
    q1 = matmul(xn, wqkv1[:, :D], bqkv1[:, :D])
    x = x + attention(q1, kv1_ref, tbias, wo1_ref, bo1_ref)

    # ---- residual 1: cross-attention (K/V = encoder output, from scratch) --- #
    xn = layernorm(x, la1, lb1)
    q2 = matmul(xn, wq2_ref[...], bq2_ref[...])
    x = x + attention(q2, kv2_ref, sbias, wo2_ref, bo2_ref)

    # ---- residual 2: feed-forward ------------------------------------------- #
    xn = layernorm(x, la2, lb2)
    h1 = jnp.maximum(matmul(xn, w1_ref[...], b1_ref[...]), 0.0)
    x = x + matmul(h1, w2_ref[...], b2_ref[...])

    o_ref[...] = x


# --------------------------------------------------------------------------- #
# One-time parameter preprocessing (transpose / fuse / bf16 cast).
# --------------------------------------------------------------------------- #
def prepare_params(params, *, compute_dtype=jnp.bfloat16):
    """Call once per layer and reuse: transposes torch-convention (out,in)
    weights to (in,out), fuses QKV / KV projections, casts weights to the MXU
    compute dtype (biases stay f32, added after f32 accumulation), and packs
    the LayerNorm scalars into one SMEM vector."""
    sa, ca, ff = params["self_attn"], params["cross_attn"], params["ffn"]
    f32 = jnp.float32

    def t(w):                                            # (out,in) -> (in,out)
        return jnp.asarray(w, f32).T.astype(compute_dtype)

    def r(*bs):                                          # concat -> (1, out) f32
        return jnp.concatenate([jnp.asarray(b, f32).reshape(-1) for b in bs])[None, :]

    ln = jnp.asarray(
        [params["ln"][0]["alpha"], params["ln"][0]["bias"],
         params["ln"][1]["alpha"], params["ln"][1]["bias"],
         params["ln"][2]["alpha"], params["ln"][2]["bias"]], f32)

    return {
        "ln": ln,
        "wqkv1": jnp.concatenate([t(sa["wq"]), t(sa["wk"]), t(sa["wv"])], axis=1),
        "bqkv1": r(sa["bq"], sa["bk"], sa["bv"]),
        "wo1": t(sa["wo"]), "bo1": r(sa["bo"]),
        "wq2": t(ca["wq"]), "bq2": r(ca["bq"]),
        "wkv2": jnp.concatenate([t(ca["wk"]), t(ca["wv"])], axis=1),
        "bkv2": r(ca["bk"], ca["bv"]),
        "wo2": t(ca["wo"]), "bo2": r(ca["bo"]),
        "w1": t(ff["w1"]), "b1": r(ff["b1"]),
        "w2": t(ff["w2"]), "b2": r(ff["b2"]),
        "compute_dtype": jnp.dtype(compute_dtype),
    }


# --------------------------------------------------------------------------- #
# Mask handling / small helpers
# --------------------------------------------------------------------------- #
def _canon_mask(mask):
    m = jnp.asarray(mask)
    if m.ndim == 4:
        m = m[:, 0]                    # drop the broadcast head dim
    elif m.ndim == 2:
        m = m[None]
    return m                           # (B|1, Sq, Skv)


def _is_traced(a):
    try:
        return isinstance(a, jax.core.Tracer)
    except AttributeError:
        return False


def _resolve_mask_mode(mode, mask3, *, causal_ok):
    """'auto' inspects a CONCRETE mask for structure (causal / query-invariant
    key padding); traced masks fall back to the generic full-bias path."""
    if mode != "auto":
        return mode
    if _is_traced(mask3):
        return "full"
    nz = mask3 != 0
    sq, skv = mask3.shape[-2], mask3.shape[-1]
    if causal_ok and sq == skv:
        causal = jnp.tril(jnp.ones((sq, skv), bool))[None]
        if bool(jnp.all(nz == causal)):
            return "causal"
    if bool(jnp.all(nz == nz[:, :1, :])):
        return "key"
    return "full"


def _mask_to_bias(mask3, mode):
    """0/1 mask (B|1,Sq,Skv) -> additive bias: 'key' -> (B|1,1,Skv),
    'full' -> (B|1,Sq,Skv)."""
    m = mask3[:, :1, :] if mode == "key" else mask3
    return jnp.where(m == 0, -1e9, 0.0).astype(jnp.float32)


def _default_q_tile(seq_len, cap=256):
    # Bounded query tile (don't default to the full sequence): largest divisor
    # of S that is <= cap, so live score blocks stay (q_tile, S_kv)-sized.
    for t in range(min(seq_len, cap), 0, -1):
        if seq_len % t == 0:
            return t
    return seq_len


def _vmem_limit_bytes(frac=0.85):
    # Generation-aware VMEM budget (v5e/v6e: 128 MiB, v7x: 64 MiB) instead of a
    # hard 64 MiB cap.
    try:
        cap = int(pltpu.get_tpu_info().vmem_capacity_bytes)
    except Exception:           # hardware query only; never hides kernel errors
        cap = 64 * 2 ** 20
    return int(cap * frac)


@functools.lru_cache(maxsize=None)
def _single_buffering_supported():
    """Explicit feature probe for pl.Buffered(buffer_count=1) single-buffered
    inputs (replaces the old broad try/except around the real kernel)."""
    if not hasattr(pl, "Buffered"):
        return False

    def probe(x_ref, o_ref):
        o_ref[...] = x_ref[...] + 1.0

    try:
        fn = pl.pallas_call(
            probe,
            out_shape=jax.ShapeDtypeStruct((8, 128), jnp.float32),
            grid=(1,),
            in_specs=[pl.BlockSpec((8, 128), lambda i: (0, 0),
                                   pipeline_mode=pl.Buffered(buffer_count=1))],
            out_specs=pl.BlockSpec((8, 128), lambda i: (0, 0)))
        jax.block_until_ready(fn(jnp.zeros((8, 128), jnp.float32)))
        return True
    except Exception:
        return False


# --------------------------------------------------------------------------- #
# Wrapper
# --------------------------------------------------------------------------- #
def decoder_layer_pallas(x, enc, src_mask, tgt_mask, prepared, *, num_heads,
                         eps=1e-6, q_tile=None,
                         tgt_mask_mode="auto", src_mask_mode="auto"):
    B, S, D = x.shape
    _, S_enc, _ = enc.shape
    assert D % num_heads == 0
    d_k = D // num_heads
    cdt = prepared["compute_dtype"]

    if q_tile is None:
        q_tile = _default_q_tile(S)
    q_tile = min(q_tile, S)
    assert S % q_tile == 0, "q_tile must divide the target sequence length"
    n_q = S // q_tile
    q_is_full = q_tile == S

    tgt3 = _canon_mask(tgt_mask)
    src3 = _canon_mask(src_mask)
    tgt_mode = _resolve_mask_mode(tgt_mask_mode, tgt3, causal_ok=True)
    src_mode = _resolve_mask_mode(src_mask_mode, src3, causal_ok=False)
    if src_mode == "causal":
        src_mode = "full"

    single_buf = _single_buffering_supported()

    def resident(block_shape, index_map):
        # Operands whose block only changes at batch boundaries (or never):
        # single-buffer them so the pipeline doesn't pin a second VMEM copy.
        if single_buf:
            return pl.BlockSpec(block_shape, index_map,
                                pipeline_mode=pl.Buffered(buffer_count=1))
        return pl.BlockSpec(block_shape, index_map)

    def bias_spec(bias, mode, kv_len):
        per_batch = bias.shape[0] > 1
        if mode == "key":
            idx = (lambda b, qi: (b, 0, 0)) if per_batch else (lambda b, qi: (0, 0, 0))
            return resident((None, 1, kv_len), idx)
        idx = (lambda b, qi: (b, qi, 0)) if per_batch else (lambda b, qi: (0, qi, 0))
        return pl.BlockSpec((None, q_tile, kv_len), idx)

    weight_names = ("wqkv1", "bqkv1", "wo1", "bo1", "wq2", "bq2",
                    "wkv2", "bkv2", "wo2", "bo2", "w1", "b1", "w2", "b2")
    weights = [prepared[n] for n in weight_names]

    args = [prepared["ln"], x]
    in_specs = [pl.BlockSpec(memory_space=pltpu.MemorySpace.SMEM),            # LN scalars
                pl.BlockSpec((None, q_tile, D), lambda b, qi: (b, qi, 0))]    # x query tile
    if not q_is_full:
        args.append(x)                                                        # full x (K/V source)
        in_specs.append(resident((None, S, D), lambda b, qi: (b, 0, 0)))
    args.append(enc)                                                          # encoder output
    in_specs.append(resident((None, S_enc, D), lambda b, qi: (b, 0, 0)))
    if tgt_mode != "causal":
        tbias = _mask_to_bias(tgt3, tgt_mode)
        args.append(tbias)
        in_specs.append(bias_spec(tbias, tgt_mode, S))
    sbias = _mask_to_bias(src3, src_mode)
    args.append(sbias)
    in_specs.append(bias_spec(sbias, src_mode, S_enc))
    for w in weights:
        args.append(w)
        in_specs.append(resident(w.shape, lambda b, qi: (0, 0)))

    kernel = functools.partial(
        _decoder_layer_kernel, num_heads=num_heads, eps=eps,
        q_is_full=q_is_full, tgt_mode=tgt_mode, src_mode=src_mode,
        compute_dtype=cdt)

    return pl.pallas_call(
        kernel,
        out_shape=jax.ShapeDtypeStruct((B, S, D), jnp.float32),
        grid=(B, n_q),
        in_specs=in_specs,
        out_specs=pl.BlockSpec((None, q_tile, D), lambda b, qi: (b, qi, 0)),
        scratch_shapes=[pltpu.VMEM((2 * num_heads, S, d_k), cdt),
                        pltpu.VMEM((2 * num_heads, S_enc, d_k), cdt)],
        compiler_params=pltpu.CompilerParams(
            # Batch axis parallel (megacore / v7x 2nd TC).  The q-tile axis MUST
            # be "arbitrary": the K/V scratch carries across query tiles.
            dimension_semantics=("parallel", "arbitrary"),
            vmem_limit_bytes=_vmem_limit_bytes()),
    )(*args)


# --------------------------------------------------------------------------- #
# Pure-JAX reference (mirrors the PyTorch module, dropout=0)
# --------------------------------------------------------------------------- #
def decoder_layer_reference(x, enc, src_mask, tgt_mask, params, *, num_heads, eps=1e-6):
    def ln(y, alpha, bias):
        mean = y.mean(-1, keepdims=True)
        std = jnp.sqrt(((y - mean) ** 2).sum(-1, keepdims=True) / (y.shape[-1] - 1))
        return alpha * (y - mean) / (std + eps) + bias

    def lin(y, w, b):            # torch convention: w is (out, in)
        return y @ w.T + b

    def mha(q_in, kv_in, mask, p):
        B, Sq, D = q_in.shape
        Skv = kv_in.shape[1]
        H, dk = num_heads, D // num_heads
        q = lin(q_in, p["wq"], p["bq"]).reshape(B, Sq, H, dk).transpose(0, 2, 1, 3)
        k = lin(kv_in, p["wk"], p["bk"]).reshape(B, Skv, H, dk).transpose(0, 2, 1, 3)
        v = lin(kv_in, p["wv"], p["bv"]).reshape(B, Skv, H, dk).transpose(0, 2, 1, 3)
        s = q @ jnp.swapaxes(k, -1, -2) / math.sqrt(dk)
        s = jnp.where(mask == 0, -1e9, s)
        a = jax.nn.softmax(s, axis=-1)
        o = (a @ v).transpose(0, 2, 1, 3).reshape(B, Sq, D)
        return lin(o, p["wo"], p["bo"])

    lnp = params["ln"]
    xn = ln(x, lnp[0]["alpha"], lnp[0]["bias"])
    x = x + mha(xn, xn, tgt_mask, params["self_attn"])
    x = x + mha(ln(x, lnp[1]["alpha"], lnp[1]["bias"]), enc, src_mask, params["cross_attn"])
    xn = ln(x, lnp[2]["alpha"], lnp[2]["bias"])
    ff = params["ffn"]
    x = x + lin(jnp.maximum(lin(xn, ff["w1"], ff["b1"]), 0.0), ff["w2"], ff["b2"])
    return x


# --------------------------------------------------------------------------- #
# Deterministic parameter init (torch nn.Linear-style uniform bounds)
# --------------------------------------------------------------------------- #
def _linear_init(key, d_in, d_out):
    k1, k2 = jax.random.split(key)
    bound = 1.0 / math.sqrt(d_in)
    w = jax.random.uniform(k1, (d_out, d_in), jnp.float32, -bound, bound)
    b = jax.random.uniform(k2, (d_out,), jnp.float32, -bound, bound)
    return w, b


def _mha_init(key, d_model):
    ks = jax.random.split(key, 4)
    p = {}
    for name, k in zip(("q", "k", "v", "o"), ks):
        w, b = _linear_init(k, d_model, d_model)
        p[f"w{name}"], p[f"b{name}"] = w, b
    return p


if __name__ == "__main__":
    B, S, S_enc, D, H, D_FF = 2, 16, 16, 32, 4, 64

    key = jax.random.PRNGKey(0)
    k_x, k_enc, k_sa, k_ca, k_f1, k_f2, k_m1, k_m2 = jax.random.split(key, 8)

    x = jax.random.normal(k_x, (B, S, D), jnp.float32)
    enc = jax.random.normal(k_enc, (B, S_enc, D), jnp.float32)

    # Structured masks (the common transformer case): a causal target mask
    # (generated in-kernel, no O(B*S^2) bias traffic) and a per-batch key-
    # padding source mask (shipped as a (B,1,S_enc) additive key bias).
    tgt_mask = jnp.tril(jnp.ones((S, S), jnp.float32))[None, None]
    src_mask = jnp.ones((B, 1, S, S_enc), jnp.float32).at[:, :, :, S_enc - 3:].set(0.0)

    w1, b1 = _linear_init(k_f1, D, D_FF)
    w2, b2 = _linear_init(k_f2, D_FF, D)
    params = {
        "self_attn": _mha_init(k_sa, D),
        "cross_attn": _mha_init(k_ca, D),
        "ffn": {"w1": w1, "b1": b1, "w2": w2, "b2": b2},
        # LayerNormalization: alpha = ones(1), bias = zeros(1)
        "ln": [{"alpha": 1.0, "bias": 0.0} for _ in range(3)],
    }

    # One-time weight preprocessing (transpose + QKV/KV fusion + bf16 cast).
    prepared = prepare_params(params, compute_dtype=jnp.bfloat16)

    ref = decoder_layer_reference(x, enc, src_mask, tgt_mask, params, num_heads=H)

    # (1) Default q_tile (full sequence at this tiny S): causal + key-bias path.
    out = decoder_layer_pallas(x, enc, src_mask, tgt_mask, prepared, num_heads=H)
    jax.block_until_ready(out)
    assert out.shape == (B, S, D)
    assert bool(jnp.all(jnp.isfinite(out)))
    err = float(jnp.max(jnp.abs(out - ref)))
    assert bool(jnp.allclose(out, ref, atol=5e-2, rtol=5e-2)), err

    # (2) Query-tiled path (grid (B, 2)): K/V scratch computed once per batch
    # element and reused by both query tiles; in-kernel causal bias is offset
    # by the tile index.
    out_t = decoder_layer_pallas(x, enc, src_mask, tgt_mask, prepared,
                                 num_heads=H, q_tile=8)
    jax.block_until_ready(out_t)
    err_t = float(jnp.max(jnp.abs(out_t - ref)))
    assert bool(jnp.allclose(out_t, ref, atol=5e-2, rtol=5e-2)), err_t

    # (3) Unstructured masks exercise the generic full-additive-bias fallback.
    rand_tgt = (jax.random.uniform(k_m1, (B, 1, S, S)) > 0.4).astype(jnp.float32)
    rand_tgt = jnp.maximum(rand_tgt, jnp.eye(S, dtype=jnp.float32)[None, None])
    rand_src = (jax.random.uniform(k_m2, (B, 1, S, S_enc)) > 0.4).astype(jnp.float32)
    rand_src = rand_src.at[:, :, :, 0].set(1.0)
    ref_r = decoder_layer_reference(x, enc, rand_src, rand_tgt, params, num_heads=H)
    out_r = decoder_layer_pallas(x, enc, rand_src, rand_tgt, prepared,
                                 num_heads=H, q_tile=8)
    jax.block_until_ready(out_r)
    err_r = float(jnp.max(jnp.abs(out_r - ref_r)))
    assert bool(jnp.allclose(out_r, ref_r, atol=5e-2, rtol=5e-2)), err_r

    print("KERNEL_OK")
</pallas_src>

<mosaic_0001>
module attributes {stable_mosaic.version = 11 : i64} {
  func.func @probe(%arg0: i32, %arg1: memref<8x128xf32, #tpu.memory_space<vmem>>, %arg2: memref<8x128xf32, #tpu.memory_space<vmem>>) attributes {dimension_semantics = [#tpu.dimension_semantics<arbitrary>], iteration_bounds = array<i64: 1>, scalar_prefetch = 0 : i64, scratch_operands = 0 : i64, tpu.core_type = #tpu.core_type<tc>, window_params = [{pipeline_mode = #tpu.pipeline_mode<synchronous>, transform_indices = @transform_0, window_bounds = array<i64: 8, 128>}, {pipeline_mode = #tpu.pipeline_mode<synchronous>, transform_indices = @transform_1, window_bounds = array<i64: 8, 128>}]} {
    %c0 = arith.constant 0 : index
    %c0_0 = arith.constant 0 : index
    %0 = vector.load %arg1[%c0, %c0_0] : memref<8x128xf32, #tpu.memory_space<vmem>>, vector<8x128xf32>
    %cst = arith.constant 1.000000e+00 : f32
    %1 = vector.broadcast %cst : f32 to vector<8x128xf32>
    %2 = arith.addf %0, %1 : vector<8x128xf32>
    %c0_1 = arith.constant 0 : index
    %c0_2 = arith.constant 0 : index
    %3 = vector.load %arg2[%c0_1, %c0_2] : memref<8x128xf32, #tpu.memory_space<vmem>>, vector<8x128xf32>
    tpu.vector_store %arg2[%c0_1, %c0_2], %2 {strides = array<i32>} : memref<8x128xf32, #tpu.memory_space<vmem>>, vector<8x128xf32>,
    return
  }
  func.func @transform_0(%arg0: i32) -> (i32, i32) {
    %c0_i32 = arith.constant 0 : i32
    %c0_i32_0 = arith.constant 0 : i32
    %c0_i32_1 = arith.constant 0 : i32
    return %c0_i32, %c0_i32_0 : i32, i32
  }
  func.func @transform_1(%arg0: i32) -> (i32, i32) {
    %c0_i32 = arith.constant 0 : i32
    %c0_i32_0 = arith.constant 0 : i32
    %c0_i32_1 = arith.constant 0 : i32
    return %c0_i32, %c0_i32_0 : i32, i32
  }
}

module attributes {stable_mosaic.version = 11 : i64} {
  func.func @_decoder_layer_kernel(%arg0: i32, %arg1: i32, %arg2: memref<6xf32, #tpu.memory_space<smem>>, %arg3: memref<1x16x32xf32, #tpu.memory_space<vmem>>, %arg4: memref<1x16x32xf32, #tpu.memory_space<vmem>>, %arg5: memref<1x1x16xf32, #tpu.memory_space<vmem>>, %arg6: memref<32x96xbf16, #tpu.memory_space<vmem>>, %arg7: memref<1x96xf32, #tpu.memory_space<vmem>>, %arg8: memref<32x32xbf16, #tpu.memory_space<vmem>>, %arg9: memref<1x32xf32, #tpu.memory_space<vmem>>, %arg10: memref<32x32xbf16, #tpu.memory_space<vmem>>, %arg11: memref<1x32xf32, #tpu.memory_space<vmem>>, %arg12: memref<32x64xbf16, #tpu.memory_space<vmem>>, %arg13: memref<1x64xf32, #tpu.memory_space<vmem>>, %arg14: memref<32x32xbf16, #tpu.memory_space<vmem>>, %arg15: memref<1x32xf32, #tpu.memory_space<vmem>>, %arg16: memref<32x64xbf16, #tpu.memory_space<vmem>>, %arg17: memref<1x64xf32, #tpu.memory_space<vmem>>, %arg18: memref<64x32xbf16, #tpu.memory_space<vmem>>, %arg19: memref<1x32xf32, #tpu.memory_space<vmem>>, %arg20: memref<1x16x32xf32, #tpu.memory_space<vmem>>, %arg21: memref<8x16x8xbf16, #tpu.memory_space<vmem>>, %arg22: memref<8x16x8xbf16, #tpu.memory_space<vmem>>) attributes {dimension_semantics = [#tpu.dimension_semantics<parallel>, #tpu.dimension_semantics<arbitrary>], iteration_bounds = array<i64: 2, 1>, scalar_prefetch = 0 : i64, scratch_operands = 2 : i64, tpu.core_type = #tpu.core_type<tc>, window_params = [{transform_indices = @transform_0, window_bounds = array<i64: 6>}, {transform_indices = @transform_1, window_bounds = array<i64: 1, 16, 32>}, {transform_indices = @transform_2, window_bounds = array<i64: 1, 16, 32>}, {transform_indices = @transform_3, window_bounds = array<i64: 1, 1, 16>}, {pipeline_mode = #tpu.pipeline_mode<synchronous>, transform_indices = @transform_4, window_bounds = array<i64: 32, 96>}, {pipeline_mode = #tpu.pipeline_mode<synchronous>, transform_indices = @transform_5, window_bounds = array<i64: 1, 96>}, {pipeline_mode = #tpu.pipeline_mode<synchronous>, transform_indices = @transform_6, window_bounds = array<i64: 32, 32>}, {pipeline_mode = #tpu.pipeline_mode<synchronous>, transform_indices = @transform_7, window_bounds = array<i64: 1, 32>}, {pipeline_mode = #tpu.pipeline_mode<synchronous>, transform_indices = @transform_8, window_bounds = array<i64: 32, 32>}, {pipeline_mode = #tpu.pipeline_mode<synchronous>, transform_indices = @transform_9, window_bounds = array<i64: 1, 32>}, {pipeline_mode = #tpu.pipeline_mode<synchronous>, transform_indices = @transform_10, window_bounds = array<i64: 32, 64>}, {pipeline_mode = #tpu.pipeline_mode<synchronous>, transform_indices = @transform_11, window_bounds = array<i64: 1, 64>}, {pipeline_mode = #tpu.pipeline_mode<synchronous>, transform_indices = @transform_12, window_bounds = array<i64: 32, 32>}, {pipeline_mode = #tpu.pipeline_mode<synchronous>, transform_indices = @transform_13, window_bounds = array<i64: 1, 32>}, {pipeline_mode = #tpu.pipeline_mode<synchronous>, transform_indices = @transform_14, window_bounds = array<i64: 32, 64>}, {pipeline_mode = #tpu.pipeline_mode<synchronous>, transform_indices = @transform_15, window_bounds = array<i64: 1, 64>}, {pipeline_mode = #tpu.pipeline_mode<synchronous>, transform_indices = @transform_16, window_bounds = array<i64: 64, 32>}, {pipeline_mode = #tpu.pipeline_mode<synchronous>, transform_indices = @transform_17, window_bounds = array<i64: 1, 32>}, {transform_indices = @transform_18, window_bounds = array<i64: 1, 16, 32>}]} {
    %c0 = arith.constant 0 : index
    %0 = memref.load %arg2[%c0] : memref<6xf32, #tpu.memory_space<smem>>
    %c1 = arith.constant 1 : index
    %1 = memref.load %arg2[%c1] : memref<6xf32, #tpu.memory_space<smem>>
    %c2 = arith.constant 2 : index
    %2 = memref.load %arg2[%c2] : memref<6xf32, #tpu.memory_space<smem>>
    %c3 = arith.constant 3 : index
    %3 = memref.load %arg2[%c3] : memref<6xf32, #tpu.memory_space<smem>>
    %c4 = arith.constant 4 : index
    %4 = memref.load %arg2[%c4] : memref<6xf32, #tpu.memory_space<smem>>
    %c5 = arith.constant 5 : index
    %5 = memref.load %arg2[%c5] : memref<6xf32, #tpu.memory_space<smem>>
    %c0_0 = arith.constant 0 : index
    %c0_1 = arith.constant 0 : index
    %6 = vector.load %arg6[%c0_0, %c0_1] : memref<32x96xbf16, #tpu.memory_space<vmem>>, vector<32x96xbf16>
    %c0_2 = arith.constant 0 : index
    %c0_3 = arith.constant 0 : index
    %7 = vector.load %arg7[%c0_2, %c0_3] : memref<1x96xf32, #tpu.memory_space<vmem>>, vector<1x96xf32>
    %c0_i32 = arith.constant 0 : i32
    %8 = arith.cmpi eq, %arg1, %c0_i32 : i32
    %9 = arith.extui %8 : i1 to i32
    %c0_i32_4 = arith.constant 0 : i32
    %10 = arith.cmpi ne, %9, %c0_i32_4 : i32
    scf.if %10 {
      %c0_73 = arith.constant 0 : index
      %c0_74 = arith.constant 0 : index
      %c0_75 = arith.constant 0 : index
      %211 = vector.load %arg3[%c0_73, %c0_74, %c0_75] : memref<1x16x32xf32, #tpu.memory_space<vmem>>, vector<1x16x32xf32>
      %212 = vector.shape_cast %211 : vector<1x16x32xf32> to vector<16x32xf32>
      %cst_76 = arith.constant dense<0.000000e+00> : vector<16xf32>
      %213 = vector.multi_reduction <add>, %212, %cst_76 [1] : vector<16x32xf32> to vector<16xf32>
      %214 = vector.shape_cast %213 : vector<16xf32> to vector<16x1xf32>
      %cst_77 = arith.constant 3.200000e+01 : f32
      %215 = vector.broadcast %cst_77 : f32 to vector<16x1xf32>
      %216 = arith.divf %214, %215 : vector<16x1xf32>
      %217 = vector.broadcast %216 : vector<16x1xf32> to vector<16x32xf32>
      %218 = arith.subf %212, %217 : vector<16x32xf32>
      %219 = arith.mulf %218, %218 : vector<16x32xf32>
      %cst_78 = arith.constant dense<0.000000e+00> : vector<16xf32>
      %220 = vector.multi_reduction <add>, %219, %cst_78 [1] : vector<16x32xf32> to vector<16xf32>
      %221 = vector.shape_cast %220 : vector<16xf32> to vector<16x1xf32>
      %cst_79 = arith.constant 0.0322580636 : f32
      %222 = vector.broadcast %cst_79 : f32 to vector<16x1xf32>
      %223 = arith.mulf %221, %222 : vector<16x1xf32>
      %224 = math.sqrt %223 : vector<16x1xf32>
      %cst_80 = arith.constant 9.99999997E-7 : f32
      %225 = vector.broadcast %cst_80 : f32 to vector<16x1xf32>
      %226 = arith.addf %224, %225 : vector<16x1xf32>
      %227 = tpu.reciprocal %226 {approx = true} : vector<16x1xf32> -> vector<16x1xf32>
      %228 = vector.broadcast %0 : f32 to vector<16x32xf32>
      %229 = arith.mulf %228, %218 : vector<16x32xf32>
      %230 = vector.broadcast %227 : vector<16x1xf32> to vector<16x32xf32>
      %231 = arith.mulf %229, %230 : vector<16x32xf32>
      %232 = vector.broadcast %1 : f32 to vector<16x32xf32>
      %233 = arith.addf %231, %232 : vector<16x32xf32>
      %234 = vector.extract_strided_slice %6 {offsets = [0, 32], sizes = [32, 64], strides = [1, 1]} : vector<32x96xbf16> to vector<32x64xbf16>
      %235 = vector.extract_strided_slice %7 {offsets = [0, 32], sizes = [1, 64], strides = [1, 1]} : vector<1x96xf32> to vector<1x64xf32>
      %236 = arith.truncf %233 : vector<16x32xf32> to vector<16x32xbf16>
      %cst_81 = arith.constant dense<0.000000e+00> : vector<16x64xf32>
      %237 = tpu.matmul %236, %234, %cst_81 {dimension_numbers = #tpu.dot_dimension_numbers<[1], [0], [0], [1], [0, 0, 1, 1], [], []>} : vector<16x32xbf16>, vector<32x64xbf16>, vector<16x64xf32> -> vector<16x64xf32>
      %238 = vector.broadcast %235 : vector<1x64xf32> to vector<16x64xf32>
      %239 = arith.addf %237, %238 : vector<16x64xf32>
      %240 = arith.truncf %239 : vector<16x64xf32> to vector<16x64xbf16>
      %c0_82 = arith.constant 0 : index
      %c0_83 = arith.constant 0 : index
      %c0_84 = arith.constant 0 : index
      %241 = vector.load %arg4[%c0_82, %c0_83, %c0_84] : memref<1x16x32xf32, #tpu.memory_space<vmem>>, vector<1x16x32xf32>
      %242 = vector.shape_cast %241 : vector<1x16x32xf32> to vector<16x32xf32>
      %c0_85 = arith.constant 0 : index
      %c0_86 = arith.constant 0 : index
      %243 = vector.load %arg12[%c0_85, %c0_86] : memref<32x64xbf16, #tpu.memory_space<vmem>>, vector<32x64xbf16>
      %c0_87 = arith.constant 0 : index
      %c0_88 = arith.constant 0 : index
      %244 = vector.load %arg13[%c0_87, %c0_88] : memref<1x64xf32, #tpu.memory_space<vmem>>, vector<1x64xf32>
      %245 = arith.truncf %242 : vector<16x32xf32> to vector<16x32xbf16>
      %cst_89 = arith.constant dense<0.000000e+00> : vector<16x64xf32>
      %246 = tpu.matmul %245, %243, %cst_89 {dimension_numbers = #tpu.dot_dimension_numbers<[1], [0], [0], [1], [0, 0, 1, 1], [], []>} : vector<16x32xbf16>, vector<32x64xbf16>, vector<16x64xf32> -> vector<16x64xf32>
      %247 = vector.broadcast %244 : vector<1x64xf32> to vector<16x64xf32>
      %248 = arith.addf %246, %247 : vector<16x64xf32>
      %249 = arith.truncf %248 : vector<16x64xf32> to vector<16x64xbf16>
      %250 = vector.extract_strided_slice %240 {offsets = [0, 0], sizes = [16, 8], strides = [1, 1]} : vector<16x64xbf16> to vector<16x8xbf16>
      %c0_90 = arith.constant 0 : index
      %c0_91 = arith.constant 0 : index
      %c0_92 = arith.constant 0 : index
      %251 = vector.load %arg21[%c0_90, %c0_91, %c0_92] : memref<8x16x8xbf16, #tpu.memory_space<vmem>>, vector<1x16x8xbf16>
      %252 = vector.shape_cast %251 : vector<1x16x8xbf16> to vector<16x8xbf16>
      %253 = vector.shape_cast %250 : vector<16x8xbf16> to vector<1x16x8xbf16>
      tpu.vector_store %arg21[%c0_90, %c0_91, %c0_92], %253 {strides = array<i32>} : memref<8x16x8xbf16, #tpu.memory_space<vmem>>, vector<1x16x8xbf16>,
      %254 = vector.extract_strided_slice %249 {offsets = [0, 0], sizes = [16, 8], strides = [1, 1]} : vector<16x64xbf16> to vector<16x8xbf16>
      %c0_93 = arith.constant 0 : index
      %c0_94 = arith.constant 0 : index
      %c0_95 = arith.constant 0 : index
      %255 = vector.load %arg22[%c0_93, %c0_94, %c0_95] : memref<8x16x8xbf16, #tpu.memory_space<vmem>>, vector<1x16x8xbf16>
      %256 = vector.shape_cast %255 : vector<1x16x8xbf16> to vector<16x8xbf16>
      %257 = vector.shape_cast %254 : vector<16x8xbf16> to vector<1x16x8xbf16>
      tpu.vector_store %arg22[%c0_93, %c0_94, %c0_95], %257 {strides = array<i32>} : memref<8x16x8xbf16, #tpu.memory_space<vmem>>, vector<1x16x8xbf16>,
      %258 = vector.extract_strided_slice %240 {offsets = [0, 8], sizes = [16, 8], strides = [1, 1]} : vector<16x64xbf16> to vector<16x8xbf16>
      %c1_96 = arith.constant 1 : index
      %c0_97 = arith.constant 0 : index
      %c0_98 = arith.constant 0 : index
      %259 = vector.load %arg21[%c1_96, %c0_97, %c0_98] : memref<8x16x8xbf16, #tpu.memory_space<vmem>>, vector<1x16x8xbf16>
      %260 = vector.shape_cast %259 : vector<1x16x8xbf16> to vector<16x8xbf16>
      %261 = vector.shape_cast %258 : vector<16x8xbf16> to vector<1x16x8xbf16>
      tpu.vector_store %arg21[%c1_96, %c0_97, %c0_98], %261 {strides = array<i32>} : memref<8x16x8xbf16, #tpu.memory_space<vmem>>, vector<1x16x8xbf16>,
      %262 = vector.extract_strided_slice %249 {offsets = [0, 8], sizes = [16, 8], strides = [1, 1]} : vector<16x64xbf16> to vector<16x8xbf16>
      %c1_99 = arith.constant 1 : index
      %c0_100 = arith.constant 0 : index
      %c0_101 = arith.constant 0 : index
      %263 = vector.load %arg22[%c1_99, %c0_100, %c0_101] : memref<8x16x8xbf16, #tpu.memory_space<vmem>>, vector<1x16x8xbf16>
      %264 = vector.shape_cast %263 : vector<1x16x8xbf16> to vector<16x8xbf16>
      %265 = vector.shape_cast %262 : vector<16x8xbf16> to vector<1x16x8xbf16>
      tpu.vector_store %arg22[%c1_99, %c0_100, %c0_101], %265 {strides = array<i32>} : memref<8x16x8xbf16, #tpu.memory_space<vmem>>, vector<1x16x8xbf16>,
      %266 = vector.extract_strided_slice %240 {offsets = [0, 16], sizes = [16, 8], strides = [1, 1]} : vector<16x64xbf16> to vector<16x8xbf16>
      %c2_102 = arith.constant 2 : index
      %c0_103 = arith.constant 0 : index
      %c0_104 = arith.constant 0 : index
      %267 = vector.load %arg21[%c2_102, %c0_103, %c0_104] : memref<8x16x8xbf16, #tpu.memory_space<vmem>>, vector<1x16x8xbf16>
      %268 = vector.shape_cast %267 : vector<1x16x8xbf16> to vector<16x8xbf16>
      %269 = vector.shape_cast %266 : vector<16x8xbf16> to vector<1x16x8xbf16>
      tpu.vector_store %arg21[%c2_102, %c0_103, %c0_104], %269 {strides = array<i32>} : memref<8x16x8xbf16, #tpu.memory_space<vmem>>, vector<1x16x8xbf16>,
      %270 = vector.extract_strided_slice %249 {offsets = [0, 16], sizes = [16, 8], strides = [1, 1]} : vector<16x64xbf16> to vector<16x8xbf16>
      %c2_105 = arith.constant 2 : index
      %c0_106 = arith.constant 0 : index
      %c0_107 = arith.constant 0 : index
      %271 = vector.load %arg22[%c2_105, %c0_106, %c0_107] : memref<8x16x8xbf16, #tpu.memory_space<vmem>>, vector<1x16x8xbf16>
      %272 = vector.shape_cast %271 : vector<1x16x8xbf16> to vector<16x8xbf16>
      %273 = vector.shape_cast %270 : vector<16x8xbf16> to vector<1x16x8xbf16>
      tpu.vector_store %arg22[%c2_105, %c0_106, %c0_107], %273 {strides = array<i32>} : memref<8x16x8xbf16, #tpu.memory_space<vmem>>, vector<1x16x8xbf16>,
      %274 = vector.extract_strided_slice %240 {offsets = [0, 24], sizes = [16, 8], strides = [1, 1]} : vector<16x64xbf16> to vector<16x8xbf16>
      %c3_108 = arith.constant 3 : index
      %c0_109 = arith.constant 0 : index
      %c0_110 = arith.constant 0 : index
      %275 = vector.load %arg21[%c3_108, %c0_109, %c0_110] : memref<8x16x8xbf16, #tpu.memory_space<vmem>>, vector<1x16x8xbf16>
      %276 = vector.shape_cast %275 : vector<1x16x8xbf16> to vector<16x8xbf16>
      %277 = vector.shape_cast %274 : vector<16x8xbf16> to vector<1x16x8xbf16>
      tpu.vector_store %arg21[%c3_108, %c0_109, %c0_110], %277 {strides = array<i32>} : memref<8x16x8xbf16, #tpu.memory_space<vmem>>, vector<1x16x8xbf16>,
      %278 = vector.extract_strided_slice %249 {offsets = [0, 24], sizes = [16, 8], strides = [1, 1]} : vector<16x64xbf16> to vector<16x8xbf16>
      %c3_111 = arith.constant 3 : index
      %c0_112 = arith.constant 0 : index
      %c0_113 = arith.constant 0 : index
      %279 = vector.load %arg22[%c3_111, %c0_112, %c0_113] : memref<8x16x8xbf16, #tpu.memory_space<vmem>>, vector<1x16x8xbf16>
      %280 = vector.shape_cast %279 : vector<1x16x8xbf16> to vector<16x8xbf16>
      %281 = vector.shape_cast %278 : vector<16x8xbf16> to vector<1x16x8xbf16>
      tpu.vector_store %arg22[%c3_111, %c0_112, %c0_113], %281 {strides = array<i32>} : memref<8x16x8xbf16, #tpu.memory_space<vmem>>, vector<1x16x8xbf16>,
      %282 = vector.extract_strided_slice %240 {offsets = [0, 32], sizes = [16, 8], strides = [1, 1]} : vector<16x64xbf16> to vector<16x8xbf16>
      %c4_114 = arith.constant 4 : index
      %c0_115 = arith.constant 0 : index
      %c0_116 = arith.constant 0 : index
      %283 = vector.load %arg21[%c4_114, %c0_115, %c0_116] : memref<8x16x8xbf16, #tpu.memory_space<vmem>>, vector<1x16x8xbf16>
      %284 = vector.shape_cast %283 : vector<1x16x8xbf16> to vector<16x8xbf16>
      %285 = vector.shape_cast %282 : vector<16x8xbf16> to vector<1x16x8xbf16>
      tpu.vector_store %arg21[%c4_114, %c0_115, %c0_116], %285 {strides = array<i32>} : memref<8x16x8xbf16, #tpu.memory_space<vmem>>, vector<1x16x8xbf16>,
      %286 = vector.extract_strided_slice %249 {offsets = [0, 32], sizes = [16, 8], strides = [1, 1]} : vector<16x64xbf16> to vector<16x8xbf16>
      %c4_117 = arith.constant 4 : index
      %c0_118 = arith.constant 0 : index
      %c0_119 = arith.constant 0 : index
      %287 = vector.load %arg22[%c4_117, %c0_118, %c0_119] : memref<8x16x8xbf16, #tpu.memory_space<vmem>>, vector<1x16x8xbf16>
      %288 = vector.shape_cast %287 : vector<1x16x8xbf16> to vector<16x8xbf16>
      %289 = vector.shape_cast %286 : vector<16x8xbf16> to vector<1x16x8xbf16>
      tpu.vector_store %arg22[%c4_117, %c0_118, %c0_119], %289 {strides = array<i32>} : memref<8x16x8xbf16, #tpu.memory_space<vmem>>, vector<1x16x8xbf16>,
      %290 = vector.extract_strided_slice %240 {offsets = [0, 40], sizes = [16, 8], strides = [1, 1]} : vector<16x64xbf16> to vector<16x8xbf16>
      %c5_120 = arith.constant 5 : index
      %c0_121 = arith.constant 0 : index
      %c0_122 = arith.constant 0 : index
      %291 = vector.load %arg21[%c5_120, %c0_121, %c0_122] : memref<8x16x8xbf16, #tpu.memory_space<vmem>>, vector<1x16x8xbf16>
      %292 = vector.shape_cast %291 : vector<1x16x8xbf16> to vector<16x8xbf16>
      %293 = vector.shape_cast %290 : vector<16x8xbf16> to vector<1x16x8xbf16>
      tpu.vector_store %arg21[%c5_120, %c0_121, %c0_122], %293 {strides = array<i32>} : memref<8x16x8xbf16, #tpu.memory_space<vmem>>, vector<1x16x8xbf16>,
      %294 = vector.extract_strided_slice %249 {offsets = [0, 40], sizes = [16, 8], strides = [1, 1]} : vector<16x64xbf16> to vector<16x8xbf16>
      %c5_123 = arith.constant 5 : index
      %c0_124 = arith.constant 0 : index
      %c0_125 = arith.constant 0 : index
      %295 = vector.load %arg22[%c5_123, %c0_124, %c0_125] : memref<8x16x8xbf16, #tpu.memory_space<vmem>>, vector<1x16x8xbf16>
      %296 = vector.shape_cast %295 : vector<1x16x8xbf16> to vector<16x8xbf16>
      %297 = vector.shape_cast %294 : vector<16x8xbf16> to vector<1x16x8xbf16>
      tpu.vector_store %arg22[%c5_123, %c0_124, %c0_125], %297 {strides = array<i32>} : memref<8x16x8xbf16, #tpu.memory_space<vmem>>, vector<1x16x8xbf16>,
      %298 = vector.extract_strided_slice %240 {offsets = [0, 48], sizes = [16, 8], strides = [1, 1]} : vector<16x64xbf16> to vector<16x8xbf16>
      %c6 = arith.constant 6 : index
      %c0_126 = arith.constant 0 : index
      %c0_127 = arith.constant 0 : index
      %299 = vector.load %arg21[%c6, %c0_126, %c0_127] : memref<8x16x8xbf16, #tpu.memory_space<vmem>>, vector<1x16x8xbf16>
      %300 = vector.shape_cast %299 : vector<1x16x8xbf16> to vector<16x8xbf16>
      %301 = vector.shape_cast %298 : vector<16x8xbf16> to vector<1x16x8xbf16>
      tpu.vector_store %arg21[%c6, %c0_126, %c0_127], %301 {strides = array<i32>} : memref<8x16x8xbf16, #tpu.memory_space<vmem>>, vector<1x16x8xbf16>,
      %302 = vector.extract_strided_slice %249 {offsets = [0, 48], sizes = [16, 8], strides = [1, 1]} : vector<16x64xbf16> to vector<16x8xbf16>
      %c6_128 = arith.constant 6 : index
      %c0_129 = arith.constant 0 : index
      %c0_130 = arith.constant 0 : index
      %303 = vector.load %arg22[%c6_128, %c0_129, %c0_130] : memref<8x16x8xbf16, #tpu.memory_space<vmem>>, vector<1x16x8xbf16>
      %304 = vector.shape_cast %303 : vector<1x16x8xbf16> to vector<16x8xbf16>
      %305 = vector.shape_cast %302 : vector<16x8xbf16> to vector<1x16x8xbf16>
      tpu.vector_store %arg22[%c6_128, %c0_129, %c0_130], %305 {strides = array<i32>} : memref<8x16x8xbf16, #tpu.memory_space<vmem>>, vector<1x16x8xbf16>,
      %306 = vector.extract_strided_slice %240 {offsets = [0, 56], sizes = [16, 8], strides = [1, 1]} : vector<16x64xbf16> to vector<16x8xbf16>
      %c7 = arith.constant 7 : index
      %c0_131 = arith.constant 0 : index
      %c0_132 = arith.constant 0 : index
      %307 = vector.load %arg21[%c7, %c0_131, %c0_132] : memref<8x16x8xbf16, #tpu.memory_space<vmem>>, vector<1x16x8xbf16>
      %308 = vector.shape_cast %307 : vector<1x16x8xbf16> to vector<16x8xbf16>
      %309 = vector.shape_cast %306 : vector<16x8xbf16> to vector<1x16x8xbf16>
      tpu.vector_store %arg21[%c7, %c0_131, %c0_132], %309 {strides = array<i32>} : memref<8x16x8xbf16, #tpu.memory_space<vmem>>, vector<1x16x8xbf16>,
      %310 = vector.extract_strided_slice %249 {offsets = [0, 56], sizes = [16, 8], strides = [1, 1]} : vector<16x64xbf16> to vector<16x8xbf16>
      %c7_133 = arith.constant 7 : index
      %c0_134 = arith.constant 0 : index
      %c0_135 = arith.constant 0 : index
      %311 = vector.load %arg22[%c7_133, %c0_134, %c0_135] : memref<8x16x8xbf16, #tpu.memory_space<vmem>>, vector<1x16x8xbf16>
      %312 = vector.shape_cast %311 : vector<1x16x8xbf16> to vector<16x8xbf16>
      %313 = vector.shape_cast %310 : vector<16x8xbf16> to vector<1x16x8xbf16>
      tpu.vector_store %arg22[%c7_133, %c0_134, %c0_135], %313 {strides = array<i32>} : memref<8x16x8xbf16, #tpu.memory_space<vmem>>, vector<1x16x8xbf16>,
    } else {
    }
    %c16_i32 = arith.constant 16 : i32
    %11 = arith.muli %arg1, %c16_i32 : i32
    %12 = tpu.iota {dimensions = array<i32: 0>} : vector<16x16xi32>
    %13 = vector.broadcast %11 : i32 to vector<16x16xi32>
    %14 = arith.addi %12, %13 : vector<16x16xi32>
    %15 = tpu.iota {dimensions = array<i32: 1>} : vector<16x16xi32>
    %16 = arith.cmpi sge, %14, %15 : vector<16x16xi32>
    %cst = arith.constant 0.000000e+00 : f32
    %cst_5 = arith.constant -1.000000e+09 : f32
    %17 = vector.broadcast %cst : f32 to vector<16x16xf32>
    %18 = vector.broadcast %cst_5 : f32 to vector<16x16xf32>
    %19 = arith.select %16, %17, %18 : vector<16x16xi1>, vector<16x16xf32>
    %c0_6 = arith.constant 0 : index
    %c0_7 = arith.constant 0 : index
    %c0_8 = arith.constant 0 : index
    %20 = vector.load %arg5[%c0_6, %c0_7, %c0_8] : memref<1x1x16xf32, #tpu.memory_space<vmem>>, vector<1x1x16xf32>
    %21 = vector.shape_cast %20 : vector<1x1x16xf32> to vector<1x16xf32>
    %c0_9 = arith.constant 0 : index
    %c0_10 = arith.constant 0 : index
    %c0_11 = arith.constant 0 : index
    %22 = vector.load %arg3[%c0_9, %c0_10, %c0_11] : memref<1x16x32xf32, #tpu.memory_space<vmem>>, vector<1x16x32xf32>
    %23 = vector.shape_cast %22 : vector<1x16x32xf32> to vector<16x32xf32>
    %cst_12 = arith.constant dense<0.000000e+00> : vector<16xf32>
    %24 = vector.multi_reduction <add>, %23, %cst_12 [1] : vector<16x32xf32> to vector<16xf32>
    %25 = vector.shape_cast %24 : vector<16xf32> to vector<16x1xf32>
    %cst_13 = arith.constant 3.200000e+01 : f32
    %26 = vector.broadcast %cst_13 : f32 to vector<16x1xf32>
    %27 = arith.divf %25, %26 : vector<16x1xf32>
    %28 = vector.broadcast %27 : vector<16x1xf32> to vector<16x32xf32>
    %29 = arith.subf %23, %28 : vector<16x32xf32>
    %30 = arith.mulf %29, %29 : vector<16x32xf32>
    %cst_14 = arith.constant dense<0.000000e+00> : vector<16xf32>
    %31 = vector.multi_reduction <add>, %30, %cst_14 [1] : vector<16x32xf32> to vector<16xf32>
    %32 = vector.shape_cast %31 : vector<16xf32> to vector<16x1xf32>
    %cst_15 = arith.constant 0.0322580636 : f32
    %33 = vector.broadcast %cst_15 : f32 to vector<16x1xf32>
    %34 = arith.mulf %32, %33 : vector<16x1xf32>
    %35 = math.sqrt %34 : vector<16x1xf32>
    %cst_16 = arith.constant 9.99999997E-7 : f32
    %36 = vector.broadcast %cst_16 : f32 to vector<16x1xf32>
    %37 = arith.addf %35, %36 : vector<16x1xf32>
    %38 = tpu.reciprocal %37 {approx = true} : vector<16x1xf32> -> vector<16x1xf32>
    %39 = vector.broadcast %0 : f32 to vector<16x32xf32>
    %40 = arith.mulf %39, %29 : vector<16x32xf32>
    %41 = vector.broadcast %38 : vector<16x1xf32> to vector<16x32xf32>
    %42 = arith.mulf %40, %41 : vector<16x32xf32>
    %43 = vector.broadcast %1 : f32 to vector<16x32xf32>
    %44 = arith.addf %42, %43 : vector<16x32xf32>
    %45 = vector.extract_strided_slice %6 {offsets = [0, 0], sizes = [32, 32], strides = [1, 1]} : vector<32x96xbf16> to vector<32x32xbf16>
    %46 = vector.extract_strided_slice %7 {offsets = [0, 0], sizes = [1, 32], strides = [1, 1]} : vector<1x96xf32> to vector<1x32xf32>
    %47 = arith.truncf %44 : vector<16x32xf32> to vector<16x32xbf16>
    %cst_17 = arith.constant dense<0.000000e+00> : vector<16x32xf32>
    %48 = tpu.matmul %47, %45, %cst_17 {dimension_numbers = #tpu.dot_dimension_numbers<[1], [0], [0], [1], [0, 0, 1, 1], [], []>} : vector<16x32xbf16>, vector<32x32xbf16>, vector<16x32xf32> -> vector<16x32xf32>
    %49 = vector.broadcast %46 : vector<1x32xf32> to vector<16x32xf32>
    %50 = arith.addf %48, %49 : vector<16x32xf32>
    %c0_18 = arith.constant 0 : index
    %c0_19 = arith.constant 0 : index
    %c0_20 = arith.constant 0 : index
    %51 = vector.load %arg21[%c0_18, %c0_19, %c0_20] : memref<8x16x8xbf16, #tpu.memory_space<vmem>>, vector<8x16x8xbf16>
    %52 = vector.extract_strided_slice %51 {offsets = [0, 0, 0], sizes = [4, 16, 8], strides = [1, 1, 1]} : vector<8x16x8xbf16> to vector<4x16x8xbf16>
    %53 = vector.extract_strided_slice %51 {offsets = [4, 0, 0], sizes = [4, 16, 8], strides = [1, 1, 1]} : vector<8x16x8xbf16> to vector<4x16x8xbf16>
    %54 = arith.truncf %50 : vector<16x32xf32> to vector<16x32xbf16>
    %55 = vector.extract_strided_slice %54 {offsets = [0, 0], sizes = [16, 8], strides = [1, 1]} : vector<16x32xbf16> to vector<16x8xbf16>
    %56 = vector.extract_strided_slice %54 {offsets = [0, 8], sizes = [16, 8], strides = [1, 1]} : vector<16x32xbf16> to vector<16x8xbf16>
    %57 = vector.extract_strided_slice %54 {offsets = [0, 16], sizes = [16, 8], strides = [1, 1]} : vector<16x32xbf16> to vector<16x8xbf16>
    %58 = vector.extract_strided_slice %54 {offsets = [0, 24], sizes = [16, 8], strides = [1, 1]} : vector<16x32xbf16> to vector<16x8xbf16>
    %59 = vector.shape_cast %55 : vector<16x8xbf16> to vector<1x16x8xbf16>
    %60 = vector.shape_cast %56 : vector<16x8xbf16> to vector<1x16x8xbf16>
    %61 = vector.shape_cast %57 : vector<16x8xbf16> to vector<1x16x8xbf16>
    %62 = vector.shape_cast %58 : vector<16x8xbf16> to vector<1x16x8xbf16>
    %63 = tpu.concatenate %59, %60, %61, %62 in 0 : vector<1x16x8xbf16>, vector<1x16x8xbf16>, vector<1x16x8xbf16>, vector<1x16x8xbf16> -> vector<4x16x8xbf16>
    "tpu.trace_start"() <{level = 10 : i32, message = "hqd,hkd->hqk"}> : () -> ()
    %cst_21 = arith.constant dense<0.000000e+00> : vector<4x16x16xf32>
    %64 = tpu.matmul %63, %52, %cst_21 {dimension_numbers = #tpu.dot_dimension_numbers<[2], [2], [1], [1], [0, 0, 0, 1, 1, 1], [0], [0]>} : vector<4x16x8xbf16>, vector<4x16x8xbf16>, vector<4x16x16xf32> -> vector<4x16x16xf32>
    "tpu.trace_stop"() : () -> ()
    %cst_22 = arith.constant 0.353553385 : f32
    %65 = vector.broadcast %cst_22 : f32 to vector<4x16x16xf32>
    %66 = arith.mulf %64, %65 : vector<4x16x16xf32>
    %67 = vector.shape_cast %19 : vector<16x16xf32> to vector<1x16x16xf32>
    %68 = vector.broadcast %67 : vector<1x16x16xf32> to vector<4x16x16xf32>
    %69 = arith.addf %66, %68 : vector<4x16x16xf32>
    %cst_23 = arith.constant dense<0xFF800000> : vector<4x16xf32>
    %70 = vector.multi_reduction <maximumf>, %69, %cst_23 [2] : vector<4x16x16xf32> to vector<4x16xf32>
    %71 = vector.shape_cast %70 : vector<4x16xf32> to vector<4x16x1xf32>
    %72 = vector.broadcast %71 : vector<4x16x1xf32> to vector<4x16x16xf32>
    %73 = arith.subf %69, %72 : vector<4x16x16xf32>
    %74 = math.exp %73 : vector<4x16x16xf32>
    %cst_24 = arith.constant dense<0.000000e+00> : vector<4x16xf32>
    %75 = vector.multi_reduction <add>, %74, %cst_24 [2] : vector<4x16x16xf32> to vector<4x16xf32>
    %76 = vector.shape_cast %75 : vector<4x16xf32> to vector<4x16x1xf32>
    %77 = tpu.reciprocal %76 {approx = true} : vector<4x16x1xf32> -> vector<4x16x1xf32>
    %78 = vector.broadcast %77 : vector<4x16x1xf32> to vector<4x16x16xf32>
    %79 = arith.mulf %74, %78 : vector<4x16x16xf32>
    %80 = arith.truncf %79 : vector<4x16x16xf32> to vector<4x16x16xbf16>
    "tpu.trace_start"() <{level = 10 : i32, message = "hqk,hkd->hqd"}> : () -> ()
    %cst_25 = arith.constant dense<0.000000e+00> : vector<4x16x8xf32>
    %81 = tpu.matmul %80, %53, %cst_25 {dimension_numbers = #tpu.dot_dimension_numbers<[2], [1], [1], [2], [0, 0, 0, 1, 1, 2], [0], [0]>} : vector<4x16x16xbf16>, vector<4x16x8xbf16>, vector<4x16x8xf32> -> vector<4x16x8xf32>
    "tpu.trace_stop"() : () -> ()
    %82 = vector.extract_strided_slice %81 {offsets = [0, 0, 0], sizes = [1, 16, 8], strides = [1, 1, 1]} : vector<4x16x8xf32> to vector<1x16x8xf32>
    %83 = vector.shape_cast %82 : vector<1x16x8xf32> to vector<16x8xf32>
    %84 = vector.extract_strided_slice %81 {offsets = [1, 0, 0], sizes = [1, 16, 8], strides = [1, 1, 1]} : vector<4x16x8xf32> to vector<1x16x8xf32>
    %85 = vector.shape_cast %84 : vector<1x16x8xf32> to vector<16x8xf32>
    %86 = vector.extract_strided_slice %81 {offsets = [2, 0, 0], sizes = [1, 16, 8], strides = [1, 1, 1]} : vector<4x16x8xf32> to vector<1x16x8xf32>
    %87 = vector.shape_cast %86 : vector<1x16x8xf32> to vector<16x8xf32>
    %88 = vector.extract_strided_slice %81 {offsets = [3, 0, 0], sizes = [1, 16, 8], strides = [1, 1, 1]} : vector<4x16x8xf32> to vector<1x16x8xf32>
    %89 = vector.shape_cast %88 : vector<1x16x8xf32> to vector<16x8xf32>
    %90 = tpu.concatenate %83, %85, %87, %89 in 1 : vector<16x8xf32>, vector<16x8xf32>, vector<16x8xf32>, vector<16x8xf32> -> vector<16x32xf32>
    %c0_26 = arith.constant 0 : index
    %c0_27 = arith.constant 0 : index
    %91 = vector.load %arg8[%c0_26, %c0_27] : memref<32x32xbf16, #tpu.memory_space<vmem>>, vector<32x32xbf16>
    %c0_28 = arith.constant 0 : index
    %c0_29 = arith.constant 0 : index
    %92 = vector.load %arg9[%c0_28, %c0_29] : memref<1x32xf32, #tpu.memory_space<vmem>>, vector<1x32xf32>
    %93 = arith.truncf %90 : vector<16x32xf32> to vector<16x32xbf16>
    %cst_30 = arith.constant dense<0.000000e+00> : vector<16x32xf32>
    %94 = tpu.matmul %93, %91, %cst_30 {dimension_numbers = #tpu.dot_dimension_numbers<[1], [0], [0], [1], [0, 0, 1, 1], [], []>} : vector<16x32xbf16>, vector<32x32xbf16>, vector<16x32xf32> -> vector<16x32xf32>
    %95 = vector.broadcast %92 : vector<1x32xf32> to vector<16x32xf32>
    %96 = arith.addf %94, %95 : vector<16x32xf32>
    %97 = arith.addf %23, %96 : vector<16x32xf32>
    %cst_31 = arith.constant dense<0.000000e+00> : vector<16xf32>
    %98 = vector.multi_reduction <add>, %97, %cst_31 [1] : vector<16x32xf32> to vector<16xf32>
    %99 = vector.shape_cast %98 : vector<16xf32> to vector<16x1xf32>
    %cst_32 = arith.constant 3.200000e+01 : f32
    %100 = vector.broadcast %cst_32 : f32 to vector<16x1xf32>
    %101 = arith.divf %99, %100 : vector<16x1xf32>
    %102 = vector.broadcast %101 : vector<16x1xf32> to vector<16x32xf32>
    %103 = arith.subf %97, %102 : vector<16x32xf32>
    %104 = arith.mulf %103, %103 : vector<16x32xf32>
    %cst_33 = arith.constant dense<0.000000e+00> : vector<16xf32>
    %105 = vector.multi_reduction <add>, %104, %cst_33 [1] : vector<16x32xf32> to vector<16xf32>
    %106 = vector.shape_cast %105 : vector<16xf32> to vector<16x1xf32>
    %cst_34 = arith.constant 0.0322580636 : f32
    %107 = vector.broadcast %cst_34 : f32 to vector<16x1xf32>
    %108 = arith.mulf %106, %107 : vector<16x1xf32>
    %109 = math.sqrt %108 : vector<16x1xf32>
    %cst_35 = arith.constant 9.99999997E-7 : f32
    %110 = vector.broadcast %cst_35 : f32 to vector<16x1xf32>
    %111 = arith.addf %109, %110 : vector<16x1xf32>
    %112 = tpu.reciprocal %111 {approx = true} : vector<16x1xf32> -> vector<16x1xf32>
    %113 = vector.broadcast %2 : f32 to vector<16x32xf32>
    %114 = arith.mulf %113, %103 : vector<16x32xf32>
    %115 = vector.broadcast %112 : vector<16x1xf32> to vector<16x32xf32>
    %116 = arith.mulf %114, %115 : vector<16x32xf32>
    %117 = vector.broadcast %3 : f32 to vector<16x32xf32>
    %118 = arith.addf %116, %117 : vector<16x32xf32>
    %c0_36 = arith.constant 0 : index
    %c0_37 = arith.constant 0 : index
    %119 = vector.load %arg10[%c0_36, %c0_37] : memref<32x32xbf16, #tpu.memory_space<vmem>>, vector<32x32xbf16>
    %c0_38 = arith.constant 0 : index
    %c0_39 = arith.constant 0 : index
    %120 = vector.load %arg11[%c0_38, %c0_39] : memref<1x32xf32, #tpu.memory_space<vmem>>, vector<1x32xf32>
    %121 = arith.truncf %118 : vector<16x32xf32> to vector<16x32xbf16>
    %cst_40 = arith.constant dense<0.000000e+00> : vector<16x32xf32>
    %122 = tpu.matmul %121, %119, %cst_40 {dimension_numbers = #tpu.dot_dimension_numbers<[1], [0], [0], [1], [0, 0, 1, 1], [], []>} : vector<16x32xbf16>, vector<32x32xbf16>, vector<16x32xf32> -> vector<16x32xf32>
    %123 = vector.broadcast %120 : vector<1x32xf32> to vector<16x32xf32>
    %124 = arith.addf %122, %123 : vector<16x32xf32>
    %c0_41 = arith.constant 0 : index
    %c0_42 = arith.constant 0 : index
    %c0_43 = arith.constant 0 : index
    %125 = vector.load %arg22[%c0_41, %c0_42, %c0_43] : memref<8x16x8xbf16, #tpu.memory_space<vmem>>, vector<8x16x8xbf16>
    %126 = vector.extract_strided_slice %125 {offsets = [0, 0, 0], sizes = [4, 16, 8], strides = [1, 1, 1]} : vector<8x16x8xbf16> to vector<4x16x8xbf16>
    %127 = vector.extract_strided_slice %125 {offsets = [4, 0, 0], sizes = [4, 16, 8], strides = [1, 1, 1]} : vector<8x16x8xbf16> to vector<4x16x8xbf16>
    %128 = arith.truncf %124 : vector<16x32xf32> to vector<16x32xbf16>
    %129 = vector.extract_strided_slice %128 {offsets = [0, 0], sizes = [16, 8], strides = [1, 1]} : vector<16x32xbf16> to vector<16x8xbf16>
    %130 = vector.extract_strided_slice %128 {offsets = [0, 8], sizes = [16, 8], strides = [1, 1]} : vector<16x32xbf16> to vector<16x8xbf16>
    %131 = vector.extract_strided_slice %128 {offsets = [0, 16], sizes = [16, 8], strides = [1, 1]} : vector<16x32xbf16> to vector<16x8xbf16>
    %132 = vector.extract_strided_slice %128 {offsets = [0, 24], sizes = [16, 8], strides = [1, 1]} : vector<16x32xbf16> to vector<16x8xbf16>
    %133 = vector.shape_cast %129 : vector<16x8xbf16> to vector<1x16x8xbf16>
    %134 = vector.shape_cast %130 : vector<16x8xbf16> to vector<1x16x8xbf16>
    %135 = vector.shape_cast %131 : vector<16x8xbf16> to vector<1x16x8xbf16>
    %136 = vector.shape_cast %132 : vector<16x8xbf16> to vector<1x16x8xbf16>
    %137 = tpu.concatenate %133, %134, %135, %136 in 0 : vector<1x16x8xbf16>, vector<1x16x8xbf16>, vector<1x16x8xbf16>, vector<1x16x8xbf16> -> vector<4x16x8xbf16>
    "tpu.trace_start"() <{level = 10 : i32, message = "hqd,hkd->hqk"}> : () -> ()
    %cst_44 = arith.constant dense<0.000000e+00> : vector<4x16x16xf32>
    %138 = tpu.matmul %137, %126, %cst_44 {dimension_numbers = #tpu.dot_dimension_numbers<[2], [2], [1], [1], [0, 0, 0, 1, 1, 1], [0], [0]>} : vector<4x16x8xbf16>, vector<4x16x8xbf16>, vector<4x16x16xf32> -> vector<4x16x16xf32>
    "tpu.trace_stop"() : () -> ()
    %cst_45 = arith.constant 0.353553385 : f32
    %139 = vector.broadcast %cst_45 : f32 to vector<4x16x16xf32>
    %140 = arith.mulf %138, %139 : vector<4x16x16xf32>
    %141 = vector.shape_cast %21 : vector<1x16xf32> to vector<1x1x16xf32>
    %142 = vector.broadcast %141 : vector<1x1x16xf32> to vector<4x16x16xf32>
    %143 = arith.addf %140, %142 : vector<4x16x16xf32>
    %cst_46 = arith.constant dense<0xFF800000> : vector<4x16xf32>
    %144 = vector.multi_reduction <maximumf>, %143, %cst_46 [2] : vector<4x16x16xf32> to vector<4x16xf32>
    %145 = vector.shape_cast %144 : vector<4x16xf32> to vector<4x16x1xf32>
    %146 = vector.broadcast %145 : vector<4x16x1xf32> to vector<4x16x16xf32>
    %147 = arith.subf %143, %146 : vector<4x16x16xf32>
    %148 = math.exp %147 : vector<4x16x16xf32>
    %cst_47 = arith.constant dense<0.000000e+00> : vector<4x16xf32>
    %149 = vector.multi_reduction <add>, %148, %cst_47 [2] : vector<4x16x16xf32> to vector<4x16xf32>
    %150 = vector.shape_cast %149 : vector<4x16xf32> to vector<4x16x1xf32>
    %151 = tpu.reciprocal %150 {approx = true} : vector<4x16x1xf32> -> vector<4x16x1xf32>
    %152 = vector.broadcast %151 : vector<4x16x1xf32> to vector<4x16x16xf32>
    %153 = arith.mulf %148, %152 : vector<4x16x16xf32>
    %154 = arith.truncf %153 : vector<4x16x16xf32> to vector<4x16x16xbf16>
    "tpu.trace_start"() <{level = 10 : i32, message = "hqk,hkd->hqd"}> : () -> ()
    %cst_48 = arith.constant dense<0.000000e+00> : vector<4x16x8xf32>
    %155 = tpu.matmul %154, %127, %cst_48 {dimension_numbers = #tpu.dot_dimension_numbers<[2], [1], [1], [2], [0, 0, 0, 1, 1, 2], [0], [0]>} : vector<4x16x16xbf16>, vector<4x16x8xbf16>, vector<4x16x8xf32> -> vector<4x16x8xf32>
    "tpu.trace_stop"() : () -> ()
    %156 = vector.extract_strided_slice %155 {offsets = [0, 0, 0], sizes = [1, 16, 8], strides = [1, 1, 1]} : vector<4x16x8xf32> to vector<1x16x8xf32>
    %157 = vector.shape_cast %156 : vector<1x16x8xf32> to vector<16x8xf32>
    %158 = vector.extract_strided_slice %155 {offsets = [1, 0, 0], sizes = [1, 16, 8], strides = [1, 1, 1]} : vector<4x16x8xf32> to vector<1x16x8xf32>
    %159 = vector.shape_cast %158 : vector<1x16x8xf32> to vector<16x8xf32>
    %160 = vector.extract_strided_slice %155 {offsets = [2, 0, 0], sizes = [1, 16, 8], strides = [1, 1, 1]} : vector<4x16x8xf32> to vector<1x16x8xf32>
    %161 = vector.shape_cast %160 : vector<1x16x8xf32> to vector<16x8xf32>
    %162 = vector.extract_strided_slice %155 {offsets = [3, 0, 0], sizes = [1, 16, 8], strides = [1, 1, 1]} : vector<4x16x8xf32> to vector<1x16x8xf32>
    %163 = vector.shape_cast %162 : vector<1x16x8xf32> to vector<16x8xf32>
    %164 = tpu.concatenate %157, %159, %161, %163 in 1 : vector<16x8xf32>, vector<16x8xf32>, vector<16x8xf32>, vector<16x8xf32> -> vector<16x32xf32>
    %c0_49 = arith.constant 0 : index
    %c0_50 = arith.constant 0 : index
    %165 = vector.load %arg14[%c0_49, %c0_50] : memref<32x32xbf16, #tpu.memory_space<vmem>>, vector<32x32xbf16>
    %c0_51 = arith.constant 0 : index
    %c0_52 = arith.constant 0 : index
    %166 = vector.load %arg15[%c0_51, %c0_52] : memref<1x32xf32, #tpu.memory_space<vmem>>, vector<1x32xf32>
    %167 = arith.truncf %164 : vector<16x32xf32> to vector<16x32xbf16>
    %cst_53 = arith.constant dense<0.000000e+00> : vector<16x32xf32>
    %168 = tpu.matmul %167, %165, %cst_53 {dimension_numbers = #tpu.dot_dimension_numbers<[1], [0], [0], [1], [0, 0, 1, 1], [], []>} : vector<16x32xbf16>, vector<32x32xbf16>, vector<16x32xf32> -> vector<16x32xf32>
    %169 = vector.broadcast %166 : vector<1x32xf32> to vector<16x32xf32>
    %170 = arith.addf %168, %169 : vector<16x32xf32>
    %171 = arith.addf %97, %170 : vector<16x32xf32>
    %cst_54 = arith.constant dense<0.000000e+00> : vector<16xf32>
    %172 = vector.multi_reduction <add>, %171, %cst_54 [1] : vector<16x32xf32> to vector<16xf32>
    %173 = vector.shape_cast %172 : vector<16xf32> to vector<16x1xf32>
    %cst_55 = arith.constant 3.200000e+01 : f32
    %174 = vector.broadcast %cst_55 : f32 to vector<16x1xf32>
    %175 = arith.divf %173, %174 : vector<16x1xf32>
    %176 = vector.broadcast %175 : vector<16x1xf32> to vector<16x32xf32>
    %177 = arith.subf %171, %176 : vector<16x32xf32>
    %178 = arith.mulf %177, %177 : vector<16x32xf32>
    %cst_56 = arith.constant dense<0.000000e+00> : vector<16xf32>
    %179 = vector.multi_reduction <add>, %178, %cst_56 [1] : vector<16x32xf32> to vector<16xf32>
    %180 = vector.shape_cast %179 : vector<16xf32> to vector<16x1xf32>
    %cst_57 = arith.constant 0.0322580636 : f32
    %181 = vector.broadcast %cst_57 : f32 to vector<16x1xf32>
    %182 = arith.mulf %180, %181 : vector<16x1xf32>
    %183 = math.sqrt %182 : vector<16x1xf32>
    %cst_58 = arith.constant 9.99999997E-7 : f32
    %184 = vector.broadcast %cst_58 : f32 to vector<16x1xf32>
    %185 = arith.addf %183, %184 : vector<16x1xf32>
    %186 = tpu.reciprocal %185 {approx = true} : vector<16x1xf32> -> vector<16x1xf32>
    %187 = vector.broadcast %4 : f32 to vector<16x32xf32>
    %188 = arith.mulf %187, %177 : vector<16x32xf32>
    %189 = vector.broadcast %186 : vector<16x1xf32> to vector<16x32xf32>
    %190 = arith.mulf %188, %189 : vector<16x32xf32>
    %191 = vector.broadcast %5 : f32 to vector<16x32xf32>
    %192 = arith.addf %190, %191 : vector<16x32xf32>
    %c0_59 = arith.constant 0 : index
    %c0_60 = arith.constant 0 : index
    %193 = vector.load %arg16[%c0_59, %c0_60] : memref<32x64xbf16, #tpu.memory_space<vmem>>, vector<32x64xbf16>
    %c0_61 = arith.constant 0 : index
    %c0_62 = arith.constant 0 : index
    %194 = vector.load %arg17[%c0_61, %c0_62] : memref<1x64xf32, #tpu.memory_space<vmem>>, vector<1x64xf32>
    %195 = arith.truncf %192 : vector<16x32xf32> to vector<16x32xbf16>
    %cst_63 = arith.constant dense<0.000000e+00> : vector<16x64xf32>
    %196 = tpu.matmul %195, %193, %cst_63 {dimension_numbers = #tpu.dot_dimension_numbers<[1], [0], [0], [1], [0, 0, 1, 1], [], []>} : vector<16x32xbf16>, vector<32x64xbf16>, vector<16x64xf32> -> vector<16x64xf32>
    %197 = vector.broadcast %194 : vector<1x64xf32> to vector<16x64xf32>
    %198 = arith.addf %196, %197 : vector<16x64xf32>
    %cst_64 = arith.constant 0.000000e+00 : f32
    %199 = vector.broadcast %cst_64 : f32 to vector<16x64xf32>
    %200 = arith.maximumf %198, %199 : vector<16x64xf32>
    %c0_65 = arith.constant 0 : index
    %c0_66 = arith.constant 0 : index
    %201 = vector.load %arg18[%c0_65, %c0_66] : memref<64x32xbf16, #tpu.memory_space<vmem>>, vector<64x32xbf16>
    %c0_67 = arith.constant 0 : index
    %c0_68 = arith.constant 0 : index
    %202 = vector.load %arg19[%c0_67, %c0_68] : memref<1x32xf32, #tpu.memory_space<vmem>>, vector<1x32xf32>
    %203 = arith.truncf %200 : vector<16x64xf32> to vector<16x64xbf16>
    %cst_69 = arith.constant dense<0.000000e+00> : vector<16x32xf32>
    %204 = tpu.matmul %203, %201, %cst_69 {dimension_numbers = #tpu.dot_dimension_numbers<[1], [0], [0], [1], [0, 0, 1, 1], [], []>} : vector<16x64xbf16>, vector<64x32xbf16>, vector<16x32xf32> -> vector<16x32xf32>
    %205 = vector.broadcast %202 : vector<1x32xf32> to vector<16x32xf32>
    %206 = arith.addf %204, %205 : vector<16x32xf32>
    %207 = arith.addf %171, %206 : vector<16x32xf32>
    %c0_70 = arith.constant 0 : index
    %c0_71 = arith.constant 0 : index
    %c0_72 = arith.constant 0 : index
    %208 = vector.load %arg20[%c0_70, %c0_71, %c0_72] : memref<1x16x32xf32, #tpu.memory_space<vmem>>, vector<1x16x32xf32>
    %209 = vector.shape_cast %208 : vector<1x16x32xf32> to vector<16x32xf32>
    %210 = vector.shape_cast %207 : vector<16x32xf32> to vector<1x16x32xf32>
    tpu.vector_store %arg20[%c0_70, %c0_71, %c0_72], %210 {strides = array<i32>} : memref<1x16x32xf32, #tpu.memory_space<vmem>>, vector<1x16x32xf32>,
    return
  }
  func.func @transform_0(%arg0: i32, %arg1: i32) -> i32 {
    %c0_i32 = arith.constant 0 : i32
    %c0_i32_0 = arith.constant 0 : i32
    return %c0_i32 : i32
  }
  func.func @transform_1(%arg0: i32, %arg1: i32) -> (i32, i32, i32) {
    %c0_i32 = arith.constant 0 : i32
    %c0_i32_0 = arith.constant 0 : i32
    return %arg0, %arg1, %c0_i32 : i32, i32, i32
  }
  func.func @transform_2(%arg0: i32, %arg1: i32) -> (i32, i32, i32) {
    %c0_i32 = arith.constant 0 : i32
    %c0_i32_0 = arith.constant 0 : i32
    %c0_i32_1 = arith.constant 0 : i32
    return %arg0, %c0_i32, %c0_i32_0 : i32, i32, i32
  }
  func.func @transform_3(%arg0: i32, %arg1: i32) -> (i32, i32, i32) {
    %c0_i32 = arith.constant 0 : i32
    %c0_i32_0 = arith.constant 0 : i32
    %c0_i32_1 = arith.constant 0 : i32
    return %arg0, %c0_i32, %c0_i32_0 : i32, i32, i32
  }
  func.func @transform_4(%arg0: i32, %arg1: i32) -> (i32, i32) {
    %c0_i32 = arith.constant 0 : i32
    %c0_i32_0 = arith.constant 0 : i32
    %c0_i32_1 = arith.constant 0 : i32
    return %c0_i32, %c0_i32_0 : i32, i32
  }
  func.func @transform_5(%arg0: i32, %arg1: i32) -> (i32, i32) {
    %c0_i32 = arith.constant 0 : i32
    %c0_i32_0 = arith.constant 0 : i32
    %c0_i32_1 = arith.constant 0 : i32
    return %c0_i32, %c0_i32_0 : i32, i32
  }
  func.func @transform_6(%arg0: i32, %arg1: i32) -> (i32, i32) {
    %c0_i32 = arith.constant 0 : i32
    %c0_i32_0 = arith.constant 0 : i32
    %c0_i32_1 = arith.constant 0 : i32
    return %c0_i32, %c0_i32_0 : i32, i32
  }
  func.func @transform_7(%arg0: i32, %arg1: i32) -> (i32, i32) {
    %c0_i32 = arith.constant 0 : i32
    %c0_i32_0 = arith.constant 0 : i32
    %c0_i32_1 = arith.constant 0 : i32
    return %c0_i32, %c0_i32_0 : i32, i32
  }
  func.func @transform_8(%arg0: i32, %arg1: i32) -> (i32, i32) {
    %c0_i32 = arith.constant 0 : i32
    %c0_i32_0 = arith.constant 0 : i32
    %c0_i32_1 = arith.constant 0 : i32
    return %c0_i32, %c0_i32_0 : i32, i32
  }
  func.func @transform_9(%arg0: i32, %arg1: i32) -> (i32, i32) {
    %c0_i32 = arith.constant 0 : i32
    %c0_i32_0 = arith.constant 0 : i32
    %c0_i32_1 = arith.constant 0 : i32
    return %c0_i32, %c0_i32_0 : i32, i32
  }
  func.func @transform_10(%arg0: i32, %arg1: i32) -> (i32, i32) {
    %c0_i32 = arith.constant 0 : i32
    %c0_i32_0 = arith.constant 0 : i32
    %c0_i32_1 = arith.constant 0 : i32
    return %c0_i32, %c0_i32_0 : i32, i32
  }
  func.func @transform_11(%arg0: i32, %arg1: i32) -> (i32, i32) {
    %c0_i32 = arith.constant 0 : i32
    %c0_i32_0 = arith.constant 0 : i32
    %c0_i32_1 = arith.constant 0 : i32
    return %c0_i32, %c0_i32_0 : i32, i32
  }
  func.func @transform_12(%arg0: i32, %arg1: i32) -> (i32, i32) {
    %c0_i32 = arith.constant 0 : i32
    %c0_i32_0 = arith.constant 0 : i32
    %c0_i32_1 = arith.constant 0 : i32
    return %c0_i32, %c0_i32_0 : i32, i32
  }
  func.func @transform_13(%arg0: i32, %arg1: i32) -> (i32, i32) {
    %c0_i32 = arith.constant 0 : i32
    %c0_i32_0 = arith.constant 0 : i32
    %c0_i32_1 = arith.constant 0 : i32
    return %c0_i32, %c0_i32_0 : i32, i32
  }
  func.func @transform_14(%arg0: i32, %arg1: i32) -> (i32, i32) {
    %c0_i32 = arith.constant 0 : i32
    %c0_i32_0 = arith.constant 0 : i32
    %c0_i32_1 = arith.constant 0 : i32
    return %c0_i32, %c0_i32_0 : i32, i32
  }
  func.func @transform_15(%arg0: i32, %arg1: i32) -> (i32, i32) {
    %c0_i32 = arith.constant 0 : i32
    %c0_i32_0 = arith.constant 0 : i32
    %c0_i32_1 = arith.constant 0 : i32
    return %c0_i32, %c0_i32_0 : i32, i32
  }
  func.func @transform_16(%arg0: i32, %arg1: i32) -> (i32, i32) {
    %c0_i32 = arith.constant 0 : i32
    %c0_i32_0 = arith.constant 0 : i32
    %c0_i32_1 = arith.constant 0 : i32
    return %c0_i32, %c0_i32_0 : i32, i32
  }
  func.func @transform_17(%arg0: i32, %arg1: i32) -> (i32, i32) {
    %c0_i32 = arith.constant 0 : i32
    %c0_i32_0 = arith.constant 0 : i32
    %c0_i32_1 = arith.constant 0 : i32
    return %c0_i32, %c0_i32_0 : i32, i32
  }
  func.func @transform_18(%arg0: i32, %arg1: i32) -> (i32, i32, i32) {
    %c0_i32 = arith.constant 0 : i32
    %c0_i32_0 = arith.constant 0 : i32
    return %arg0, %arg1, %c0_i32 : i32, i32, i32
  }
}

</mosaic_0001>

<bundles_post_ra>
// kernel: tpu_custom_call.1
= control target key start
LH: loop header
LB: loop body
LE: loop exit
PB: predicated region body
PF: predicated region fallthrough
CT: control target
= control target key end

     0   :  { %6 = vsyncpa [#allocation3], 0  ;;  %s125_s0 = inlined_call_operand.hbm [shape: f32[8,128], index: 0, kind: input, shape index: {}]   ;;  %s126_s1 = inlined_call_operand.hbm [shape: f32[8,128], index: 1, kind: output, shape index: {}]  }
   0x1   :  { %7 = vsyncpa [#allocation4], 0  ;;  %s89_s6 = smov [#allocation2]   ;;  %s41_s10 = scalar_lea.hbm %s125_s0, 128 }
   0x2   :  { %s14_s7 = sshll.u32 %s89_s6, 4  ;;  %p42_p0 = scmp.ne.s32.totalorder %s125_s0, %s41_s10  ;;  %s15_s7 = int_to_ptr.vmem [resolvable:$true] %s14_s7 }
   0x3   :  { %p45_p1 = scmp.lt.u32.totalorder %s41_s10, %s125_s0 }
   0x5   :  { %p47_p2 = pnand %p45_p1, %p42_p0 }
   0x7   :  { %50 = shalt.err (!%p47_p2)
}
   0x8   :  { %s51_s15 = scalar_lea.vmem %s15_s7, 128  ;;  %p56_p4 = scmp.lt.s32.totalorder %s15_s7, %s15_s7 }
   0x9   :  { %p52_p3 = scmp.ne.s32.totalorder %s15_s7, %s51_s15  ;;  %p57_p5 = scmp.lt.s32.totalorder %s51_s15, %s51_s15 }
   0xb   :  { %p58_p6 = por %p57_p5, %p56_p4 }
   0xd   :  { %p59_p7 = pnand %p58_p6, %p52_p3 }
   0xf   :  { %62 = shalt.err (!%p59_p7)
}
  0x10   :  { %17 = dma.hbm_to_vmem [thread:$0]  %s125_s0, 128, %s15_s7, [#allocation3]  }
  0x11   :  { %85 = dma.done.wait [#allocation3], 128  }
  0x12   :  { %86 = vsyncadd [#allocation3], 4294967168  ;;  %s90_s18 = smov [#allocation5]   ;;  %v21_v0 = vld [vmem:[#allocation2] sm:$0xff] }
  0x13   :  { %s30_s19 = sshll.u32 %s90_s18, 4  ;;  %v22_v1 = vadd.f32 1.0, %v21_v0  ;;  %s31_s19 = int_to_ptr.vmem [resolvable:$true] %s30_s19 }
  0x14   :  { %s63_s20 = scalar_lea.vmem %s31_s19, 128  ;;  %p68_p9 = scmp.lt.s32.totalorder %s31_s19, %s31_s19 }
  0x15   :  { %23 = vst [vmem:[#allocation5] sm:$0xff] %v22_v1  ;;  %p64_p8 = scmp.ne.s32.totalorder %s31_s19, %s63_s20  ;;  %p69_p10 = scmp.lt.s32.totalorder %s63_s20, %s63_s20 }
  0x17   :  { %p70_p11 = por %p69_p10, %p68_p9 }
  0x19   :  { %p71_p12 = pnand %p70_p11, %p64_p8 }
  0x1b   :  { %74 = shalt.err (!%p71_p12)
}
  0x1c   :  { %s75_s23 = scalar_lea.hbm %s126_s1, 128 }
  0x1d   :  { %p76_p13 = scmp.ne.s32.totalorder %s126_s1, %s75_s23  ;;  %p79_p0 = scmp.lt.u32.totalorder %s75_s23, %s126_s1 }
  0x1f   :  { %p81_p1 = pnand %p79_p0, %p76_p13 }
  0x21   :  { %84 = shalt.err (!%p81_p1)
}
  0x22   :  { %33 = dma.vmem_to_hbm [thread:$0]  %s31_s19, 128, %s126_s1, [#allocation4]  }
  0x23   :  { %87 = dma.done.wait [#allocation4], 128  }
  0x24   :  { %88 = vsyncadd [#allocation4], 4294967168 }
  0x25   :  { %37 = vsyncpa [#allocation3], 1 }
  0x26   :  { %38 = vsyncpa [#allocation4], 1 }

// kernel: tpu_custom_call.1
= control target key start
LH: loop header
LB: loop body
LE: loop exit
PB: predicated region body
PF: predicated region fallthrough
CT: control target
= control target key end

     0   :  { %s4938_s0 = inlined_call_operand.vmem [shape: f32[6], index: 0, kind: input, shape index: {}]   ;;  %s4939_s1 = inlined_call_operand.vmem [shape: f32[2,16,32], index: 1, kind: input, shape index: {}]   ;;  %s4940_s2 = inlined_call_operand.hbm [shape: f32[2,16,32], index: 2, kind: input, shape index: {}]   ;;  %s4941_s3 = inlined_call_operand.hbm [shape: f32[2,1,16], index: 3, kind: input, shape index: {}]   ;;  %s4942_s4 = inlined_call_operand.vmem [shape: bf16[32,96], index: 4, kind: input, shape index: {}]   ;;  %s4943_s5 = inlined_call_operand.hbm [shape: f32[1,96], index: 5, kind: input, shape index: {}]   ;;  %s4944_s6 = inlined_call_operand.hbm [shape: bf16[32,32], index: 6, kind: input, shape index: {}]   ;;  %s4945_s7 = inlined_call_operand.hbm [shape: f32[1,32], index: 7, kind: input, shape index: {}]   ;;  %s4946_s8 = inlined_call_operand.hbm [shape: bf16[32,32], index: 8, kind: input, shape index: {}]   ;;  %s4947_s9 = inlined_call_operand.hbm [shape: f32[1,32], index: 9, kind: input, shape index: {}]   ;;  %s4948_s10 = inlined_call_operand.vmem [shape: bf16[32,64], index: 10, kind: input, shape index: {}]   ;;  %s4949_s11 = inlined_call_operand.hbm [shape: f32[1,64], index: 11, kind: input, shape index: {}]   ;;  %s4950_s12 = inlined_call_operand.hbm [shape: bf16[32,32], index: 12, kind: input, shape index: {}]   ;;  %s4951_s13 = inlined_call_operand.hbm [shape: f32[1,32], index: 13, kind: input, shape index: {}]   ;;  %s4952_s14 = inlined_call_operand.vmem [shape: bf16[32,64], index: 14, kind: input, shape index: {}]   ;;  %s4953_s15 = inlined_call_operand.vmem [shape: f32[1,64], index: 15, kind: input, shape index: {}]   ;;  %s4954_s16 = inlined_call_operand.vmem [shape: bf16[64,32], index: 16, kind: input, shape index: {}]   ;;  %s4955_s17 = inlined_call_operand.vmem [shape: f32[1,32], index: 17, kind: input, shape index: {}]   ;;  %s4956_s18 = inlined_call_operand.hbm [shape: f32[2,16,32], index: 18, kind: output, shape index: {}]  }
   0x1   :  { %4969 = sst [smem:[#allocation33_spill]] %s4938_s0 }
   0x2   :  { %4970 = sst [smem:[#allocation34_spill]] %s4939_s1 }
   0x3   :  { %4971 = sst [smem:[#allocation35_spill]] %s4940_s2 }
   0x4   :  { %4972 = sst [smem:[#allocation36_spill]] %s4942_s4 }
   0x5   :  { %4973 = sst [smem:[#allocation37_spill]] %s4943_s5 }
   0x6   :  { %4974 = sst [smem:[#allocation38_spill]] %s4944_s6 }
   0x7   :  { %4975 = sst [smem:[#allocation39_spill]] %s4945_s7 }
   0x8   :  { %4976 = sst [smem:[#allocation40_spill]] %s4946_s8 }
   0x9   :  { %4977 = sst [smem:[#allocation41_spill]] %s4947_s9 }
   0xa   :  { %4978 = sst [smem:[#allocation42_spill]] %s4948_s10 }
   0xb   :  { %4979 = sst [smem:[#allocation43_spill]] %s4949_s11 }
   0xc   :  { %4980 = sst [smem:[#allocation44_spill]] %s4950_s12 }
   0xd   :  { %4981 = sst [smem:[#allocation45_spill]] %s4952_s14 }
   0xe   :  { %4982 = sst [smem:[#allocation46_spill]] %s4953_s15 }
   0xf   :  { %4983 = sst [smem:[#allocation47_spill]] %s4954_s16 }
  0x10   :  { %4984 = sst [smem:[#allocation48_spill]] %s4955_s17 }
  0x11   :  { %4985 = sst [smem:[#allocation49_spill]] %s4956_s18 }
  0x12   :  { %23 = vsyncpa [#allocation7], 0 }
  0x13   :  { %24 = vsyncpa [#allocation5], 0 }
  0x14   :  { %26 = vsyncpa [#allocation5 + $0x1], 0 }
  0x15   :  { %27 = vsyncpa [#allocation10], 0 }
  0x16   :  { %29 = vsyncpa [#allocation10 + $0x1], 0 }
  0x17   :  { %30 = vsyncpa [#allocation13], 0 }
  0x18   :  { %31 = vsyncpa [#allocation16], 0 }
  0x19   :  { %32 = vsyncpa [#allocation19], 0 }
  0x1a   :  { %33 = vsyncpa [#allocation22], 0 }
  0x1b   :  { %34 = vsyncpa [#allocation6], 0 }
  0x1c   :  { %36 = vsyncpa [#allocation6 + $0x1], 0  ;;  %s4108_s27 = smov 0   ;;  %s4110_s28 = smov 0  }
  0x1d   :  { %s4112_s29 = smov 0   ;;  %s4114_s30 = smov 0  }
  0x1e   :  { %s4116_s0 = smov 0   ;;  %s4118_s19 = smov 0  }
  0x1f LB: > { %s3983_s1 = smov [#allocation11]   ;;  %s4139_s21 = sadd.s32 4294967295, %s3981_s19   ;;  %s3981_s19 = sphi %s4118_s19, %s42_s19   ;;  %s3977_s0 = sphi %s4116_s0, %s5035_s0   ;;  %s3973_s30 = sphi %s4114_s30, %s5034_s30   ;;  %s3969_s29 = sphi %s4112_s29, %s5033_s29   ;;  %s3965_s28 = sphi %s4110_s28, %s5032_s28   ;;  %s3961_s27 = sphi %s4108_s27, %s5031_s27  }
  0x20   : > { %s509_s20 = sshll.u32 %s3983_s1, 4  ;;  %p2940_p0 = scmp.ge.s32.totalorder %s3981_s19, 1  ;;  %s4144_s20 = int_to_ptr.vmem [resolvable:$true] %s509_s20 }
  0x21   : > { %p4963_p1 = scmp.eq.s32.totalorder %s4139_s21, 0  ;;  %p482_p2 = scmp.lt.s32.totalorder %s3981_s19, 3 }
  0x22   : > { %s3984_s2 = smov [#allocation12]   ;;  %s3985_s25 = smov [#allocation15]  }
  0x23   : > { %p4146_p3 = pnand %p2940_p0, %p482_p2  ;;  %s519_s23 = sshll.u32 %s3984_s2, 4  ;;  %s4153_s23 = int_to_ptr.vmem [resolvable:$true] %s519_s23 }
  0x24   : > { %s543_s26 = sshll.u32 %s3985_s25, 4  ;;  %s4988_s5 = sld [smem:[#allocation37_spill]]  ;;  %s4161_s26 = int_to_ptr.vmem [resolvable:$true] %s543_s26 }
  0x25   : > { %s4986_s22 = scalar_select %p4146_p3, 1, 0 }
  0x26   : > { %p3296_p5 = pneg %p4146_p3 }
  0x28   : > { %p4157_p6 = pnand %p3296_p5, %p4963_p1 }
  0x2a   : > { %s3572_s17 = scalar_lea.hbm %s4988_s5, 16  ;;  %p4171_p8 = pneg %p4157_p6 }
  0x2b   : > { %p3573_p7 = scmp.ne.s32.totalorder %s4988_s5, %s3572_s17  ;;  %p3579_p11 = scmp.lt.u32.totalorder %s3572_s17, %s4988_s5 }
  0x2d   : > { %p3575_p9 = pnand %p4171_p8, %p3573_p7 }
  0x2f   : > { %p3576_p10 = pneg %p3575_p9 }
  0x31   : > { %p3581_p12 = pnand %p3579_p11, %p3576_p10 }
  0x33   : > { %3584 = shalt.err (!%p3581_p12)
}
  0x34   : > { %s3585_s15 = scalar_lea.vmem %s4144_s20, 16  ;;  %s3592_s16 = scalar_lea.vmem %s4144_s20, 32 }
  0x35   : > { %p3586_p13 = scmp.ne.s32.totalorder %s4144_s20, %s3585_s15  ;;  %p3593_p5 = scmp.lt.s32.totalorder %s4144_s20, %s4144_s20 }
  0x36   : > { %p3594_p7 = scmp.lt.s32.totalorder %s3592_s16, %s3585_s15 }
  0x37   : > { %p3588_p0 = pnand %p3586_p13, %p4171_p8 }
  0x38   : > { %p3595_p9 = por %p3594_p7, %p3593_p5 }
  0x39   : > { %p3589_p2 = pneg %p3588_p0 }
  0x3b   : > { %p3596_p4 = pnand %p3595_p9, %p3589_p2 }
  0x3d   : > { %3599 = shalt.err (!%p3596_p4)
}
  0x3e   : > { %3302 = dma.hbm_to_vmem [thread:$0]  (!%p4157_p6), %s4988_s5, 16, %s4144_s20, [#allocation10]  }
  0x3f   : > { %s4990_s6 = sld [smem:[#allocation38_spill]] }
  0x45   : > { %s3600_s25 = scalar_lea.hbm %s4990_s6, 256 }
  0x46   : > { %p3601_p10 = scmp.ne.s32.totalorder %s4990_s6, %s3600_s25  ;;  %p3607_p4 = scmp.lt.u32.totalorder %s3600_s25, %s4990_s6 }
  0x48   : > { %p3603_p11 = pnand %p3601_p10, %p4171_p8 }
  0x4a   : > { %p3604_p12 = pneg %p3603_p11 }
  0x4c   : > { %p3609_p13 = pnand %p3607_p4, %p3604_p12 }
  0x4e   : > { %3612 = shalt.err (!%p3609_p13)
}
  0x4f   : > { %s3613_s20 = scalar_lea.vmem %s4153_s23, 256  ;;  %p3621_p7 = scmp.lt.s32.totalorder %s4153_s23, %s4153_s23 }
  0x50   : > { %p3614_p0 = scmp.ne.s32.totalorder %s4153_s23, %s3613_s20  ;;  %p3622_p9 = scmp.lt.s32.totalorder %s3613_s20, %s3613_s20 }
  0x52   : > { %p3616_p2 = pnand %p3614_p0, %p4171_p8  ;;  %p3623_p10 = por %p3622_p9, %p3621_p7 }
  0x54   : > { %p3617_p5 = pneg %p3616_p2 }
  0x56   : > { %p3624_p11 = pnand %p3623_p10, %p3617_p5 }
  0x58   : > { %3627 = shalt.err (!%p3624_p11)
}
  0x59   : > { %s4965_s4 = smov 64   ;;  %s3987_s10 = smov 4  }
  0x5a   : > { %3305 = dma.hbm_to_vmem [thread:$0]  (!%p4157_p6), %s4990_s6, 256, %s4153_s23, [#allocation13], %s4965_s4, %s4965_s4, %s3987_s10  }
  0x5b   : > { %s4991_s8 = sld [smem:[#allocation40_spill]] }
  0x61   : > { %s3628_s25 = scalar_lea.hbm %s4991_s8, 256 }
  0x62   : > { %p3629_p12 = scmp.ne.s32.totalorder %s4991_s8, %s3628_s25  ;;  %p3635_p0 = scmp.lt.u32.totalorder %s3628_s25, %s4991_s8 }
  0x64   : > { %p3631_p4 = pnand %p3629_p12, %p4171_p8 }
  0x66   : > { %p3632_p13 = pneg %p3631_p4 }
  0x68   : > { %p3637_p2 = pnand %p3635_p0, %p3632_p13 }
  0x6a   : > { %3640 = shalt.err (!%p3637_p2)
}
  0x6b   : > { %s3641_s23 = scalar_lea.vmem %s4161_s26, 256  ;;  %p3649_p10 = scmp.lt.s32.totalorder %s4161_s26, %s4161_s26 }
  0x6c   : > { %p3642_p5 = scmp.ne.s32.totalorder %s4161_s26, %s3641_s23  ;;  %p3650_p11 = scmp.lt.s32.totalorder %s3641_s23, %s3641_s23 }
  0x6e   : > { %p3644_p7 = pnand %p3642_p5, %p4171_p8  ;;  %p3651_p12 = por %p3650_p11, %p3649_p10 }
  0x70   : > { %p3645_p9 = pneg %p3644_p7 }
  0x72   : > { %p3652_p4 = pnand %p3651_p12, %p3645_p9 }
  0x74   : > { %3655 = shalt.err (!%p3652_p4)
}
  0x75   : > { %3311 = dma.hbm_to_vmem [thread:$0]  (!%p4157_p6), %s4991_s8, 256, %s4161_s26, [#allocation16], %s4965_s4, %s4965_s4, %s3987_s10  }
  0x76   : > { %s3988_s17 = smov [#allocation18]   ;;  %s4992_s11 = sld [smem:[#allocation43_spill]] }
  0x77   : > { %s571_s18 = sshll.u32 %s3988_s17, 4  ;;  %s572_s18 = int_to_ptr.vmem [resolvable:$true] %s571_s18 }
  0x7c   : > { %s3656_s15 = scalar_lea.hbm %s4992_s11, 16 }
  0x7d   : > { %p3657_p13 = scmp.ne.s32.totalorder %s4992_s11, %s3656_s15  ;;  %p3663_p5 = scmp.lt.u32.totalorder %s3656_s15, %s4992_s11 }
  0x7f   : > { %p3659_p0 = pnand %p3657_p13, %p4171_p8 }
  0x81   : > { %p3660_p2 = pneg %p3659_p0 }
  0x83   : > { %p3665_p7 = pnand %p3663_p5, %p3660_p2 }
  0x85   : > { %3668 = shalt.err (!%p3665_p7)
}
  0x86   : > { %s3669_s26 = scalar_lea.vmem %s572_s18, 16  ;;  %s3676_s5 = scalar_lea.vmem %s572_s18, 32 }
  0x87   : > { %p3670_p9 = scmp.ne.s32.totalorder %s572_s18, %s3669_s26  ;;  %p3677_p12 = scmp.lt.s32.totalorder %s572_s18, %s572_s18 }
  0x88   : > { %p3678_p4 = scmp.lt.s32.totalorder %s3676_s5, %s3669_s26 }
  0x89   : > { %p3672_p10 = pnand %p3670_p9, %p4171_p8 }
  0x8a   : > { %p3679_p1 = por %p3678_p4, %p3677_p12 }
  0x8b   : > { %p3673_p11 = pneg %p3672_p10 }
  0x8d   : > { %p3680_p3 = pnand %p3679_p1, %p3673_p11 }
  0x8f   : > { %3683 = shalt.err (!%p3680_p3)
}
  0x90   : > { %3317 = dma.hbm_to_vmem [thread:$0]  (!%p4157_p6), %s4992_s11, 16, %s572_s18, [#allocation19]  }
  0x91   : > { %s4993_s25 = sld [smem:[#allocation33_spill]] }
  0x97   : > { %s495_s15 = sshll.u32 %s4993_s25, 4  ;;  %s496_s15 = int_to_ptr.vmem [resolvable:$true] %s495_s15 }
  0x98   : > { %s3684_s16 = scalar_lea.vmem %s496_s15, 16  ;;  %p3692_p5 = scmp.lt.s32.totalorder %s496_s15, %s496_s15 }
  0x99   : > { %p3685_p13 = scmp.ne.s32.totalorder %s496_s15, %s3684_s16  ;;  %p3693_p1 = scmp.lt.s32.totalorder %s3684_s16, %s3684_s16 }
  0x9b   : > { %p3687_p0 = pnand %p3685_p13, %p4171_p8  ;;  %p3694_p3 = por %p3693_p1, %p3692_p5 }
  0x9d   : > { %p3688_p2 = pneg %p3687_p0 }
  0x9f   : > { %p3695_p7 = pnand %p3694_p3, %p3688_p2 }
  0xa1   : > { %3698 = shalt.err (!%p3695_p7)
}
  0xa2   : > { %s3989_s20 = smov [#allocation4]   ;;  %s3990_s18 = smov [#allocation14]  }
  0xa3   : > { %3299 = dma.vmem_to_smem (!%p4157_p6), %s496_s15, 16, %s3989_s20, [#allocation7]  }
  0xa4   : > { %s533_s23 = sshll.u32 %s3990_s18, 4  ;;  %s3991_s26 = smov [#allocation17]   ;;  %s534_s23 = int_to_ptr.vmem [resolvable:$true] %s533_s23 }
  0xa5   : > { %s557_s5 = sshll.u32 %s3991_s26, 4  ;;  %s4994_s7 = sld [smem:[#allocation39_spill]]  ;;  %s558_s5 = int_to_ptr.vmem [resolvable:$true] %s557_s5 }
  0xab   : > { %s3699_s6 = scalar_lea.hbm %s4994_s7, 16 }
  0xac   : > { %p3700_p9 = scmp.ne.s32.totalorder %s4994_s7, %s3699_s6  ;;  %p3706_p12 = scmp.lt.u32.totalorder %s3699_s6, %s4994_s7 }
  0xae   : > { %p3702_p10 = pnand %p3700_p9, %p4171_p8 }
  0xb0   : > { %p3703_p11 = pneg %p3702_p10 }
  0xb2   : > { %p3708_p4 = pnand %p3706_p12, %p3703_p11 }
  0xb4   : > { %3711 = shalt.err (!%p3708_p4)
}
  0xb5   : > { %s3712_s15 = scalar_lea.vmem %s534_s23, 16  ;;  %s3719_s20 = scalar_lea.vmem %s534_s23, 32 }
  0xb6   : > { %p3713_p13 = scmp.ne.s32.totalorder %s534_s23, %s3712_s15  ;;  %p3720_p5 = scmp.lt.s32.totalorder %s534_s23, %s534_s23 }
  0xb7   : > { %p3721_p1 = scmp.lt.s32.totalorder %s3719_s20, %s3712_s15 }
  0xb8   : > { %p3715_p0 = pnand %p3713_p13, %p4171_p8 }
  0xb9   : > { %p3722_p3 = por %p3721_p1, %p3720_p5 }
  0xba   : > { %p3716_p2 = pneg %p3715_p0 }
  0xbc   : > { %p3723_p7 = pnand %p3722_p3, %p3716_p2 }
  0xbe   : > { %3726 = shalt.err (!%p3723_p7)
}
  0xbf   : > { %3308 = dma.hbm_to_vmem [thread:$0]  (!%p4157_p6), %s4994_s7, 16, %s534_s23, [#allocation13]  }
  0xc0   : > { %s4995_s9 = sld [smem:[#allocation41_spill]] }
  0xc6   : > { %s3727_s17 = scalar_lea.hbm %s4995_s9, 16 }
  0xc7   : > { %p3728_p9 = scmp.ne.s32.totalorder %s4995_s9, %s3727_s17  ;;  %p3734_p12 = scmp.lt.u32.totalorder %s3727_s17, %s4995_s9 }
  0xc9   : > { %p3730_p10 = pnand %p3728_p9, %p4171_p8 }
  0xcb   : > { %p3731_p11 = pneg %p3730_p10 }
  0xcd   : > { %p3736_p4 = pnand %p3734_p12, %p3731_p11 }
  0xcf   : > { %3739 = shalt.err (!%p3736_p4)
}
  0xd0   : > { %s3740_s15 = scalar_lea.vmem %s558_s5, 16  ;;  %s3747_s23 = scalar_lea.vmem %s558_s5, 32 }
  0xd1   : > { %p3741_p13 = scmp.ne.s32.totalorder %s558_s5, %s3740_s15  ;;  %p3748_p5 = scmp.lt.s32.totalorder %s558_s5, %s558_s5 }
  0xd2   : > { %p3749_p1 = scmp.lt.s32.totalorder %s3747_s23, %s3740_s15 }
  0xd3   : > { %p3743_p0 = pnand %p3741_p13, %p4171_p8 }
  0xd4   : > { %p3750_p3 = por %p3749_p1, %p3748_p5 }
  0xd5   : > { %p3744_p2 = pneg %p3743_p0 }
  0xd7   : > { %p3751_p7 = pnand %p3750_p3, %p3744_p2 }
  0xd9   : > { %3754 = shalt.err (!%p3751_p7)
}
  0xda   : > { %3314 = dma.hbm_to_vmem [thread:$0]  (!%p4157_p6), %s4995_s9, 16, %s558_s5, [#allocation16]  }
  0xdb   : > { %s3992_s26 = smov [#allocation20]   ;;  %s3993_s14 = smov [#allocation21]  }
  0xdc   : > { %s581_s4 = sshll.u32 %s3992_s26, 4  ;;  %s595_s17 = sshll.u32 %s3993_s14, 4  ;;  %s582_s4 = int_to_ptr.vmem [resolvable:$true] %s581_s4  ;;  %s596_s17 = int_to_ptr.vmem [resolvable:$true] %s595_s17 }
  0xdd   : > { %s4996_s12 = sld [smem:[#allocation44_spill]] }
  0xe3   : > { %s3755_s25 = scalar_lea.hbm %s4996_s12, 256 }
  0xe4   : > { %p3756_p9 = scmp.ne.s32.totalorder %s4996_s12, %s3755_s25  ;;  %p3762_p12 = scmp.lt.u32.totalorder %s3755_s25, %s4996_s12 }
  0xe6   : > { %p3758_p10 = pnand %p3756_p9, %p4171_p8 }
  0xe8   : > { %p3759_p11 = pneg %p3758_p10 }
  0xea   : > { %p3764_p4 = pnand %p3762_p12, %p3759_p11 }
  0xec   : > { %3767 = shalt.err (!%p3764_p4)
}
  0xed   : > { %s3768_s5 = scalar_lea.vmem %s582_s4, 256  ;;  %p3776_p5 = scmp.lt.s32.totalorder %s582_s4, %s582_s4 }
  0xee   : > { %p3769_p13 = scmp.ne.s32.totalorder %s582_s4, %s3768_s5  ;;  %p3777_p1 = scmp.lt.s32.totalorder %s3768_s5, %s3768_s5 }
  0xf0   : > { %p3771_p0 = pnand %p3769_p13, %p4171_p8  ;;  %p3778_p3 = por %p3777_p1, %p3776_p5 }
  0xf2   : > { %p3772_p2 = pneg %p3771_p0 }
  0xf4   : > { %p3779_p7 = pnand %p3778_p3, %p3772_p2 }
  0xf6   : > { %3782 = shalt.err (!%p3779_p7)
}
  0xf7   : > { %s4997_s18 = smov 64   ;;  %s3783_s25 = scalar_lea.hbm %s4951_s13, 16 }
  0xf8   : > { %3320 = dma.hbm_to_vmem [thread:$0]  (!%p4157_p6), %s4996_s12, 256, %s582_s4, [#allocation19], %s4997_s18, %s4997_s18, %s3987_s10  }
  0xf9   : > { %p3784_p9 = scmp.ne.s32.totalorder %s4951_s13, %s3783_s25  ;;  %p3790_p12 = scmp.lt.u32.totalorder %s3783_s25, %s4951_s13 }
  0xfb   : > { %p3786_p10 = pnand %p3784_p9, %p4171_p8 }
  0xfd   : > { %p3787_p11 = pneg %p3786_p10 }
  0xff   : > { %p3792_p4 = pnand %p3790_p12, %p3787_p11 }
 0x101   : > { %3795 = shalt.err (!%p3792_p4)
}
 0x102   : > { %s3796_s5 = scalar_lea.vmem %s596_s17, 16  ;;  %s3803_s10 = scalar_lea.vmem %s596_s17, 32 }
 0x103   : > { %p3797_p13 = scmp.ne.s32.totalorder %s596_s17, %s3796_s5  ;;  %p3804_p5 = scmp.lt.s32.totalorder %s596_s17, %s596_s17 }
 0x104   : > { %p3805_p1 = scmp.lt.s32.totalorder %s3803_s10, %s3796_s5 }
 0x105   : > { %p3799_p0 = pnand %p3797_p13, %p4171_p8 }
 0x106   : > { %p3806_p3 = por %p3805_p1, %p3804_p5 }
 0x107   : > { %p3800_p2 = pneg %p3799_p0 }
 0x109   : > { %p3807_p7 = pnand %p3806_p3, %p3800_p2 }
 0x10b   : > { %3810 = shalt.err (!%p3807_p7)
}
 0x10c   : > { %3323 = dma.hbm_to_vmem [thread:$0]  (!%p4157_p6), %s4951_s13, 16, %s596_s17, [#allocation22]  }
 0x10d   : > { %s2939_s2 = sadd.s32 4294967294, %s3981_s19   ;;  %s54_s26 = sadd.s32 1, %s3977_s0 }
 0x10e   : > { %s110_s24 = sadd.s32 1, %s3969_s29  ;;  %p56_p8 = scmp.ge.s32.totalorder %s54_s26, 2 }
 0x10f   : > { %p117_p9 = scmp.ne.s32.totalorder %s3969_s29, %s3965_s28  ;;  %p118_p10 = scmp.eq.s32.totalorder %s3981_s19, 0 }
 0x110   : > { %p123_p11 = scmp.ne.s32.totalorder %s3965_s28, %s3961_s27  ;;  %s5037_s26 = smov (%p56_p8, %s54_s26), 0 }
 0x111   : > { %p4355_p12 = por %p118_p10, %p117_p9  ;;  %p4999_p4 = scmp.eq.s32.totalorder %s4139_s21, 0 }
 0x112   : > { %s107_s6 = ssub.s32 %s3977_s0, %s5037_s26  ;;  %p469_p13 = scmp.eq.s32.totalorder %s4139_s21, 1 }
 0x113   : > { %p4361_p6 = por %p4999_p4, %p123_p11  ;;  %p108_p0 = scmp.eq.s32.totalorder %s107_s6, 0 }
 0x114   : > { %p475_p2 = scmp.eq.s32.totalorder %s2939_s2, 1  ;;  %p4368_p5 = por %p469_p13, %p117_p9 }
 0x115   : > { %s5000_s17 = scalar_select %p4361_p6, 1, 0 }
 0x116   : > { %s5001_s1 = scalar_select %p4368_p5, 1, 0 }
 0x117   : > { %p3344_p1 = scmp.lt.s32.totalorder %s3981_s19, 2  ;;  %p4376_p3 = por %p475_p2, %p123_p11 }
 0x118   : > { %s4374_s25 = scalar_select %p108_p0, %s3969_s29, %s110_s24  }
 0x119   : > { %s5002_s16 = scalar_select %p4376_p3, 1, 0 }
 0x11a   : > { %s4381_s15 = sand.u32 1, %s3969_s29   ;;  %s3028_s20 = sshll.u32 %s3977_s0, 8 }
 0x11b   : > { %s2951_s23 = sshll.u32 %s4381_s15, 4  ;;  %s5003_s4 = sld [smem:[#allocation35_spill]] }
 0x11c   : > { %s635_s2 = scalar_lea.vmem [#allocation8], %s2951_s23  ;;  %p4394_p7 = pnand %p3344_p1, %p4355_p12 }
 0x11d   : > { %s642_s24 = sshll.u32 %s635_s2, 4  ;;  %s632_s8 = scalar_lea.sflag [#allocation5], %s4381_s15  ;;  %s4390_s24 = int_to_ptr.vmem [resolvable:$true] %s642_s24 }
 0x11e   : > { %p3813_p9 = pneg %p4394_p7 }
 0x121   : > { %s4388_s18 = scalar_lea.hbm %s5003_s4, %s3028_s20  ;;  %s3816_s14 = scalar_lea.hbm %s5003_s4, 512 }
 0x122   : > { %s3811_s5 = scalar_lea.hbm %s4388_s18, 256  ;;  %p3817_p12 = scmp.lt.u32.totalorder %s4388_s18, %s5003_s4 }
 0x123   : > { %p3812_p8 = scmp.ne.s32.totalorder %s4388_s18, %s3811_s5  ;;  %p3818_p4 = scmp.lt.u32.totalorder %s3816_s14, %s3811_s5 }
 0x124   : > { %p3820_p0 = scmp.lt.u32.totalorder %s3811_s5, %s4388_s18 }
 0x125   : > { %p3814_p10 = pnand %p3813_p9, %p3812_p8  ;;  %p3819_p13 = por %p3818_p4, %p3817_p12 }
 0x127   : > { %p3815_p11 = pneg %p3814_p10  ;;  %p3821_p2 = por %p3820_p0, %p3819_p13 }
 0x129   : > { %p3822_p1 = pnand %p3821_p2, %p3815_p11 }
 0x12b   : > { %3825 = shalt.err (!%p3822_p1)
}
 0x12c   : > { %s3826_s7 = scalar_lea.vmem %s4390_s24, 256  ;;  %s3994_s23 = smov [#allocation8]  }
 0x12d   : > { %p3827_p8 = scmp.ne.s32.totalorder %s4390_s24, %s3826_s7  ;;  %s3831_s20 = sshll.u32 %s3994_s23, 4  ;;  %s3832_s20 = int_to_ptr.vmem [resolvable:$false] %s3831_s20 }
 0x12e   : > { %s3833_s10 = scalar_lea.vmem %s3832_s20, 512  ;;  %p3834_p5 = scmp.lt.s32.totalorder %s4390_s24, %s3832_s20 }
 0x12f   : > { %p3829_p10 = pnand %p3827_p8, %p3813_p9  ;;  %p3835_p12 = scmp.lt.s32.totalorder %s3833_s10, %s3826_s7 }
 0x131   : > { %p3830_p3 = pneg %p3829_p10  ;;  %p3836_p4 = por %p3835_p12, %p3834_p5 }
 0x133   : > { %p3837_p13 = pnand %p3836_p4, %p3830_p3 }
 0x135   : > { %3840 = shalt.err (!%p3837_p13)
}
 0x136   : > { %s3995_s5 = smov 128   ;;  %s3996_s14 = smov 8  }
 0x137   : > { %3327 = dma.hbm_to_vmem [thread:$0]  (!%p4394_p7), %s4388_s18, 256, %s4390_s24, %s632_s8, %s3995_s5, %s3995_s5, %s3996_s14  }
 0x138   : > { %s2954_s2 = sshll.u32 %s3977_s0, 4  ;;  %s655_s23 = scalar_lea.vmem [#allocation9], %s4381_s15 }
 0x139   : > { %s662_s20 = sshll.u32 %s655_s23, 4  ;;  %s4432_s4 = scalar_lea.hbm %s4941_s3, %s2954_s2  ;;  %s663_s20 = int_to_ptr.vmem [resolvable:$true] %s662_s20 }
 0x13a   : > { %s5005_s9 = sand.u32 1, %s3981_s19   ;;  %s3841_s12 = scalar_lea.hbm %s4432_s4, 16 }
 0x13b   : > { %s653_s11 = scalar_lea.sflag [#allocation10], %s5005_s9  ;;  %p3842_p5 = scmp.ne.s32.totalorder %s4432_s4, %s3841_s12 }
 0x13c   : > { %s3846_s18 = scalar_lea.hbm %s4941_s3, 32  ;;  %p3847_p0 = scmp.lt.u32.totalorder %s4432_s4, %s4941_s3 }
 0x13d   : > { %p3844_p3 = pnand %p3842_p5, %p3813_p9  ;;  %p3848_p2 = scmp.lt.u32.totalorder %s3846_s18, %s3841_s12 }
 0x13e   : > { %p3850_p8 = scmp.lt.u32.totalorder %s3841_s12, %s4432_s4 }
 0x13f   : > { %p3845_p11 = pneg %p3844_p3  ;;  %p3849_p1 = por %p3848_p2, %p3847_p0 }
 0x141   : > { %p3851_p10 = por %p3850_p8, %p3849_p1 }
 0x143   : > { %p3852_p12 = pnand %p3851_p10, %p3845_p11 }
 0x145   : > { %3855 = shalt.err (!%p3852_p12)
}
 0x146   : > { %s3856_s9 = scalar_lea.vmem %s663_s20, 16  ;;  %s3997_s14 = smov [#allocation9]  }
 0x147   : > { %p3857_p4 = scmp.ne.s32.totalorder %s663_s20, %s3856_s9  ;;  %s3861_s2 = sshll.u32 %s3997_s14, 4  ;;  %s3862_s2 = int_to_ptr.vmem [resolvable:$false] %s3861_s2 }
 0x148   : > { %s3863_s23 = scalar_lea.vmem %s3862_s2, 32  ;;  %p3864_p3 = scmp.lt.s32.totalorder %s663_s20, %s3862_s2 }
 0x149   : > { %p3859_p13 = pnand %p3857_p4, %p3813_p9  ;;  %p3865_p6 = scmp.lt.s32.totalorder %s3863_s23, %s3856_s9 }
 0x14b   : > { %p3860_p5 = pneg %p3859_p13  ;;  %p3866_p0 = por %p3865_p6, %p3864_p3 }
 0x14d   : > { %p3867_p2 = pnand %p3866_p0, %p3860_p5 }
 0x14f   : > { %3870 = shalt.err (!%p3867_p2)
}
 0x150   : > { %3330 = dma.hbm_to_vmem [thread:$0]  (!%p4394_p7), %s4432_s4, 16, %s663_s20, %s653_s11  }
 0x151   : > { %p5006_p11 = scmp.ne.s32.totalorder %s4986_s22, 0 }
 0x152   : > { %p5007_p1 = scmp.eq.s32.totalorder (!%p5006_p11), %s4139_s21, 0 }
 0x153   : > { %671 = sbr.rel (%p5006_p11) target bundleno = 4764 (0x129c), region = 92 }
 0x15a   : > { %3924 = dma.done.wait (%p5007_p1), [#allocation7], 16   ;;  %p5008_p9 = pmov %p5007_p1 }
 0x15b   : > { %s4462_s12 = sand.u32 1, %s3965_s28   ;;  %p5009_p6 = scmp.ne.s32.totalorder %s5000_s17, 0 }
 0x15c   : > { %3926 = vsyncadd (%p5008_p9), [#allocation7], 4294967280  ;;  %s2957_s7 = sshll.u32 %s4462_s12, 4  ;;  %s678_s6 = scalar_lea.sflag [#allocation5], %s4462_s12 }
 0x15d   : > { %s4468_s11 = scalar_lea.vmem [#allocation8], %s2957_s7 }
 0x15e   : > { %3928 = dma.done.wait (%p5009_p6), %s678_s6, 256  }
 0x15f   : > { %3930 = vsyncadd (%p5009_p6), %s678_s6, 4294967040  ;;  %s686_s22 = sand.u32 1, %s4139_s21   ;;  %s689_s20 = scalar_lea.vmem [#allocation9], %s4462_s12 }
 0x160   : > { %s687_s4 = scalar_lea.sflag [#allocation10], %s686_s22 }
 0x161   : > { %3932 = dma.done.wait (%p5009_p6), %s687_s4, 16  }
 0x162   : > { %3934 = vsyncadd (%p5009_p6), %s687_s4, 4294967280  ;;  %p5010_p7 = pmov %p5007_p1 }
 0x163   : > { %p5011_p8 = pmov %p5007_p1 }
 0x164   : > { %3936 = dma.done.wait (%p5010_p7), [#allocation10], 16  }
 0x165   : > { %3938 = vsyncadd (%p5011_p8), [#allocation10], 4294967280  ;;  %p5012_p10 = pmov %p5007_p1 }
 0x166   : > { %p5013_p12 = pmov %p5007_p1 }
 0x167   : > { %3940 = dma.done.wait (%p5012_p10), [#allocation13], 272  }
 0x168   : > { %3942 = vsyncadd (%p5013_p12), [#allocation13], 4294967024  ;;  %p5014_p4 = pmov %p5007_p1 }
 0x169   : > { %p5015_p13 = pmov %p5007_p1 }
 0x16a   : > { %3944 = dma.done.wait (%p5014_p4), [#allocation16], 272  }
 0x16b   : > { %3946 = vsyncadd (%p5015_p13), [#allocation16], 4294967024  ;;  %p5016_p5 = pmov %p5007_p1 }
 0x16c   : > { %p5017_p3 = pmov %p5007_p1 }
 0x16d   : > { %3948 = dma.done.wait (%p5016_p5), [#allocation19], 272  }
 0x16e   : > { %3950 = vsyncadd (%p5017_p3), [#allocation19], 4294967024  ;;  %p5018_p0 = pmov %p5007_p1 }
 0x170   : > { %3952 = dma.done.wait (%p5018_p0), [#allocation22], 16   ;;  %p5019_p2 = pmov %p5018_p0 }
 0x172   : > { %3954 = vsyncadd (%p5019_p2), [#allocation22], 4294967280 }
 0x173   : > { %726 = sfence }
 0x174   : > { %p789_p11 = scmp.lt.s32.totalorder %s3973_s30, 1  ;;  %vm817_vm0 = vcmask 261120   ;;  %s5020_s18 = sld [smem:[#allocation34_spill]]  ;;  %v3999_v26 = vmov 0.0   ;;  %vm4000_vm1 = vmmov 0   ;;  %vm1006_vm10 = vcmask 64512  }
 0x175   : > { %s5021_s9 = sld [smem:[#allocation36_spill]]  ;;  %s3998_s23 = smov 96   ;;  %3090 = vmatprep.subr.bf16.mxu0 %v3999_v26  ;;  %3094 = vmatprep.mubr.msk.bf16.mxu0 %vm4000_vm1, %v3999_v26  ;;  %v4557_v27 = vld [vmem:[#allocation11] ss:$0 sm:$0xff]  ;;  %vm1429_vm13 = vcmask 130048   ;;  %vm1726_vm14 = vcmask 195584  }
 0x176   : > { %s790_s17 = scalar_select %p789_p11, %s3973_s30, 1  ;;  %3098 = vmatprep.subr.bf16.mxu1 %v3999_v26  ;;  %3102 = vmatprep.mubr.msk.bf16.mxu1 %vm4000_vm1, %v3999_v26 }
 0x177   : > { %s800_s6 = sld [smem:[#allocation4]]  ;;  %s2969_s22 = sld [smem:[#allocation4 + $0x1]] }
 0x178   : > { %s3029_s10 = sshll.u32 %s790_s17, 4  ;;  %s4005_s21 = smov 80  }
 0x179   : > { %s4006_s5 = smov 72   ;;  %s4007_s14 = smov 88  }
 0x17a   : > { %s796_s24 = scalar_lea.vmem %s5020_s18, %s3029_s10  ;;  %s5022_s10 = sld [smem:[#allocation42_spill]] }
 0x17b   : > { %v4505_v0 = vld [vmem:[%s796_s24] sm:$0xff]  ;;  %v4507_v1 = vld [vmem:[%s796_s24 + $0x8] sm:$0xff]  ;;  %s4002_s18 = smov 120   ;;  %s4003_s24 = smov 104  }
 0x17c   : > { %v818_v2 = vsel %vm817_vm0, %v4505_v0, 0.0  ;;  %v821_v3 = vsel %vm817_vm0, %v4507_v1, 0.0  ;;  %v4540_v24 = vld [vmem:[%s5021_s9 + $0x8] sm:$0xff]   ;;  %v4545_v25 = vld [vmem:[%s5021_s9] sm:$0xff]   ;;  %s4008_s2 = smov 16   ;;  %s2970_s4 = sld [smem:[#allocation4 + $0x2]] }
 0x17d   : > { %819 = vadd.xlane.f32.xlu0 %v818_v2  ;;  %1099 = vadd.xlane.f32.xlu1 %v818_v2  ;;  %v857_v62 = vstv %s800_s6  ;;  %s4009_s6 = smov 8   ;;  %s2971_s17 = sld [smem:[#allocation4 + $0x3]] }
 0x17e   : > { %s5023_s8 = sld [smem:[#allocation45_spill]]  ;;  %p5028_p9 = scmp.ne.s32.totalorder %s5001_s1, 0 }
 0x181   : > { %822 = vadd.xlane.f32.xlu0 %v821_v3  ;;  %1102 = vadd.xlane.f32.xlu1 %v821_v3 }
 0x20a   : > { %v820_v4 = vpop.xlane.xlu0 %819  ;;  %v1100_v5 = vpop.xlane.xlu1 %1099 }
 0x20b   : > { %v825_v6 = vmul.f32 0.03125, %v820_v4  ;;  %v1105_v7 = vmul.f32 0.03125, %v1100_v5 }
 0x20d   : > { %v4514_v8 = vsub.f32 %v4505_v0, %v825_v6  ;;  %v4517_v9 = vsub.f32 %v4505_v0, %v1105_v7  ;;  %v862_v6 = vstv %s2969_s22  ;;  %s4010_s22 = smov 24  }
 0x20e   : > { %v823_v10 = vpop.xlane.xlu0 %822  ;;  %v1103_v11 = vpop.xlane.xlu1 %1102 }
 0x20f   : > { %v826_v12 = vmul.f32 0.03125, %v823_v10  ;;  %v1106_v13 = vmul.f32 0.03125, %v1103_v11  ;;  %v829_v14 = vmul.f32 %v4514_v8, %v4514_v8  ;;  %v1109_v15 = vmul.f32 %v4517_v9, %v4517_v9 }
 0x210   : > { %v858_v2 = vmul.f32 %v857_v62, %v4514_v8  ;;  %v1138_v10 = vmul.f32 %v4517_v9, %v857_v62 }
 0x211   : > { %v4524_v16 = vsub.f32 %v4507_v1, %v826_v12  ;;  %v4527_v17 = vsub.f32 %v4507_v1, %v1106_v13  ;;  %v831_v18 = vsel %vm817_vm0, %v829_v14, 0.0  ;;  %v1111_v21 = vsel %vm817_vm0, %v1109_v15, 0.0 }
 0x212   : > { %832 = vadd.xlane.f32.xlu0 %v831_v18 }
 0x213   : > { %v830_v19 = vmul.f32 %v4524_v16, %v4524_v16  ;;  %v1110_v20 = vmul.f32 %v4527_v17, %v4527_v17  ;;  %v859_v3 = vmul.f32 %v857_v62, %v4524_v16  ;;  %v1139_v12 = vmul.f32 %v4527_v17, %v857_v62  ;;  %v3462_v17 = vld [vmem:[%s5022_s10] sm:$0xff]  }
 0x214   : > { %3099 = vmatpush3.bf16.msra.mxu1 %v3462_v17 }
 0x215   : > { %v834_v22 = vsel %vm817_vm0, %v830_v19, 0.0  ;;  %v1114_v23 = vsel %vm817_vm0, %v1110_v20, 0.0  ;;  %3100 = vmatprep.subr.bf16.mxu1 %v3999_v26 }
 0x216   : > { %835 = vadd.xlane.f32.xlu1 %v834_v22  ;;  %1112 = vadd.xlane.f32.xlu0 %v1111_v21  ;;  %v3463_v21 = vld [vmem:[%s5022_s10 + $0x8] sm:$0xff]   ;;  %v935_v22 = vld [vmem:[%s4468_s11] sm:$0xff] }
 0x218   : > { %3101 = vmatpush3.bf16.msra.mxu1 %v3463_v21 }
 0x219   : > { %3114 = vmatprep.subr.bf16.mxu1 %v3999_v26 }
 0x21a   : > { %1115 = vadd.xlane.f32.xlu1 %v1114_v23  ;;  %v936_v23 = vld [vmem:[%s4468_s11 + $0x8] sm:$0xff]  ;;  %s4001_s11 = smov 112  }
 0x22b   : > { %883 = vrot.lane.b32.xlu1 %v4540_v24, %s3998_s23 }
 0x22c   : > { %881 = vrot.lane.b32.xlu0 %v4545_v25, %s3998_s23 }
 0x22f   : > { %887 = vrot.lane.b32.xlu1 %v4557_v27, %s3998_s23 }
 0x29f   : > { %v833_v28 = vpop.xlane.xlu0 %832 }
 0x2a0   : > { %v837_v29 = vmul.f32 0.032258064, %v833_v28 }
 0x2a2   : > { %3476 = vrsqrt.f32 %v837_v29  ;;  %vm841_vm2 = vcmp.eq.f32.partialorder %v837_v29, inf  ;;  %v844_v40 = vand.u32 2147483648, %v837_v29  ;;  %vm843_vm3 = vcmp.eq.f32.partialorder %v837_v29, 0.0 }
 0x2a3   : > { %v836_v30 = vpop.xlane.xlu1 %835  ;;  %v1113_v32 = vpop.xlane.xlu0 %1112 }
 0x2a4   : > { %v838_v31 = vmul.f32 0.032258064, %v836_v30  ;;  %v1117_v33 = vmul.f32 0.032258064, %v1113_v32 }
 0x2a6   : > { %3478 = vrsqrt.f32 %v838_v31  ;;  %vm848_vm4 = vcmp.eq.f32.partialorder %v838_v31, inf  ;;  %vm1121_vm5 = vcmp.eq.f32.partialorder %v1117_v33, inf  ;;  %v1124_v46 = vand.u32 2147483648, %v1117_v33 }
 0x2a7   : > { %3480 = vrsqrt.f32 %v1117_v33  ;;  %v1116_v34 = vpop.xlane.xlu1 %1115  ;;  %v882_v36 = vpop.permute.xlu0 %881  ;;  %v851_v48 = vand.u32 2147483648, %v838_v31  ;;  %vm1123_vm6 = vcmp.eq.f32.partialorder %v1117_v33, 0.0  ;;  %vm850_vm7 = vcmp.eq.f32.partialorder %v838_v31, 0.0 }
 0x2a8   : > { %v1118_v35 = vmul.f32 0.032258064, %v1116_v34  ;;  %3091 = vmatpush3.bf16.msra.mxu0 %v882_v36 }
 0x2a9   : > { %3092 = vmatprep.subr.bf16.mxu0 %v3999_v26 }
 0x2aa   : > { %3482 = vrsqrt.f32 %v1118_v35  ;;  %vm1128_vm8 = vcmp.eq.f32.partialorder %v1118_v35, inf  ;;  %v1131_v54 = vand.u32 2147483648, %v1118_v35  ;;  %vm1130_vm9 = vcmp.eq.f32.partialorder %v1118_v35, 0.0 }
 0x2ab   : > { %v884_v37 = vpop.permute.xlu1 %883 }
 0x2ac   : > { %v3477_v38 = vpop.eup %3476  ;;  %3093 = vmatpush3.bf16.msra.mxu0 %v884_v37 }
 0x2ad   : > { %v840_v39 = vmul.f32 %v3477_v38, %v837_v29  ;;  %3106 = vmatprep.subr.bf16.mxu0 %v3999_v26 }
 0x2af   : > { %v842_v42 = vsel %vm841_vm2, %v837_v29, %v840_v39 }
 0x2b0   : > { %v3479_v41 = vpop.eup %3478  ;;  %v845_v44 = vsel %vm843_vm3, %v844_v40, %v842_v42 }
 0x2b1   : > { %v3481_v43 = vpop.eup %3480  ;;  %v847_v45 = vmul.f32 %v3479_v41, %v838_v31  ;;  %v853_v47 = vadd.f32 1e-06, %v845_v44 }
 0x2b2   : > { %v1120_v49 = vmul.f32 %v3481_v43, %v1117_v33 }
 0x2b3   : > { %v849_v50 = vsel %vm848_vm4, %v838_v31, %v847_v45  ;;  %3484 = vrcp.f32 %v853_v47 }
 0x2b4   : > { %v3483_v51 = vpop.eup %3482  ;;  %v852_v52 = vsel %vm850_vm7, %v851_v48, %v849_v50  ;;  %v1122_v53 = vsel %vm1121_vm5, %v1117_v33, %v1120_v49 }
 0x2b5   : > { %v854_v55 = vadd.f32 1e-06, %v852_v52  ;;  %v1125_v56 = vsel %vm1123_vm6, %v1124_v46, %v1122_v53  ;;  %v1127_v57 = vmul.f32 %v3483_v51, %v1118_v35 }
 0x2b6   : > { %v1133_v58 = vadd.f32 1e-06, %v1125_v56 }
 0x2b7   : > { %3486 = vrcp.f32 %v854_v55  ;;  %v1129_v59 = vsel %vm1128_vm8, %v1118_v35, %v1127_v57  ;;  %vm2663_vm8 = vcmask 523264  }
 0x2b8   : > { %3488 = vrcp.f32 %v1133_v58  ;;  %v1132_v60 = vsel %vm1130_vm9, %v1131_v54, %v1129_v59 }
 0x2b9   : > { %v1134_v61 = vadd.f32 1e-06, %v1132_v60 }
 0x2bb   : > { %3490 = vrcp.f32 %v1134_v61 }
 0x2bd   : > { %v3485_v63 = vpop.eup %3484 }
 0x2be   : > { %v860_v4 = vmul.f32 %v3485_v63, %v858_v2  ;;  %v867_v63 = vlaneseq }
 0x2c0   : > { %v863_v13 = vadd.f32 %v862_v6, %v860_v4  ;;  %v868_v2 = vshrl.u32 %v867_v63, 7 }
 0x2c1   : > { %v3487_v5 = vpop.eup %3486 }
 0x2c2   : > { %v3489_v7 = vpop.eup %3488  ;;  %v861_v11 = vmul.f32 %v3487_v5, %v859_v3  ;;  %v1089_v3 = vand.u32 127, %v867_v63  ;;  %v1084_v4 = vadd.s32 8, %v868_v2 }
 0x2c3   : > { %v1140_v15 = vmul.f32 %v3489_v7, %v1138_v10 }
 0x2c4   : > { %v864_v14 = vadd.f32 %v862_v6, %v861_v11  ;;  %vm1090_vm11 = vcmp.ge.s32.totalorder %v868_v2, %v1089_v3  ;;  %vm1091_vm12 = vcmp.ge.s32.totalorder %v1084_v4, %v1089_v3 }
 0x2c5   : > { %v3491_v18 = vpop.eup %3490  ;;  %v1143_v8 = vadd.f32 %v1140_v15, %v862_v6 }
 0x2c6   : > { %v865_v19 = vpack.c.bf16 %v864_v14, %v863_v13  ;;  %v1141_v20 = vmul.f32 %v3491_v18, %v1139_v12 }
 0x2c8   : > { %3095 = vmatmul.mubr.msk.bf16.vlgmr.msra.gmra.mrb[0].mxu0 %vm817_vm0, %v865_v19  ;;  %v1144_v16 = vadd.f32 %v1141_v20, %v862_v6  ;;  %v4004_v6 = vmov -1e+09  }
 0x2c9   : > { %3107 = vmatpush3.bf16.msra.mxu0 %v4545_v25  ;;  %3110 = vmatprep.mubr.msk.bf16.mxu0 %vm4000_vm1, %v3999_v26  ;;  %v888_v25 = vpop.permute.xlu1 %887  ;;  %v1092_v7 = vsel %vm1090_vm11, 0.0, %v4004_v6  ;;  %v1093_v13 = vsel %vm1091_vm12, 0.0, %v4004_v6 }
 0x2ca   : > { %3108 = vmatprep.subr.bf16.mxu0 %v3999_v26  ;;  %v1145_v9 = vpack.c.bf16 %v1144_v16, %v1143_v8 }
 0x2cd   : > { %3109 = vmatpush3.bf16.msra.mxu0 %v4540_v24  ;;  %v942_v24 = vpack.c.bf16 %v936_v23, %v935_v22 }
 0x2ce   : > { %3120 = vmatprep.subr.bf16.mxu0 %v3999_v26 }
 0x2cf   : > { %3103 = vmatmul.mubr.msk.bf16.vlgmr.msra.gmra.mrb[0].mxu1 %vm817_vm0, %v942_v24 }
 0x2d0   : > { %3111 = vmatmul.mubr.msk.bf16.vlgmr.msra.gmra.mrb[4].mxu0 %vm817_vm0, %v1145_v9  ;;  %3116 = vmatprep.mubr.msk.bf16.mxu1 %vm4000_vm1, %v3999_v26 }
 0x2d1   : > { %3122 = vmatprep.mubr.msk.bf16.mxu0 %vm4000_vm1, %v3999_v26 }
 0x39b   : > { %v927_v28 = vpop.f32.mrb[0].mxu0 }
 0x39c   : > { %v3096_v29 = vpop.f32.mrb[1].mxu0  ;;  %v928_v31 = vadd.f32 %v927_v28, %v888_v25 }
 0x39d   : > { %v930_v30 = vpop.f32.mrb[2].mxu0 }
 0x39e   : > { %v931_v32 = vadd.f32 %v930_v30, %v888_v25  ;;  %v3097_v33 = vpop.f32.mrb[3].mxu0 }
 0x3a0   : > { %v4590_v34 = vpack.c.bf16 %v931_v32, %v928_v31 }
 0x3a2   : > { %1007 = vst.msk [vmem:[#allocation2] sm:$0xff] %vm1006_vm10, %v4590_v34  ;;  %1021 = vrot.lane.b32.xlu0 %v4590_v34, %s4001_s11  ;;  %1010 = vrot.lane.b32.xlu1 %v4590_v34, %s4002_s18  ;;  %v998_v44 = vpop.f32.mrb[0].mxu1 }
 0x3a3   : > { %v1201_v35 = vpop.f32.mrb[4].mxu0  ;;  %v3104_v46 = vpop.f32.mrb[1].mxu1 }
 0x3a4   : > { %v3112_v36 = vpop.f32.mrb[5].mxu0  ;;  %v1202_v38 = vadd.f32 %v4557_v27, %v1201_v35  ;;  %v1001_v47 = vpop.f32.mrb[2].mxu1 }
 0x3a5   : > { %v1204_v37 = vpop.f32.mrb[6].mxu0  ;;  %v3105_v49 = vpop.f32.mrb[3].mxu1 }
 0x3a6   : > { %v1205_v39 = vadd.f32 %v4557_v27, %v1204_v37  ;;  %1031 = vrot.lane.b32.xlu1 %v4590_v34, %s4003_s24  ;;  %v3113_v40 = vpop.f32.mrb[7].mxu0  ;;  %v2977_v27 = vld [vmem:[#allocation18] ss:$0 sm:$0xff] }
 0x3a7   : > { %v999_v45 = vadd.f32 %v2977_v27, %v998_v44  ;;  %v1002_v48 = vadd.f32 %v2977_v27, %v1001_v47 }
 0x3a8   : > { %v1216_v41 = vpack.c.bf16 %v1205_v39, %v1202_v38 }
 0x3a9   : > { %v1208_v42 = vld [vmem:[#allocation2] sm:$0xff]  ;;  %v4610_v50 = vpack.c.bf16 %v1002_v48, %v999_v45 }
 0x3aa   : > { %1220 = vrot.lane.b32.xlu1 %v1216_v41, %s4001_s11  ;;  %1218 = vrot.lane.b32.xlu0 %v1216_v41, %s4002_s18  ;;  %v1229_v43 = vsel %vm1006_vm10, %v1208_v42, 0 }
 0x3ab   : > { %3115 = vmatpush3.bf16.xpose.msra.mxu1 %v1229_v43  ;;  %1008 = vst.msk [vmem:[#allocation3] sm:$0xff] %vm1006_vm10, %v4610_v50 }
 0x3ac   : > { %3126 = vmatprep.subr.bf16.mxu1 %v3999_v26 }
 0x3ae   : > { %1222 = vrot.lane.b32.xlu0 %v1216_v41, %s4003_s24 }
 0x3b2   : > { %3117 = vmatmul.mubr.msk.bf16.vlgmr.msra.gmra.mrb[4].mxu1 %vm1006_vm10, %v1216_v41 }
 0x3b3   : > { %3128 = vmatprep.mubr.msk.bf16.mxu1 %vm4000_vm1, %v3999_v26 }
 0x414   : > { %v1022_v51 = vpop.permute.xlu0 %1021  ;;  %v1011_v52 = vpop.permute.xlu1 %1010 }
 0x415   : > { %1025 = vst.msk [vmem:[#allocation2 + $0x10] sm:$0xff] %vm1006_vm10, %v1022_v51  ;;  %1014 = vst.msk [vmem:[#allocation2 + $0x8] sm:$0xff] %vm1006_vm10, %v1011_v52 }
 0x418   : > { %v1032_v53 = vpop.permute.xlu1 %1031 }
 0x419   : > { %1035 = vst.msk [vmem:[#allocation2 + $0x18] sm:$0xff] %vm1006_vm10, %v1032_v53 }
 0x41c   : > { %v1209_v54 = vld [vmem:[#allocation2 + $0x8] sm:$0xff]  ;;  %v1210_v55 = vld [vmem:[#allocation2 + $0x10] sm:$0xff]  ;;  %v1221_v59 = vpop.permute.xlu1 %1220  ;;  %v1219_v60 = vpop.permute.xlu0 %1218 }
 0x41d   : > { %v1276_v56 = vsel %vm1006_vm10, %v1209_v54, 0  ;;  %v1323_v57 = vsel %vm1006_vm10, %v1210_v55, 0 }
 0x41e   : > { %3121 = vmatpush3.bf16.xpose.msra.mxu0 %v1276_v56  ;;  %3127 = vmatpush3.bf16.xpose.msra.mxu1 %v1323_v57 }
 0x41f   : > { %3132 = vmatprep.subr.bf16.mxu0 %v3999_v26  ;;  %3138 = vmatprep.subr.bf16.mxu1 %v3999_v26 }
 0x420   : > { %v1211_v58 = vld [vmem:[#allocation2 + $0x18] sm:$0xff]  ;;  %v1223_v62 = vpop.permute.xlu0 %1222 }
 0x421   : > { %v1370_v61 = vsel %vm1006_vm10, %v1211_v58, 0 }
 0x425   : > { %3123 = vmatmul.mubr.msk.bf16.vlgmr.msra.gmra.mrb[8].mxu0 %vm1006_vm10, %v1219_v60  ;;  %3129 = vmatmul.mubr.msk.bf16.vlgmr.msra.gmra.mrb[8].mxu1 %vm1006_vm10, %v1221_v59 }
 0x426   : > { %3133 = vmatpush3.bf16.xpose.msra.mxu0 %v1370_v61  ;;  %3134 = vmatprep.mubr.msk.bf16.mxu0 %vm4000_vm1, %v3999_v26 }
 0x427   : > { %3140 = vmatprep.mubr.msk.bf16.mxu1 %vm4000_vm1, %v3999_v26  ;;  %3144 = vmatprep.subr.bf16.mxu0 %v3999_v26 }
 0x42d   : > { %3135 = vmatmul.mubr.msk.bf16.vlgmr.msra.gmra.mrb[12].mxu0 %vm1006_vm10, %v1223_v62 }
 0x42e   : > { %3146 = vmatprep.mubr.msk.bf16.mxu0 %vm4000_vm1, %v3999_v26 }
 0x485   : > { %v1265_v5 = vpop.f32.mrb[4].mxu1 }
 0x486   : > { %v1413_v10 = vmul.f32 0.35355338, %v1265_v5  ;;  %v3118_v11 = vpop.f32.mrb[5].mxu1 }
 0x487   : > { %v1268_v12 = vpop.f32.mrb[6].mxu1 }
 0x488   : > { %v1414_v14 = vmul.f32 0.35355338, %v1268_v12  ;;  %v3119_v15 = vpop.f32.mrb[7].mxu1  ;;  %v1421_v18 = vadd.f32 %v1413_v10, %v1092_v7 }
 0x48a   : > { %v1430_v19 = vsel %vm1429_vm13, %v1421_v18, -inf  ;;  %v1422_v20 = vadd.f32 %v1414_v14, %v1093_v13 }
 0x48b   : > { %1431 = vmax.xlane.f32.xlu1 %v1430_v19 }
 0x48c   : > { %v1433_v8 = vsel %vm1429_vm13, %v1422_v20, -inf }
 0x48d   : > { %1434 = vmax.xlane.f32.xlu0 %v1433_v8 }
 0x4f8   : > { %v1312_v16 = vpop.f32.mrb[8].mxu0  ;;  %v1359_v9 = vpop.f32.mrb[8].mxu1 }
 0x4f9   : > { %v1415_v17 = vmul.f32 0.35355338, %v1312_v16  ;;  %v1417_v21 = vmul.f32 0.35355338, %v1359_v9  ;;  %v3124_v22 = vpop.f32.mrb[9].mxu0  ;;  %v3130_v23 = vpop.f32.mrb[9].mxu1 }
 0x4fa   : > { %v1315_v24 = vpop.f32.mrb[10].mxu0  ;;  %v1362_v25 = vpop.f32.mrb[10].mxu1 }
 0x4fb   : > { %v1416_v28 = vmul.f32 0.35355338, %v1315_v24  ;;  %v3125_v29 = vpop.f32.mrb[11].mxu0  ;;  %v3131_v30 = vpop.f32.mrb[11].mxu1  ;;  %v1425_v31 = vadd.f32 %v1417_v21, %v1092_v7  ;;  %v1423_v32 = vadd.f32 %v1415_v17, %v1092_v7  ;;  %v1418_v33 = vmul.f32 0.35355338, %v1362_v25 }
 0x4fd   : > { %v1442_v35 = vsel %vm1429_vm13, %v1425_v31, -inf  ;;  %v1436_v36 = vsel %vm1429_vm13, %v1423_v32, -inf  ;;  %v1424_v37 = vadd.f32 %v1416_v28, %v1093_v13  ;;  %v1426_v42 = vadd.f32 %v1418_v33, %v1093_v13 }
 0x4fe   : > { %1443 = vmax.xlane.f32.xlu1 %v1442_v35  ;;  %1437 = vmax.xlane.f32.xlu0 %v1436_v36 }
 0x4ff   : > { %v1439_v41 = vsel %vm1429_vm13, %v1424_v37, -inf  ;;  %v1445_v46 = vsel %vm1429_vm13, %v1426_v42, -inf }
 0x500   : > { %v1406_v38 = vpop.f32.mrb[12].mxu0 }
 0x501   : > { %v1419_v39 = vmul.f32 0.35355338, %v1406_v38  ;;  %v3136_v40 = vpop.f32.mrb[13].mxu0 }
 0x502   : > { %1440 = vmax.xlane.f32.xlu0 %v1439_v41  ;;  %v1409_v43 = vpop.f32.mrb[14].mxu0 }
 0x503   : > { %v1420_v27 = vmul.f32 0.35355338, %v1409_v43  ;;  %v3137_v44 = vpop.f32.mrb[15].mxu0  ;;  %v1427_v45 = vadd.f32 %v1419_v39, %v1092_v7 }
 0x505   : > { %v1448_v47 = vsel %vm1429_vm13, %v1427_v45, -inf  ;;  %v1428_v48 = vadd.f32 %v1420_v27, %v1093_v13 }
 0x506   : > { %1446 = vmax.xlane.f32.xlu0 %v1445_v46  ;;  %1449 = vmax.xlane.f32.xlu1 %v1448_v47 }
 0x507   : > { %v1451_v49 = vsel %vm1429_vm13, %v1428_v48, -inf }
 0x50a   : > { %1452 = vmax.xlane.f32.xlu0 %v1451_v49 }
 0x517   : > { %1041 = vrot.lane.b32.xlu1 %v4590_v34, %s3998_s23 }
 0x518   : > { %v1432_v54 = vpop.xlane.xlu1 %1431 }
 0x519   : > { %v1454_v55 = vsub.f32 %v1421_v18, %v1432_v54 }
 0x51a   : > { %v1435_v51 = vpop.xlane.xlu0 %1434 }
 0x51b   : > { %v1455_v52 = vsub.f32 %v1422_v20, %v1435_v51  ;;  %v1462_v57 = vmul.f32 1.442695, %v1454_v55 }
 0x51d   : > { %v1464_v53 = vmul.f32 1.442695, %v1455_v52 }
 0x51f   : > { %3492 = vpow2.f32 %v1464_v53 }
 0x520   : > { %3494 = vpow2.f32 %v1462_v57 }
 0x529   : > { %v4642_v56 = vpop.eup %3492 }
 0x52a   : > { %v1481_v58 = vsel %vm1429_vm13, %v4642_v56, 0.0  ;;  %v4646_v59 = vpop.eup %3494 }
 0x52b   : > { %1482 = vadd.xlane.f32.xlu0 %v1481_v58  ;;  %v1478_v60 = vsel %vm1429_vm13, %v4646_v59, 0.0 }
 0x53b   : > { %1479 = vadd.xlane.f32.xlu1 %v1478_v60 }
 0x58b   : > { %v1444_v61 = vpop.xlane.xlu1 %1443  ;;  %v1438_v62 = vpop.xlane.xlu0 %1437 }
 0x58c   : > { %v1458_v63 = vsub.f32 %v1425_v31, %v1444_v61  ;;  %v1456_v2 = vsub.f32 %v1423_v32, %v1438_v62 }
 0x58e   : > { %v1466_v3 = vmul.f32 1.442695, %v1456_v2  ;;  %v1470_v4 = vmul.f32 1.442695, %v1458_v63 }
 0x58f   : > { %v1441_v5 = vpop.xlane.xlu0 %1440 }
 0x590   : > { %v1457_v6 = vsub.f32 %v1424_v37, %v1441_v5  ;;  %3496 = vpow2.f32 %v1466_v3 }
 0x591   : > { %3498 = vpow2.f32 %v1470_v4 }
 0x592   : > { %v1468_v7 = vmul.f32 1.442695, %v1457_v6 }
 0x593   : > { %v1447_v10 = vpop.xlane.xlu0 %1446  ;;  %v1450_v11 = vpop.xlane.xlu1 %1449 }
 0x594   : > { %3500 = vpow2.f32 %v1468_v7  ;;  %v1459_v12 = vsub.f32 %v1426_v42, %v1447_v10  ;;  %v1460_v13 = vsub.f32 %v1427_v45, %v1450_v11  ;;  %v3464_v11 = vld [vmem:[#allocation12] sm:$0xff]  }
 0x596   : > { %v1472_v14 = vmul.f32 1.442695, %v1459_v12  ;;  %v1474_v15 = vmul.f32 1.442695, %v1460_v13  ;;  %v3465_v12 = vld [vmem:[#allocation12 + $0x8] sm:$0xff]  }
 0x597   : > { %v1042_v18 = vpop.permute.xlu1 %1041  ;;  %v1453_v19 = vpop.xlane.xlu0 %1452 }
 0x598   : > { %3502 = vpow2.f32 %v1472_v14  ;;  %1045 = vst.msk [vmem:[#allocation2 + $0x20] sm:$0xff] %vm1006_vm10, %v1042_v18  ;;  %v1461_v20 = vsub.f32 %v1428_v48, %v1453_v19 }
 0x599   : > { %3504 = vpow2.f32 %v1474_v15 }
 0x59a   : > { %v1476_v8 = vmul.f32 1.442695, %v1461_v20  ;;  %v4651_v16 = vpop.eup %3496 }
 0x59b   : > { %v1484_v9 = vsel %vm1429_vm13, %v4651_v16, 0.0  ;;  %v3499_v17 = vpop.eup %3498 }
 0x59c   : > { %3506 = vpow2.f32 %v1476_v8  ;;  %1485 = vadd.xlane.f32.xlu1 %v1484_v9  ;;  %v1490_v24 = vsel %vm1429_vm13, %v3499_v17, 0.0 }
 0x59e   : > { %v3501_v21 = vpop.eup %3500 }
 0x59f   : > { %v1212_v22 = vld [vmem:[#allocation2 + $0x20] sm:$0xff]  ;;  %v1487_v23 = vsel %vm1429_vm13, %v3501_v21, 0.0 }
 0x5a0   : > { %3139 = vmatpush3.bf16.msra.mxu1 %v1212_v22  ;;  %1488 = vadd.xlane.f32.xlu0 %v1487_v23 }
 0x5a1   : > { %1491 = vadd.xlane.f32.xlu1 %v1490_v24  ;;  %3150 = vmatprep.subr.bf16.mxu1 %v3999_v26 }
 0x5a2   : > { %v3503_v25 = vpop.eup %3502 }
 0x5a3   : > { %v4658_v28 = vpop.eup %3504  ;;  %v1493_v29 = vsel %vm1429_vm13, %v3503_v25, 0.0 }
 0x5a4   : > { %v1496_v30 = vsel %vm1429_vm13, %v4658_v28, 0.0  ;;  %1494 = vadd.xlane.f32.xlu0 %v1493_v29 }
 0x5a5   : > { %1497 = vadd.xlane.f32.xlu1 %v1496_v30 }
 0x5a6   : > { %v3507_v31 = vpop.eup %3506 }
 0x5a7   : > { %v1499_v32 = vsel %vm1429_vm13, %v3507_v31, 0.0 }
 0x5a8   : > { %1500 = vadd.xlane.f32.xlu0 %v1499_v32 }
 0x5b6   : > { %1061 = vrot.lane.b32.xlu1 %v4590_v34, %s4005_s21 }
 0x5b8   : > { %v1483_v33 = vpop.xlane.xlu0 %1482 }
 0x5b9   : > { %3508 = vrcp.f32 %v1483_v33 }
 0x5ba   : > { %1071 = vrot.lane.b32.xlu1 %v4590_v34, %s4006_s5 }
 0x5be   : > { %1051 = vrot.lane.b32.xlu0 %v4590_v34, %s4007_s14 }
 0x5c3   : > { %v3509_v36 = vpop.eup %3508 }
 0x5c4   : > { %v1511_v38 = vmul.f32 %v3509_v36, %v4642_v56 }
 0x5c8   : > { %v1480_v35 = vpop.xlane.xlu1 %1479 }
 0x5c9   : > { %3510 = vrcp.f32 %v1480_v35 }
 0x5d3   : > { %v3511_v37 = vpop.eup %3510 }
 0x5d4   : > { %v1510_v39 = vmul.f32 %v3511_v37, %v4646_v59 }
 0x5d6   : > { %v1518_v40 = vpack.c.bf16 %v1511_v38, %v1510_v39 }
 0x5d8   : > { %3141 = vmatmul.mubr.msk.bf16.vlgmr.msra.gmra.mrb[12].mxu1 %vm1429_vm13, %v1518_v40 }
 0x5d9   : > { %3152 = vmatprep.mubr.msk.bf16.mxu1 %vm4000_vm1, %v3999_v26 }
 0x629   : > { %v1486_v41 = vpop.xlane.xlu1 %1485 }
 0x62d   : > { %v1489_v42 = vpop.xlane.xlu0 %1488 }
 0x62e   : > { %v1492_v43 = vpop.xlane.xlu1 %1491 }
 0x62f   : > { %3512 = vrcp.f32 %v1492_v43 }
 0x630   : > { %3514 = vrcp.f32 %v1489_v42 }
 0x631   : > { %v1495_v34 = vpop.xlane.xlu0 %1494 }
 0x632   : > { %v1498_v27 = vpop.xlane.xlu1 %1497  ;;  %3516 = vrcp.f32 %v1495_v34  ;;  %v1913_v34 = vld [vmem:[#allocation3] sm:$0xff] }
 0x633   : > { %3518 = vrcp.f32 %v1486_v41 }
 0x635   : > { %v1501_v44 = vpop.xlane.xlu0 %1500 }
 0x636   : > { %v1062_v45 = vpop.permute.xlu1 %1061  ;;  %3520 = vrcp.f32 %v1501_v44  ;;  %v1933_v44 = vsel %vm1006_vm10, %v1913_v34, 0 }
 0x637   : > { %1065 = vst.msk [vmem:[#allocation2 + $0x30] sm:$0xff] %vm1006_vm10, %v1062_v45  ;;  %3522 = vrcp.f32 %v1498_v27  ;;  %v2992_v45 = vld [vmem:[#allocation14] ss:$0 sm:$0xff] }
 0x639   : > { %v1052_v46 = vpop.permute.xlu0 %1051  ;;  %v3513_v47 = vpop.eup %3512 }
 0x63a   : > { %v1072_v48 = vpop.permute.xlu1 %1071  ;;  %1055 = vst.msk [vmem:[#allocation2 + $0x28] sm:$0xff] %vm1006_vm10, %v1052_v46  ;;  %v3515_v49 = vpop.eup %3514  ;;  %v1514_v52 = vmul.f32 %v3513_v47, %v3499_v17 }
 0x63b   : > { %1075 = vst.msk [vmem:[#allocation2 + $0x38] sm:$0xff] %vm1006_vm10, %v1072_v48  ;;  %v1513_v56 = vmul.f32 %v3515_v49, %v3501_v21 }
 0x63c   : > { %v3517_v51 = vpop.eup %3516 }
 0x63d   : > { %v1515_v53 = vmul.f32 %v3517_v51, %v3503_v25  ;;  %v3519_v54 = vpop.eup %3518 }
 0x63e   : > { %v1214_v55 = vld [vmem:[#allocation2 + $0x30] sm:$0xff]  ;;  %v1512_v58 = vmul.f32 %v3519_v54, %v4651_v16 }
 0x63f   : > { %3151 = vmatpush3.bf16.msra.mxu1 %v1214_v55  ;;  %v1520_v57 = vpack.c.bf16 %v1515_v53, %v1514_v52 }
 0x640   : > { %3162 = vmatprep.subr.bf16.mxu1 %v3999_v26  ;;  %v1519_v60 = vpack.c.bf16 %v1513_v56, %v1512_v58  ;;  %v3521_v61 = vpop.eup %3520 }
 0x641   : > { %v1213_v59 = vld [vmem:[#allocation2 + $0x28] sm:$0xff]  ;;  %v3523_v63 = vpop.eup %3522  ;;  %v1517_v2 = vmul.f32 %v3521_v61, %v3507_v31 }
 0x642   : > { %3153 = vmatmul.mubr.msk.bf16.vlgmr.msra.gmra.mrb[16].mxu1 %vm1429_vm13, %v1520_v57  ;;  %3145 = vmatpush3.bf16.msra.mxu0 %v1213_v59  ;;  %v1215_v62 = vld [vmem:[#allocation2 + $0x38] sm:$0xff]  ;;  %v1516_v3 = vmul.f32 %v3523_v63, %v4658_v28 }
 0x643   : > { %3156 = vmatprep.subr.bf16.mxu0 %v3999_v26  ;;  %3166 = vmatprep.mubr.msk.bf16.mxu1 %vm4000_vm1, %v3999_v26 }
 0x644   : > { %v1521_v4 = vpack.c.bf16 %v1517_v2, %v1516_v3  ;;  %3163 = vmatpush3.bf16.msra.mxu1 %v3464_v11 }
 0x645   : > { %3147 = vmatmul.mubr.msk.bf16.vlgmr.msra.gmra.mrb[16].mxu0 %vm1429_vm13, %v1519_v60  ;;  %3164 = vmatprep.subr.bf16.mxu1 %v3999_v26 }
 0x646   : > { %3157 = vmatpush3.bf16.msra.mxu0 %v1215_v62  ;;  %3158 = vmatprep.mubr.msk.bf16.mxu0 %vm4000_vm1, %v3999_v26 }
 0x647   : > { %3170 = vmatprep.subr.bf16.mxu0 %v3999_v26 }
 0x648   : > { %3165 = vmatpush3.bf16.msra.mxu1 %v3465_v12 }
 0x649   : > { %3178 = vmatprep.subr.bf16.mxu1 %v3999_v26 }
 0x64d   : > { %3159 = vmatmul.mubr.msk.bf16.vlgmr.msra.gmra.mrb[20].mxu0 %vm1429_vm13, %v1521_v4 }
 0x64e   : > { %3174 = vmatprep.mubr.msk.bf16.mxu0 %vm4000_vm1, %v3999_v26 }
 0x6ab   : > { %v1559_v5 = vpop.f32.mrb[12].mxu1 }
 0x6ac   : > { %v3142_v6 = vpop.f32.mrb[13].mxu1 }
 0x6ad   : > { %v1562_v7 = vpop.f32.mrb[14].mxu1  ;;  %v3467_v6 = vld [vmem:[#allocation15 + $0x8] sm:$0xff]  }
 0x6ae   : > { %v3143_v10 = vpop.f32.mrb[15].mxu1 }
 0x715   : > { %v1647_v13 = vpop.f32.mrb[16].mxu1 }
 0x716   : > { %v3154_v14 = vpop.f32.mrb[17].mxu1 }
 0x717   : > { %v1650_v15 = vpop.f32.mrb[18].mxu1 }
 0x718   : > { %v3435_v18 = vpack.i.bf16 %v1650_v15, %v1647_v13  ;;  %v3155_v19 = vpop.f32.mrb[19].mxu1  ;;  %v1603_v20 = vpop.f32.mrb[16].mxu0 }
 0x719   : > { %v3148_v8 = vpop.f32.mrb[17].mxu0 }
 0x71a   : > { %3436 = vrot.lane.b32.xlu0 %v3435_v18, %s4008_s2  ;;  %v1606_v16 = vpop.f32.mrb[18].mxu0 }
 0x71b   : > { %v3430_v9 = vpack.i.bf16 %v1606_v16, %v1603_v20  ;;  %v3149_v17 = vpop.f32.mrb[19].mxu0 }
 0x71d   : > { %3431 = vrot.lane.b32.xlu1 %v3430_v9, %s4009_s6 }
 0x720   : > { %v1691_v21 = vpop.f32.mrb[20].mxu0 }
 0x721   : > { %v3160_v22 = vpop.f32.mrb[21].mxu0 }
 0x722   : > { %v1694_v23 = vpop.f32.mrb[22].mxu0 }
 0x723   : > { %v3440_v24 = vpack.i.bf16 %v1694_v23, %v1691_v21  ;;  %v3161_v25 = vpop.f32.mrb[23].mxu0 }
 0x725   : > { %3441 = vrot.lane.b32.xlu1 %v3440_v24, %s4010_s22  ;;  %v1837_v24 = vstv %s2970_s4 }
 0x78c   : > { %v3437_v31 = vpop.permute.xlu0 %3436 }
 0x78d   : > { %v3439_v35 = vunpack.i.h.bf16 %v3437_v31  ;;  %v3438_v36 = vunpack.i.l.bf16 %v3437_v31 }
 0x78f   : > { %v3432_v28 = vpop.permute.xlu1 %3431 }
 0x790   : > { %v3434_v29 = vunpack.i.h.bf16 %v3432_v28  ;;  %v3433_v30 = vunpack.i.l.bf16 %v3432_v28 }
 0x792   : > { %v1723_v32 = vsel %vm1006_vm10, %v1562_v7, %v3434_v29  ;;  %v1722_v33 = vsel %vm1006_vm10, %v1559_v5, %v3433_v30  ;;  %v3466_v5 = vld [vmem:[#allocation15] sm:$0xff]  }
 0x793   : > { %v1724_v40 = vsel %vm1429_vm13, %v1722_v33, %v3438_v36  ;;  %v1725_v41 = vsel %vm1429_vm13, %v1723_v32, %v3439_v35  ;;  %3171 = vmatpush3.bf16.msra.mxu0 %v3466_v5  ;;  %v1842_v32 = vstv %s2971_s17 }
 0x794   : > { %3172 = vmatprep.subr.bf16.mxu0 %v3999_v26 }
 0x797   : > { %v3442_v37 = vpop.permute.xlu1 %3441  ;;  %3173 = vmatpush3.bf16.msra.mxu0 %v3467_v6 }
 0x798   : > { %v3444_v38 = vunpack.i.h.bf16 %v3442_v37  ;;  %v3443_v39 = vunpack.i.l.bf16 %v3442_v37  ;;  %3184 = vmatprep.subr.bf16.mxu0 %v3999_v26 }
 0x79a   : > { %v1728_v42 = vsel %vm1726_vm14, %v1725_v41, %v3444_v38  ;;  %v1727_v43 = vsel %vm1726_vm14, %v1724_v40, %v3443_v39  ;;  %v2996_v40 = vld [vmem:[#allocation17] ss:$0 sm:$0xff] }
 0x79b   : > { %v1734_v27 = vpack.c.bf16 %v1728_v42, %v1727_v43 }
 0x79d   : > { %3167 = vmatmul.mubr.msk.bf16.vlgmr.msra.gmra.mrb[20].mxu1 %vm817_vm0, %v1734_v27 }
 0x79e   : > { %3179 = vmatpush3.bf16.xpose.msra.mxu1 %v1933_v44  ;;  %3180 = vmatprep.mubr.msk.bf16.mxu1 %vm4000_vm1, %v3999_v26 }
 0x79f   : > { %3190 = vmatprep.subr.bf16.mxu1 %v3999_v26 }
 0x870   : > { %v1790_v46 = vpop.f32.mrb[20].mxu1 }
 0x871   : > { %v1791_v47 = vadd.f32 %v2992_v45, %v1790_v46  ;;  %v3168_v48 = vpop.f32.mrb[21].mxu1 }
 0x872   : > { %v1793_v49 = vpop.f32.mrb[22].mxu1 }
 0x873   : > { %v4709_v51 = vadd.f32 %v1791_v47, %v4505_v0  ;;  %v1794_v52 = vadd.f32 %v2992_v45, %v1793_v49  ;;  %v3169_v53 = vpop.f32.mrb[23].mxu1 }
 0x875   : > { %v4712_v54 = vadd.f32 %v1794_v52, %v4507_v1  ;;  %v1799_v55 = vsel %vm817_vm0, %v4709_v51, 0.0 }
 0x876   : > { %1800 = vadd.xlane.f32.xlu0 %v1799_v55 }
 0x877   : > { %v1802_v56 = vsel %vm817_vm0, %v4712_v54, 0.0 }
 0x878   : > { %1803 = vadd.xlane.f32.xlu1 %v1802_v56 }
 0x889   : > { %1026 = vrot.lane.b32.xlu1 %v4610_v50, %s4001_s11 }
 0x88d   : > { %1036 = vrot.lane.b32.xlu1 %v4610_v50, %s4003_s24 }
 0x903   : > { %v1801_v0 = vpop.xlane.xlu0 %1800 }
 0x904   : > { %v1805_v57 = vmul.f32 0.03125, %v1801_v0  ;;  %v3004_v0 = vld [vmem:[%s689_s20] ss:$0 sm:$0xff] }
 0x905   : > { %v1804_v58 = vpop.xlane.xlu1 %1803 }
 0x906   : > { %v1807_v1 = vsub.f32 %v4709_v51, %v1805_v57  ;;  %v1806_v59 = vmul.f32 0.03125, %v1804_v58 }
 0x908   : > { %v1808_v60 = vsub.f32 %v4712_v54, %v1806_v59  ;;  %v1809_v61 = vmul.f32 %v1807_v1, %v1807_v1  ;;  %v1838_v28 = vmul.f32 %v1837_v24, %v1807_v1 }
 0x909   : > { %v1027_v62 = vpop.permute.xlu1 %1026 }
 0x90a   : > { %1030 = vst.msk [vmem:[#allocation3 + $0x10] sm:$0xff] %vm1006_vm10, %v1027_v62  ;;  %v1811_v63 = vsel %vm817_vm0, %v1809_v61, 0.0  ;;  %v1810_v2 = vmul.f32 %v1808_v60, %v1808_v60  ;;  %v1839_v29 = vmul.f32 %v1837_v24, %v1808_v60 }
 0x90b   : > { %1812 = vadd.xlane.f32.xlu0 %v1811_v63 }
 0x90c   : > { %v1814_v4 = vsel %vm817_vm0, %v1810_v2, 0.0 }
 0x90d   : > { %v1037_v3 = vpop.permute.xlu1 %1036 }
 0x90e   : > { %1040 = vst.msk [vmem:[#allocation3 + $0x18] sm:$0xff] %vm1006_vm10, %v1037_v3 }
 0x90f   : > { %1815 = vadd.xlane.f32.xlu0 %v1814_v4 }
 0x911   : > { %v1915_v46 = vld [vmem:[#allocation3 + $0x10] sm:$0xff] }
 0x912   : > { %v2027_v47 = vsel %vm1006_vm10, %v1915_v46, 0 }
 0x915   : > { %v1916_v48 = vld [vmem:[#allocation3 + $0x18] sm:$0xff] }
 0x916   : > { %v2074_v53 = vsel %vm1006_vm10, %v1916_v48, 0 }
 0x925   : > { %1016 = vrot.lane.b32.xlu0 %v4610_v50, %s4002_s18 }
 0x998   : > { %v1813_v7 = vpop.xlane.xlu0 %1812 }
 0x999   : > { %v1817_v10 = vmul.f32 0.032258064, %v1813_v7 }
 0x99b   : > { %3524 = vrsqrt.f32 %v1817_v10  ;;  %vm1821_vm15 = vcmp.eq.f32.partialorder %v1817_v10, inf  ;;  %v1824_v18 = vand.u32 2147483648, %v1817_v10  ;;  %vm1823_vm2 = vcmp.eq.f32.partialorder %v1817_v10, 0.0 }
 0x99c   : > { %v1816_v11 = vpop.xlane.xlu0 %1815 }
 0x99d   : > { %v1818_v12 = vmul.f32 0.032258064, %v1816_v11 }
 0x99f   : > { %3526 = vrsqrt.f32 %v1818_v12  ;;  %vm1828_vm3 = vcmp.eq.f32.partialorder %v1818_v12, inf  ;;  %v1831_v17 = vand.u32 2147483648, %v1818_v12  ;;  %vm1830_vm4 = vcmp.eq.f32.partialorder %v1818_v12, 0.0 }
 0x9a0   : > { %v1017_v13 = vpop.permute.xlu0 %1016 }
 0x9a1   : > { %1020 = vst.msk [vmem:[#allocation3 + $0x8] sm:$0xff] %vm1006_vm10, %v1017_v13 }
 0x9a5   : > { %v3525_v14 = vpop.eup %3524 }
 0x9a6   : > { %v1820_v15 = vmul.f32 %v3525_v14, %v1817_v10 }
 0x9a8   : > { %v1822_v19 = vsel %vm1821_vm15, %v1817_v10, %v1820_v15  ;;  %v1914_v37 = vld [vmem:[#allocation3 + $0x8] sm:$0xff] }
 0x9a9   : > { %v3527_v20 = vpop.eup %3526  ;;  %v1825_v8 = vsel %vm1823_vm2, %v1824_v18, %v1822_v19  ;;  %v1980_v39 = vsel %vm1006_vm10, %v1914_v37, 0 }
 0x9aa   : > { %v1833_v16 = vadd.f32 1e-06, %v1825_v8  ;;  %v1827_v9 = vmul.f32 %v3527_v20, %v1818_v12 }
 0x9ac   : > { %3528 = vrcp.f32 %v1833_v16  ;;  %v1829_v21 = vsel %vm1828_vm3, %v1818_v12, %v1827_v9 }
 0x9ad   : > { %v1832_v22 = vsel %vm1830_vm4, %v1831_v17, %v1829_v21 }
 0x9ae   : > { %v1834_v23 = vadd.f32 1e-06, %v1832_v22 }
 0x9b0   : > { %3530 = vrcp.f32 %v1834_v23 }
 0x9b6   : > { %v3529_v25 = vpop.eup %3528 }
 0x9b7   : > { %v1840_v30 = vmul.f32 %v3529_v25, %v1838_v28 }
 0x9b9   : > { %v1843_v35 = vadd.f32 %v1842_v32, %v1840_v30 }
 0x9ba   : > { %v3531_v31 = vpop.eup %3530 }
 0x9bb   : > { %v1841_v33 = vmul.f32 %v3531_v31, %v1839_v29 }
 0x9bd   : > { %v1844_v36 = vadd.f32 %v1842_v32, %v1841_v33 }
 0x9bf   : > { %v1850_v38 = vpack.c.bf16 %v1844_v36, %v1843_v35 }
 0x9c1   : > { %3175 = vmatmul.mubr.msk.bf16.vlgmr.msra.gmra.mrb[24].mxu0 %vm817_vm0, %v1850_v38 }
 0x9c2   : > { %3185 = vmatpush3.bf16.xpose.msra.mxu0 %v1980_v39  ;;  %3186 = vmatprep.mubr.msk.bf16.mxu0 %vm4000_vm1, %v3999_v26 }
 0x9c3   : > { %3196 = vmatprep.subr.bf16.mxu0 %v3999_v26 }
 0xa94   : > { %v1906_v41 = vpop.f32.mrb[24].mxu0 }
 0xa95   : > { %v3176_v42 = vpop.f32.mrb[25].mxu0  ;;  %v1907_v34 = vadd.f32 %v2996_v40, %v1906_v41 }
 0xa96   : > { %v1909_v43 = vpop.f32.mrb[26].mxu0 }
 0xa97   : > { %v1910_v27 = vadd.f32 %v2996_v40, %v1909_v43  ;;  %v3177_v44 = vpop.f32.mrb[27].mxu0 }
 0xa99   : > { %v1921_v45 = vpack.c.bf16 %v1910_v27, %v1907_v34 }
 0xa9b   : > { %1925 = vrot.lane.b32.xlu0 %v1921_v45, %s4001_s11  ;;  %1923 = vrot.lane.b32.xlu1 %v1921_v45, %s4002_s18  ;;  %s5025_s18 = sld [smem:[#allocation46_spill]]  ;;  %s4011_s11 = smov [#allocation23]  }
 0xa9c   : > { %3181 = vmatmul.mubr.msk.bf16.vlgmr.msra.gmra.mrb[24].mxu1 %vm1006_vm10, %v1921_v45 }
 0xa9d   : > { %3191 = vmatpush3.bf16.xpose.msra.mxu1 %v2027_v47  ;;  %3192 = vmatprep.mubr.msk.bf16.mxu1 %vm4000_vm1, %v3999_v26 }
 0xa9e   : > { %3202 = vmatprep.subr.bf16.mxu1 %v3999_v26 }
 0xa9f   : > { %1927 = vrot.lane.b32.xlu1 %v1921_v45, %s4003_s24 }
 0xb0d   : > { %v1926_v49 = vpop.permute.xlu0 %1925  ;;  %v1924_v52 = vpop.permute.xlu1 %1923 }
 0xb0e   : > { %3187 = vmatmul.mubr.msk.bf16.vlgmr.msra.gmra.mrb[28].mxu0 %vm1006_vm10, %v1924_v52  ;;  %3193 = vmatmul.mubr.msk.bf16.vlgmr.msra.gmra.mrb[28].mxu1 %vm1006_vm10, %v1926_v49 }
 0xb0f   : > { %3197 = vmatpush3.bf16.xpose.msra.mxu0 %v2074_v53  ;;  %3198 = vmatprep.mubr.msk.bf16.mxu0 %vm4000_vm1, %v3999_v26 }
 0xb10   : > { %3208 = vmatprep.subr.bf16.mxu0 %v3999_v26  ;;  %3204 = vmatprep.mubr.msk.bf16.mxu1 %vm4000_vm1, %v3999_v26 }
 0xb11   : > { %v1928_v55 = vpop.permute.xlu1 %1927 }
 0xb16   : > { %3199 = vmatmul.mubr.msk.bf16.vlgmr.msra.gmra.mrb[32].mxu0 %vm1006_vm10, %v1928_v55 }
 0xb17   : > { %3210 = vmatprep.mubr.msk.bf16.mxu0 %vm4000_vm1, %v3999_v26 }
 0xb6f   : > { %v1969_v56 = vpop.f32.mrb[24].mxu1 }
 0xb70   : > { %v2117_v57 = vmul.f32 0.35355338, %v1969_v56  ;;  %v3182_v58 = vpop.f32.mrb[25].mxu1 }
 0xb71   : > { %v1972_v1 = vpop.f32.mrb[26].mxu1 }
 0xb72   : > { %v2118_v59 = vmul.f32 0.35355338, %v1972_v1  ;;  %v3183_v60 = vpop.f32.mrb[27].mxu1  ;;  %v2131_v61 = vadd.f32 %v3004_v0, %v2117_v57 }
 0xb74   : > { %v2139_v62 = vsel %vm1429_vm13, %v2131_v61, -inf  ;;  %v2132_v63 = vadd.f32 %v3004_v0, %v2118_v59 }
 0xb75   : > { %2140 = vmax.xlane.f32.xlu0 %v2139_v62 }
 0xb76   : > { %v2142_v2 = vsel %vm1429_vm13, %v2132_v63, -inf }
 0xb77   : > { %2143 = vmax.xlane.f32.xlu1 %v2142_v2 }
 0xbe1   : > { %v2016_v3 = vpop.f32.mrb[28].mxu0  ;;  %v2063_v4 = vpop.f32.mrb[28].mxu1 }
 0xbe2   : > { %v2119_v5 = vmul.f32 0.35355338, %v2016_v3  ;;  %v3188_v6 = vpop.f32.mrb[29].mxu0  ;;  %v3194_v7 = vpop.f32.mrb[29].mxu1  ;;  %v2121_v19 = vmul.f32 0.35355338, %v2063_v4 }
 0xbe3   : > { %v2019_v10 = vpop.f32.mrb[30].mxu0  ;;  %v2066_v11 = vpop.f32.mrb[30].mxu1 }
 0xbe4   : > { %v2120_v12 = vmul.f32 0.35355338, %v2019_v10  ;;  %v2122_v13 = vmul.f32 0.35355338, %v2066_v11  ;;  %v3189_v14 = vpop.f32.mrb[31].mxu0  ;;  %v3195_v15 = vpop.f32.mrb[31].mxu1  ;;  %v2133_v18 = vadd.f32 %v3004_v0, %v2119_v5  ;;  %v2135_v24 = vadd.f32 %v3004_v0, %v2121_v19 }
 0xbe6   : > { %v2145_v20 = vsel %vm1429_vm13, %v2133_v18, -inf  ;;  %v2136_v8 = vadd.f32 %v3004_v0, %v2122_v13  ;;  %v2134_v16 = vadd.f32 %v3004_v0, %v2120_v12  ;;  %v2151_v30 = vsel %vm1429_vm13, %v2135_v24, -inf }
 0xbe7   : > { %2146 = vmax.xlane.f32.xlu0 %v2145_v20 }
 0xbe8   : > { %v2154_v9 = vsel %vm1429_vm13, %v2136_v8, -inf  ;;  %v2148_v23 = vsel %vm1429_vm13, %v2134_v16, -inf }
 0xbe9   : > { %2155 = vmax.xlane.f32.xlu1 %v2154_v9  ;;  %v2110_v17 = vpop.f32.mrb[32].mxu0 }
 0xbea   : > { %v2123_v21 = vmul.f32 0.35355338, %v2110_v17  ;;  %v3200_v22 = vpop.f32.mrb[33].mxu0 }
 0xbeb   : > { %2149 = vmax.xlane.f32.xlu0 %v2148_v23  ;;  %v2113_v25 = vpop.f32.mrb[34].mxu0 }
 0xbec   : > { %v2124_v28 = vmul.f32 0.35355338, %v2113_v25  ;;  %v3201_v29 = vpop.f32.mrb[35].mxu0  ;;  %v2137_v32 = vadd.f32 %v3004_v0, %v2123_v21 }
 0xbee   : > { %v2138_v31 = vadd.f32 %v3004_v0, %v2124_v28  ;;  %v2157_v35 = vsel %vm1429_vm13, %v2137_v32, -inf }
 0xbef   : > { %2152 = vmax.xlane.f32.xlu0 %v2151_v30 }
 0xbf0   : > { %v2160_v33 = vsel %vm1429_vm13, %v2138_v31, -inf }
 0xbf1   : > { %2161 = vmax.xlane.f32.xlu1 %v2160_v33 }
 0xbf3   : > { %2158 = vmax.xlane.f32.xlu0 %v2157_v35 }
 0xc02   : > { %v2141_v36 = vpop.xlane.xlu0 %2140 }
 0xc03   : > { %v2163_v37 = vsub.f32 %v2131_v61, %v2141_v36 }
 0xc04   : > { %v2144_v38 = vpop.xlane.xlu1 %2143 }
 0xc05   : > { %v2171_v39 = vmul.f32 1.442695, %v2163_v37  ;;  %v2164_v40 = vsub.f32 %v2132_v63, %v2144_v38 }
 0xc07   : > { %3532 = vpow2.f32 %v2171_v39  ;;  %v2173_v41 = vmul.f32 1.442695, %v2164_v40 }
 0xc09   : > { %3534 = vpow2.f32 %v2173_v41 }
 0xc11   : > { %v4767_v42 = vpop.eup %3532 }
 0xc12   : > { %v2187_v43 = vsel %vm1429_vm13, %v4767_v42, 0.0 }
 0xc13   : > { %v4771_v34 = vpop.eup %3534  ;;  %2188 = vadd.xlane.f32.xlu0 %v2187_v43 }
 0xc14   : > { %v2190_v27 = vsel %vm1429_vm13, %v4771_v34, 0.0 }
 0xc15   : > { %2191 = vadd.xlane.f32.xlu1 %v2190_v27 }
 0xc74   : > { %v2147_v44 = vpop.xlane.xlu0 %2146 }
 0xc75   : > { %v2165_v45 = vsub.f32 %v2133_v18, %v2147_v44 }
 0xc76   : > { %v2156_v46 = vpop.xlane.xlu1 %2155 }
 0xc77   : > { %v2175_v47 = vmul.f32 1.442695, %v2165_v45  ;;  %v2168_v48 = vsub.f32 %v2136_v8, %v2156_v46 }
 0xc78   : > { %v2150_v49 = vpop.xlane.xlu0 %2149 }
 0xc79   : > { %3536 = vpow2.f32 %v2175_v47  ;;  %v2166_v52 = vsub.f32 %v2134_v16, %v2150_v49  ;;  %v2181_v53 = vmul.f32 1.442695, %v2168_v48 }
 0xc7b   : > { %v2177_v55 = vmul.f32 1.442695, %v2166_v52 }
 0xc7c   : > { %v2153_v56 = vpop.xlane.xlu0 %2152 }
 0xc7d   : > { %3538 = vpow2.f32 %v2177_v55  ;;  %v2167_v0 = vsub.f32 %v2135_v24, %v2153_v56 }
 0xc7e   : > { %3540 = vpow2.f32 %v2181_v53  ;;  %v2162_v10 = vpop.xlane.xlu1 %2161 }
 0xc7f   : > { %v2179_v57 = vmul.f32 1.442695, %v2167_v0  ;;  %v2170_v11 = vsub.f32 %v2138_v31, %v2162_v10 }
 0xc80   : > { %v2159_v58 = vpop.xlane.xlu0 %2158 }
 0xc81   : > { %3542 = vpow2.f32 %v2179_v57  ;;  %v2169_v1 = vsub.f32 %v2137_v32, %v2159_v58  ;;  %v2185_v12 = vmul.f32 1.442695, %v2170_v11 }
 0xc83   : > { %v3537_v59 = vpop.eup %3536  ;;  %v2183_v60 = vmul.f32 1.442695, %v2169_v1  ;;  %v3468_v1 = vld [vmem:[#allocation20] sm:$0xff]  }
 0xc84   : > { %v2193_v61 = vsel %vm1429_vm13, %v3537_v59, 0.0 }
 0xc85   : > { %3544 = vpow2.f32 %v2183_v60  ;;  %2194 = vadd.xlane.f32.xlu0 %v2193_v61 }
 0xc86   : > { %3546 = vpow2.f32 %v2185_v12 }
 0xc87   : > { %v3539_v62 = vpop.eup %3538 }
 0xc88   : > { %v2196_v63 = vsel %vm1429_vm13, %v3539_v62, 0.0  ;;  %v4777_v2 = vpop.eup %3540 }
 0xc89   : > { %2197 = vadd.xlane.f32.xlu1 %v2196_v63  ;;  %v2202_v5 = vsel %vm1429_vm13, %v4777_v2, 0.0 }
 0xc8b   : > { %v3543_v3 = vpop.eup %3542 }
 0xc8c   : > { %v2199_v4 = vsel %vm1429_vm13, %v3543_v3, 0.0 }
 0xc8d   : > { %2200 = vadd.xlane.f32.xlu0 %v2199_v4  ;;  %2203 = vadd.xlane.f32.xlu1 %v2202_v5 }
 0xc8f   : > { %v4782_v6 = vpop.eup %3544 }
 0xc90   : > { %v2205_v7 = vsel %vm1429_vm13, %v4782_v6, 0.0  ;;  %v3547_v13 = vpop.eup %3546 }
 0xc91   : > { %2206 = vadd.xlane.f32.xlu0 %v2205_v7  ;;  %v2208_v14 = vsel %vm1429_vm13, %v3547_v13, 0.0 }
 0xc9e   : > { %1056 = vrot.lane.b32.xlu1 %v4610_v50, %s4007_s14  ;;  %s5026_s14 = sld [smem:[#allocation48_spill]] }
 0xca0   : > { %v2189_v15 = vpop.xlane.xlu0 %2188 }
 0xca2   : > { %1066 = vrot.lane.b32.xlu1 %v4610_v50, %s4005_s21  ;;  %v2192_v18 = vpop.xlane.xlu1 %2191  ;;  %s5024_s21 = sld [smem:[#allocation47_spill]] }
 0xca7   : > { %1046 = vrot.lane.b32.xlu0 %v4610_v50, %s3998_s23  ;;  %s5027_s23 = sld [smem:[#allocation49_spill]] }
 0xcc6   : > { %2209 = vadd.xlane.f32.xlu1 %v2208_v14 }
 0xcd7   : > { %1076 = vrot.lane.b32.xlu1 %v4610_v50, %s4006_s5 }
 0xd12   : > { %v2195_v19 = vpop.xlane.xlu0 %2194 }
 0xd16   : > { %v2198_v20 = vpop.xlane.xlu1 %2197 }
 0xd17   : > { %3548 = vrcp.f32 %v2198_v20 }
 0xd18   : > { %3550 = vrcp.f32 %v2195_v19 }
 0xd19   : > { %3552 = vrcp.f32 %v2192_v18 }
 0xd1a   : > { %v2201_v8 = vpop.xlane.xlu0 %2200  ;;  %v2204_v16 = vpop.xlane.xlu1 %2203  ;;  %3554 = vrcp.f32 %v2189_v15 }
 0xd1b   : > { %3556 = vrcp.f32 %v2201_v8 }
 0xd1c   : > { %3558 = vrcp.f32 %v2204_v16 }
 0xd1e   : > { %v2207_v9 = vpop.xlane.xlu0 %2206  ;;  %v1057_v17 = vpop.permute.xlu1 %1056 }
 0xd1f   : > { %1060 = vst.msk [vmem:[#allocation3 + $0x28] sm:$0xff] %vm1006_vm10, %v1057_v17  ;;  %3560 = vrcp.f32 %v2207_v9 }
 0xd21   : > { %v3549_v21 = vpop.eup %3548 }
 0xd22   : > { %v1047_v22 = vpop.permute.xlu0 %1046  ;;  %v1067_v23 = vpop.permute.xlu1 %1066  ;;  %v2222_v50 = vmul.f32 %v3549_v21, %v3539_v62 }
 0xd23   : > { %v3551_v24 = vpop.eup %3550  ;;  %1050 = vst.msk [vmem:[#allocation3 + $0x20] sm:$0xff] %vm1006_vm10, %v1047_v22  ;;  %1070 = vst.msk [vmem:[#allocation3 + $0x30] sm:$0xff] %vm1006_vm10, %v1067_v23 }
 0xd24   : > { %v3553_v25 = vpop.eup %3552  ;;  %v2221_v28 = vmul.f32 %v3551_v24, %v3537_v59 }
 0xd25   : > { %v3555_v30 = vpop.eup %3554  ;;  %v2220_v31 = vmul.f32 %v3553_v25, %v4771_v34 }
 0xd26   : > { %v1918_v29 = vld [vmem:[#allocation3 + $0x28] sm:$0xff]  ;;  %v2228_v32 = vpack.c.bf16 %v2222_v50, %v2221_v28  ;;  %v2219_v33 = vmul.f32 %v3555_v30, %v4767_v42  ;;  %v3557_v36 = vpop.eup %3556  ;;  %v3009_v50 = vld [vmem:[#allocation21] ss:$0 sm:$0xff] }
 0xd27   : > { %3209 = vmatpush3.bf16.msra.mxu0 %v1918_v29  ;;  %v3559_v38 = vpop.eup %3558  ;;  %v2223_v40 = vmul.f32 %v3557_v36, %v3543_v3  ;;  %v3469_v3 = vld [vmem:[#allocation20 + $0x8] sm:$0xff]  }
 0xd28   : > { %3220 = vmatprep.subr.bf16.mxu0 %v3999_v26  ;;  %v2227_v37 = vpack.c.bf16 %v2220_v31, %v2219_v33  ;;  %v2224_v41 = vmul.f32 %v3559_v38, %v4777_v2 }
 0xd29   : > { %v3561_v27 = vpop.eup %3560 }
 0xd2a   : > { %3211 = vmatmul.mubr.msk.bf16.vlgmr.msra.gmra.mrb[36].mxu0 %vm1429_vm13, %v2228_v32  ;;  %v1917_v35 = vld [vmem:[#allocation3 + $0x20] sm:$0xff]  ;;  %v1919_v39 = vld [vmem:[#allocation3 + $0x30] sm:$0xff]  ;;  %v2229_v42 = vpack.c.bf16 %v2224_v41, %v2223_v40  ;;  %v2225_v45 = vmul.f32 %v3561_v27, %v4782_v6 }
 0xd2b   : > { %3203 = vmatpush3.bf16.msra.mxu1 %v1917_v35  ;;  %3222 = vmatprep.mubr.msk.bf16.mxu0 %vm4000_vm1, %v3999_v26 }
 0xd2c   : > { %3214 = vmatprep.subr.bf16.mxu1 %v3999_v26 }
 0xd2e   : > { %3205 = vmatmul.mubr.msk.bf16.vlgmr.msra.gmra.mrb[32].mxu1 %vm1429_vm13, %v2227_v37 }
 0xd2f   : > { %3215 = vmatpush3.bf16.msra.mxu1 %v1919_v39  ;;  %3216 = vmatprep.mubr.msk.bf16.mxu1 %vm4000_vm1, %v3999_v26 }
 0xd30   : > { %3226 = vmatprep.subr.bf16.mxu1 %v3999_v26 }
 0xd36   : > { %3217 = vmatmul.mubr.msk.bf16.vlgmr.msra.gmra.mrb[36].mxu1 %vm1429_vm13, %v2229_v42 }
 0xd37   : > { %3230 = vmatprep.mubr.msk.bf16.mxu1 %vm4000_vm1, %v3999_v26  ;;  %3227 = vmatpush3.bf16.msra.mxu1 %v3468_v1 }
 0xd38   : > { %3228 = vmatprep.subr.bf16.mxu1 %v3999_v26 }
 0xd3b   : > { %3229 = vmatpush3.bf16.msra.mxu1 %v3469_v3 }
 0xd3c   : > { %3242 = vmatprep.subr.bf16.mxu1 %v3999_v26 }
 0xd53   : > { %v2210_v43 = vpop.xlane.xlu1 %2209 }
 0xd54   : > { %3562 = vrcp.f32 %v2210_v43 }
 0xd57   : > { %v1077_v34 = vpop.permute.xlu1 %1076 }
 0xd58   : > { %1080 = vst.msk [vmem:[#allocation3 + $0x38] sm:$0xff] %vm1006_vm10, %v1077_v34 }
 0xd5e   : > { %v3563_v44 = vpop.eup %3562 }
 0xd5f   : > { %v2226_v46 = vmul.f32 %v3563_v44, %v3547_v13  ;;  %v1920_v47 = vld [vmem:[#allocation3 + $0x38] sm:$0xff]  ;;  %v3470_v44 = vld [vmem:[%s5023_s8] sm:$0xff]  }
 0xd60   : > { %3221 = vmatpush3.bf16.msra.mxu0 %v1920_v47  ;;  %v3473_v47 = vld [vmem:[%s5024_s21 + $0x8] sm:$0xff]  }
 0xd61   : > { %v2230_v48 = vpack.c.bf16 %v2226_v46, %v2225_v45  ;;  %3234 = vmatprep.subr.bf16.mxu0 %v3999_v26  ;;  %v3471_v45 = vld [vmem:[%s5023_s8 + $0x8] sm:$0xff]   ;;  %v3472_v46 = vld [vmem:[%s5024_s21] sm:$0xff]  }
 0xd63   : > { %3223 = vmatmul.mubr.msk.bf16.vlgmr.msra.gmra.mrb[40].mxu0 %vm1429_vm13, %v2230_v48 }
 0xd64   : > { %3238 = vmatprep.mubr.msk.bf16.mxu0 %vm4000_vm1, %v3999_v26  ;;  %3235 = vmatpush3.bf16.msra.mxu0 %v3470_v44 }
 0xd65   : > { %3236 = vmatprep.subr.bf16.mxu0 %v3999_v26 }
 0xd68   : > { %3237 = vmatpush3.bf16.msra.mxu0 %v3471_v45 }
 0xdfd   : > { %v2312_v49 = vpop.f32.mrb[36].mxu0 }
 0xdfe   : > { %v3212_v52 = vpop.f32.mrb[37].mxu0 }
 0xdff   : > { %v2315_v53 = vpop.f32.mrb[38].mxu0 }
 0xe00   : > { %v3445_v55 = vpack.i.bf16 %v2315_v53, %v2312_v49  ;;  %v3213_v56 = vpop.f32.mrb[39].mxu0 }
 0xe01   : > { %v2268_v0 = vpop.f32.mrb[32].mxu1 }
 0xe02   : > { %v3206_v57 = vpop.f32.mrb[33].mxu1  ;;  %3446 = vrot.lane.b32.xlu0 %v3445_v55, %s4009_s6 }
 0xe03   : > { %v2271_v58 = vpop.f32.mrb[34].mxu1 }
 0xe04   : > { %v3207_v59 = vpop.f32.mrb[35].mxu1 }
 0xe09   : > { %v2356_v60 = vpop.f32.mrb[36].mxu1 }
 0xe0a   : > { %v3218_v61 = vpop.f32.mrb[37].mxu1 }
 0xe0b   : > { %v2359_v62 = vpop.f32.mrb[38].mxu1 }
 0xe0c   : > { %v3450_v63 = vpack.i.bf16 %v2359_v62, %v2356_v60  ;;  %v3219_v2 = vpop.f32.mrb[39].mxu1 }
 0xe0e   : > { %3451 = vrot.lane.b32.xlu1 %v3450_v63, %s4008_s2  ;;  %s2972_s2 = sld [smem:[#allocation4 + $0x4]] }
 0xe14   : > { %v2545_v3 = vstv %s2972_s2  ;;  %s3030_s2 = sshll.u32 %s3973_s30, 8  ;;  %s2713_s30 = scalar_lea.sflag [#allocation6], %s4462_s12 }
 0xe15   : > { %s4883_s15 = scalar_lea.hbm %s5027_s23, %s3030_s2 }
 0xe36   : > { %v2400_v4 = vpop.f32.mrb[40].mxu0 }
 0xe37   : > { %v3224_v5 = vpop.f32.mrb[41].mxu0 }
 0xe38   : > { %v2403_v6 = vpop.f32.mrb[42].mxu0 }
 0xe39   : > { %v3455_v7 = vpack.i.bf16 %v2403_v6, %v2400_v4  ;;  %v3225_v10 = vpop.f32.mrb[43].mxu0 }
 0xe3b   : > { %3456 = vrot.lane.b32.xlu0 %v3455_v7, %s4010_s22  ;;  %s2973_s22 = sld [smem:[#allocation4 + $0x5]] }
 0xe74   : > { %v3447_v11 = vpop.permute.xlu0 %3446 }
 0xe75   : > { %v3449_v13 = vunpack.i.h.bf16 %v3447_v11  ;;  %v3448_v14 = vunpack.i.l.bf16 %v3447_v11  ;;  %v2550_v11 = vstv %s2973_s22  ;;  %s787_s22 = scalar_lea.vmem [#allocation23], %s2957_s7 }
 0xe76   : > { %s2728_s4 = sshll.u32 %s787_s22, 4  ;;  %s4887_s4 = int_to_ptr.vmem [resolvable:$true] %s2728_s4 }
 0xe77   : > { %v2432_v20 = vsel %vm1006_vm10, %v2271_v58, %v3449_v13  ;;  %v2431_v8 = vsel %vm1006_vm10, %v2268_v0, %v3448_v14  ;;  %s3871_s7 = scalar_lea.vmem %s4887_s4, 256 }
 0xe78   : > { %p3872_p1 = scmp.ne.s32.totalorder %s4887_s4, %s3871_s7 }
 0xe7a   : > { %p3873_p6 = pnand %p3872_p1, %p5028_p9 }
 0xe7c   : > { %p3874_p7 = pneg %p3873_p6 }
 0xe80   : > { %v3452_v12 = vpop.permute.xlu1 %3451 }
 0xe81   : > { %v3454_v15 = vunpack.i.h.bf16 %v3452_v12  ;;  %v3453_v18 = vunpack.i.l.bf16 %v3452_v12 }
 0xe83   : > { %v2433_v17 = vsel %vm1429_vm13, %v2431_v8, %v3453_v18  ;;  %v2434_v21 = vsel %vm1429_vm13, %v2432_v20, %v3454_v15  ;;  %v3474_v18 = vld [vmem:[%s5024_s21 + $0x10] sm:$0xff]   ;;  %v3013_v20 = vld [vmem:[%s5025_s18] ss:$0 sm:$0xff]  ;;  %s3875_s18 = sshll.u32 %s4011_s11, 4  ;;  %s3876_s18 = int_to_ptr.vmem [resolvable:$false] %s3875_s18 }
 0xe84   : > { %s3877_s24 = scalar_lea.vmem %s3876_s18, 512  ;;  %p3878_p8 = scmp.lt.s32.totalorder %s4887_s4, %s3876_s18 }
 0xe85   : > { %p3879_p10 = scmp.lt.s32.totalorder %s3877_s24, %s3871_s7 }
 0xe87   : > { %p3880_p12 = por %p3879_p10, %p3878_p8 }
 0xe89   : > { %p3881_p4 = pnand %p3880_p12, %p3874_p7 }
 0xead   : > { %v3457_v19 = vpop.permute.xlu0 %3456 }
 0xeae   : > { %v3459_v16 = vunpack.i.h.bf16 %v3457_v19  ;;  %v3458_v9 = vunpack.i.l.bf16 %v3457_v19  ;;  %v3475_v19 = vld [vmem:[%s5024_s21 + $0x18] sm:$0xff]  }
 0xeb0   : > { %v2436_v22 = vsel %vm1726_vm14, %v2434_v21, %v3459_v16  ;;  %v2435_v23 = vsel %vm1726_vm14, %v2433_v17, %v3458_v9 }
 0xeb1   : > { %v2442_v24 = vpack.c.bf16 %v2436_v22, %v2435_v23 }
 0xeb3   : > { %3231 = vmatmul.mubr.msk.bf16.vlgmr.msra.gmra.mrb[40].mxu1 %vm817_vm0, %v2442_v24 }
 0xeb4   : > { %3250 = vmatprep.mubr.msk.bf16.mxu1 %vm4000_vm1, %v3999_v26  ;;  %3243 = vmatpush3.bf16.msra.mxu1 %v3472_v46 }
 0xeb5   : > { %3244 = vmatprep.subr.bf16.mxu1 %v3999_v26 }
 0xeb8   : > { %3245 = vmatpush3.bf16.msra.mxu1 %v3473_v47 }
 0xeb9   : > { %3246 = vmatprep.subr.bf16.mxu1 %v3999_v26 }
 0xebc   : > { %3247 = vmatpush3.bf16.msra.mxu1 %v3474_v18 }
 0xebd   : > { %3248 = vmatprep.subr.bf16.mxu1 %v3999_v26 }
 0xec0   : > { %3249 = vmatpush3.bf16.msra.mxu1 %v3475_v19 }
 0xf86   : > { %v2498_v25 = vpop.f32.mrb[40].mxu1 }
 0xf87   : > { %v2499_v28 = vadd.f32 %v3009_v50, %v2498_v25  ;;  %v3232_v29 = vpop.f32.mrb[41].mxu1 }
 0xf88   : > { %v2501_v30 = vpop.f32.mrb[42].mxu1 }
 0xf89   : > { %v4834_v31 = vadd.f32 %v2499_v28, %v4709_v51  ;;  %v2502_v32 = vadd.f32 %v3009_v50, %v2501_v30  ;;  %v3233_v33 = vpop.f32.mrb[43].mxu1  ;;  %v3017_v50 = vld [vmem:[%s5026_s14] ss:$0 sm:$0xff] }
 0xf8b   : > { %v4837_v35 = vadd.f32 %v2502_v32, %v4712_v54  ;;  %v2507_v36 = vsel %vm817_vm0, %v4834_v31, 0.0 }
 0xf8c   : > { %2508 = vadd.xlane.f32.xlu1 %v2507_v36 }
 0xf8d   : > { %v2510_v37 = vsel %vm817_vm0, %v4837_v35, 0.0 }
 0xf8e   : > { %2511 = vadd.xlane.f32.xlu0 %v2510_v37 }
0x1019   : > { %v2509_v38 = vpop.xlane.xlu1 %2508 }
0x101a   : > { %v2513_v39 = vmul.f32 0.03125, %v2509_v38 }
0x101b   : > { %v2512_v40 = vpop.xlane.xlu0 %2511 }
0x101c   : > { %v2515_v41 = vsub.f32 %v4834_v31, %v2513_v39  ;;  %v2514_v51 = vmul.f32 0.03125, %v2512_v40 }
0x101e   : > { %v2516_v42 = vsub.f32 %v4837_v35, %v2514_v51  ;;  %v2517_v43 = vmul.f32 %v2515_v41, %v2515_v41  ;;  %v2546_v5 = vmul.f32 %v2545_v3, %v2515_v41 }
0x1020   : > { %v2519_v54 = vsel %vm817_vm0, %v2517_v43, 0.0  ;;  %v2518_v34 = vmul.f32 %v2516_v42, %v2516_v42  ;;  %v2547_v6 = vmul.f32 %v2545_v3, %v2516_v42 }
0x1021   : > { %2520 = vadd.xlane.f32.xlu0 %v2519_v54 }
0x1022   : > { %v2522_v27 = vsel %vm817_vm0, %v2518_v34, 0.0 }
0x1025   : > { %2523 = vadd.xlane.f32.xlu0 %v2522_v27 }
0x10ae   : > { %v2521_v48 = vpop.xlane.xlu0 %2520 }
0x10af   : > { %v2525_v49 = vmul.f32 0.032258064, %v2521_v48 }
0x10b1   : > { %3564 = vrsqrt.f32 %v2525_v49  ;;  %vm2529_vm1 = vcmp.eq.f32.partialorder %v2525_v49, inf  ;;  %v2532_v0 = vand.u32 2147483648, %v2525_v49  ;;  %vm2531_vm5 = vcmp.eq.f32.partialorder %v2525_v49, 0.0 }
0x10b2   : > { %v2524_v52 = vpop.xlane.xlu0 %2523 }
0x10b3   : > { %v2526_v53 = vmul.f32 0.032258064, %v2524_v52 }
0x10b5   : > { %3566 = vrsqrt.f32 %v2526_v53  ;;  %vm2536_vm6 = vcmp.eq.f32.partialorder %v2526_v53, inf  ;;  %v2539_v61 = vand.u32 2147483648, %v2526_v53  ;;  %vm2538_vm7 = vcmp.eq.f32.partialorder %v2526_v53, 0.0 }
0x10bb   : > { %v3565_v55 = vpop.eup %3564 }
0x10bc   : > { %v2528_v56 = vmul.f32 %v3565_v55, %v2525_v49 }
0x10be   : > { %v2530_v57 = vsel %vm2529_vm1, %v2525_v49, %v2528_v56 }
0x10bf   : > { %v3567_v58 = vpop.eup %3566  ;;  %v2533_v1 = vsel %vm2531_vm5, %v2532_v0, %v2530_v57 }
0x10c0   : > { %v2541_v59 = vadd.f32 1e-06, %v2533_v1  ;;  %v2535_v60 = vmul.f32 %v3567_v58, %v2526_v53 }
0x10c2   : > { %3568 = vrcp.f32 %v2541_v59  ;;  %v2537_v62 = vsel %vm2536_vm6, %v2526_v53, %v2535_v60 }
0x10c3   : > { %v2540_v63 = vsel %vm2538_vm7, %v2539_v61, %v2537_v62 }
0x10c4   : > { %v2542_v2 = vadd.f32 1e-06, %v2540_v63 }
0x10c6   : > { %3570 = vrcp.f32 %v2542_v2 }
0x10cc   : > { %v3569_v4 = vpop.eup %3568 }
0x10cd   : > { %v2548_v7 = vmul.f32 %v3569_v4, %v2546_v5 }
0x10cf   : > { %v2551_v13 = vadd.f32 %v2550_v11, %v2548_v7 }
0x10d0   : > { %v3571_v10 = vpop.eup %3570 }
0x10d1   : > { %v2549_v12 = vmul.f32 %v3571_v10, %v2547_v6 }
0x10d3   : > { %v2552_v14 = vadd.f32 %v2550_v11, %v2549_v12 }
0x10d5   : > { %v2558_v15 = vpack.c.bf16 %v2552_v14, %v2551_v13 }
0x10d7   : > { %3239 = vmatmul.mubr.msk.bf16.vlgmr.msra.gmra.mrb[44].mxu0 %vm817_vm0, %v2558_v15 }
0x11aa   : > { %v2614_v8 = vpop.f32.mrb[44].mxu0 }
0x11ab   : > { %v2615_v16 = vadd.f32 %v3013_v20, %v2614_v8  ;;  %v3240_v9 = vpop.f32.mrb[45].mxu0 }
0x11ac   : > { %v2617_v17 = vpop.f32.mrb[46].mxu0 }
0x11ad   : > { %v2618_v21 = vadd.f32 %v3013_v20, %v2617_v17  ;;  %v3241_v22 = vpop.f32.mrb[47].mxu0  ;;  %v2621_v23 = vmax.f32 %v2615_v16, 0.0 }
0x11af   : > { %v2622_v24 = vmax.f32 %v2618_v21, 0.0 }
0x11b1   : > { %v2632_v26 = vpack.c.bf16 %v2622_v24, %v2621_v23 }
0x11b3   : > { %3251 = vmatmul.mubr.msk.bf16.vlgmr.msra.gmra.mrb[44].mxu1 %vm2663_vm8, %v2632_v26 }
0x1286   : > { %v2701_v25 = vpop.f32.mrb[44].mxu1 }
0x1287   : > { %v2702_v28 = vadd.f32 %v3017_v50, %v2701_v25  ;;  %v3252_v29 = vpop.f32.mrb[45].mxu1 }
0x1288   : > { %v2704_v30 = vpop.f32.mrb[46].mxu1 }
0x1289   : > { %v2708_v32 = vadd.f32 %v2702_v28, %v4834_v31  ;;  %v2705_v33 = vadd.f32 %v3017_v50, %v2704_v30  ;;  %v3253_v36 = vpop.f32.mrb[47].mxu1 }
0x128b   : > { %2710 = vst.msk [vmem:[%s787_s22] sm:$0xff] %vm817_vm0, %v2708_v32  ;;  %v2709_v37 = vadd.f32 %v2705_v33, %v4837_v35 }
0x128d   : > { %2711 = vst.msk [vmem:[%s787_s22 + $0x8] sm:$0xff] %vm817_vm0, %v2709_v37 }
0x128e   : > { %3884 = shalt.err (!%p3881_p4)
}
0x128f   : > { %s3885_s5 = scalar_lea.hbm %s4883_s15, 256  ;;  %s3889_s22 = scalar_lea.hbm %s5027_s23, 512 }
0x1290   : > { %p3886_p13 = scmp.ne.s32.totalorder %s4883_s15, %s3885_s5  ;;  %p3890_p0 = scmp.lt.u32.totalorder %s4883_s15, %s5027_s23 }
0x1291   : > { %p3891_p2 = scmp.lt.u32.totalorder %s3889_s22, %s3885_s5  ;;  %p3893_p1 = scmp.lt.u32.totalorder %s3885_s5, %s4883_s15 }
0x1292   : > { %p3887_p5 = pnand %p3886_p13, %p5028_p9 }
0x1293   : > { %p3892_p11 = por %p3891_p2, %p3890_p0 }
0x1294   : > { %p3888_p3 = pneg %p3887_p5 }
0x1295   : > { %p3894_p6 = por %p3893_p1, %p3892_p11 }
0x1297   : > { %p3895_p7 = pnand %p3894_p6, %p3888_p3 }
0x1299   : > { %3898 = shalt.err (!%p3895_p7)
}
0x129a   : > { %s4012_s7 = smov 128  }
0x129b   : > { %3294 = dma.vmem_to_hbm [thread:$0]  (%p5028_p9), %s4887_s4, 256, %s4883_s15, %s2713_s30, %s4012_s7, %s4012_s7, %s4009_s6  }
0x129c PF: > { %s2743_s11 = sand.u32 1, %s3961_s27   ;;  %p5029_p8 = scmp.ne.s32.totalorder %s5002_s16, 0 }
0x129d   : > { %p5030_p10 = scmp.ge.s32.totalorder %s3981_s19, 2  ;;  %s2744_s18 = scalar_lea.sflag [#allocation6], %s2743_s11 }
0x129f   : > { %p3332_p12 = pnand %p5030_p10, %p5029_p8 }
0x12a1   : > { %3956 = dma.done.wait (!%p3332_p12), %s2744_s18, 256  }
0x12a2   : > { %3958 = vsyncadd (!%p3332_p12), %s2744_s18, 4294967040  ;;  %s42_s19 = sadd.s32 1, %s3981_s19   ;;  %s5031_s27 = smov %s3965_s28 }
0x12a3   : > { %p39_p4 = scmp.ge.s32.totalorder %s42_s19, 4   ;;  %s5032_s28 = smov %s3969_s29 }
0x12a4   : > { %s5033_s29 = smov %s4374_s25  ;;  %s5034_s30 = smov %s3977_s0 }
0x12a5   : > { %s5035_s0 = smov %s5037_s26  ;;  %41 = sbr.rel (!%p39_p4) target bundleno = 31 (0x1f), region = 208 }
0x12ac   :  { %2749 = vsyncpa [#allocation5], 1 }
0x12ad   :  { %2751 = vsyncpa [#allocation5 + $0x1], 1 }
0x12ae   :  { %2752 = vsyncpa [#allocation10], 1 }
0x12af   :  { %2754 = vsyncpa [#allocation10 + $0x1], 1 }
0x12b0   :  { %2755 = vsyncpa [#allocation13], 1 }
0x12b1   :  { %2756 = vsyncpa [#allocation16], 1 }
0x12b2   :  { %2757 = vsyncpa [#allocation19], 1 }
0x12b3   :  { %2758 = vsyncpa [#allocation22], 1 }
0x12b4   :  { %2759 = vsyncpa [#allocation6], 1 }
0x12b5   :  { %2761 = vsyncpa [#allocation6 + $0x1], 1 }
0x12b6   :  { %2762 = vsyncpa [#allocation7], 1 }
0x12b7   :  { %2764 = vsyncpa [#allocation7 + $0x1], 1 }

</bundles_post_ra>
